<compile_context>
chip_gen: v5e
topology: v5e:2x2
jax: 0.10.0
libtpu: 0.0.40
codegen_flags: <defaults>
</compile_context>

<pallas_src>
import functools

import jax
import jax.numpy as jnp
from jax.experimental import pallas as pl
from jax.experimental.pallas import tpu as pltpu

# Module hyper-parameters (COLOR_CHANNELS / FRAME_STACK_SIZE not given in the
# snippet; small deterministic values consistent with the model).
COLOR_CHANNELS = 3
FRAME_STACK_SIZE = 4
NUM_ACTIONS = 2

FC2_NPAD = 128                   # lane-dense fc2 output, sliced to NUM_ACTIONS
VMEM_LIMIT = 32 * 1024 * 1024    # per-call scoped VMEM; safe on v5e/v6e/v7x


def _out_sz(n, k, s):
    return (n - k) // s + 1


def _conv_geom(H, W, k, s):
    """Geometry of one conv layer in the space-to-depth packing."""
    Ho, Wo = _out_sz(H, k, s), _out_sz(W, k, s)
    kp = (k - 1) // s + 1            # kernel extent in s2d macro-pixels
    Hs = Ho + kp                     # macro rows kept (incl. flat-shift spill row)
    Ws = Wo + kp - 1                 # macro cols kept
    return Ho, Wo, kp, Hs, Ws


# ----------------------------------------------------------------------------
# Pallas kernels
# ----------------------------------------------------------------------------
def _conv_s2d_kernel(x_ref, w_ref, b_ref, o_ref, *, kp, Ws, M):
    """One image: out = SiLU(conv(x)), via kp*kp shifted row-window matmuls.

    x_ref : (1, L, Cs)        s2d-packed input rows (L = Hs*Ws), bf16
    w_ref : (kp*kp, Cs, Cout) packed weight slabs, bf16 (VMEM resident)
    b_ref : (1, Cout)         f32 bias
    o_ref : (1, M, Cout)      output rows (M = Ho*Ws), bf16
    """
    x = x_ref[0]                                            # (L, Cs)
    acc = None
    for di in range(kp):                                    # in-kernel patch extraction
        for dj in range(kp):
            off = di * Ws + dj                              # static shift
            xs = x[off:off + M, :]                          # contiguous row window
            part = jnp.dot(xs, w_ref[di * kp + dj],
                           preferred_element_type=jnp.float32)
            acc = part if acc is None else acc + part
    acc = acc + b_ref[...]
    acc = acc * jax.nn.sigmoid(acc)                         # SiLU in f32
    o_ref[0] = acc.astype(o_ref.dtype)


def _head_kernel(x_ref, w3_ref, b3_ref, w1_ref, b1_ref, w2_ref, b2_ref, o_ref,
                 *, kp, Ws, M):
    """conv3 + flatten + fc1 + SiLU + fc2 for one batch element (all in VMEM)."""
    x = x_ref[0]                                            # (L3, Cs3)
    acc = None
    for di in range(kp):                                    # conv3 patch extraction
        for dj in range(kp):
            off = di * Ws + dj
            xs = x[off:off + M, :]
            part = jnp.dot(xs, w3_ref[di * kp + dj],
                           preferred_element_type=jnp.float32)
            acc = part if acc is None else acc + part
    h3 = acc + b3_ref[...]
    h3 = (h3 * jax.nn.sigmoid(h3)).astype(w1_ref.dtype)     # (M, C3) bf16

    # fc1: NCHW flatten folded into per-spatial-slot weight slabs
    # (slots for garbage columns have zero weights).
    acc1 = None
    for p in range(M):
        part = jnp.dot(h3[p:p + 1, :], w1_ref[p],
                       preferred_element_type=jnp.float32)
        acc1 = part if acc1 is None else acc1 + part        # (1, 512)
    h1 = acc1 + b1_ref[...]
    h1 = (h1 * jax.nn.sigmoid(h1)).astype(w2_ref.dtype)

    y = jnp.dot(h1, w2_ref[...], preferred_element_type=jnp.float32) + b2_ref[...]
    o_ref[0] = y.astype(o_ref.dtype)                        # (1, FC2_NPAD) f32


# ----------------------------------------------------------------------------
# pallas_call wrappers
# ----------------------------------------------------------------------------
def conv_s2d(x_s2d, w, b, *, Ho, Ws, kp):
    """x_s2d: (B, L, Cs) bf16, w: (kp*kp, Cs, Cout) bf16, b: (1, Cout) f32."""
    B, L, Cs = x_s2d.shape
    KK, Cs2, Cout = w.shape
    assert KK == kp * kp and Cs2 == Cs
    M = Ho * Ws
    cost = pl.CostEstimate(
        flops=2 * B * M * kp * kp * Cs * Cout,
        transcendentals=B * M * Cout,
        bytes_accessed=2 * (B * L * Cs + KK * Cs * Cout + B * M * Cout) + 4 * Cout,
    )
    return pl.pallas_call(
        functools.partial(_conv_s2d_kernel, kp=kp, Ws=Ws, M=M),
        out_shape=jax.ShapeDtypeStruct((B, M, Cout), jnp.bfloat16),
        grid=(B,),
        in_specs=[
            pl.BlockSpec((1, L, Cs), lambda i: (i, 0, 0)),      # per-image rows
            pl.BlockSpec((KK, Cs, Cout), lambda i: (0, 0, 0)),  # resident weights
            pl.BlockSpec((1, Cout), lambda i: (0, 0)),          # resident bias
        ],
        out_specs=pl.BlockSpec((1, M, Cout), lambda i: (i, 0, 0)),
        compiler_params=pltpu.CompilerParams(
            dimension_semantics=("parallel",),                  # batch across v7x TCs
            vmem_limit_bytes=VMEM_LIMIT,
        ),
        cost_estimate=cost,
    )(x_s2d, w, b)


def dqn_head(x_s2d, w3, b3, w1, b1, w2, b2, *, Ho, Ws, kp):
    """Fused conv3 + fc1 + fc2.  x_s2d: (B, L, Cs) bf16 -> (B, FC2_NPAD) f32."""
    B, L, Cs = x_s2d.shape
    KK, _, C3 = w3.shape
    M = Ho * Ws
    assert w1.shape[0] == M and w1.shape[1] == C3
    Dh = w1.shape[2]
    Np = w2.shape[1]
    cost = pl.CostEstimate(
        flops=2 * B * (M * kp * kp * Cs * C3 + M * C3 * Dh + Dh * Np),
        transcendentals=B * (M * C3 + Dh),
        bytes_accessed=2 * (B * L * Cs + KK * Cs * C3 + M * C3 * Dh + Dh * Np)
                       + 4 * B * Np,
    )
    out = pl.pallas_call(
        functools.partial(_head_kernel, kp=kp, Ws=Ws, M=M),
        out_shape=jax.ShapeDtypeStruct((B, 1, Np), jnp.float32),
        grid=(B,),
        in_specs=[
            pl.BlockSpec((1, L, Cs), lambda i: (i, 0, 0)),
            pl.BlockSpec((KK, Cs, C3), lambda i: (0, 0, 0)),
            pl.BlockSpec((1, C3), lambda i: (0, 0)),
            pl.BlockSpec((M, C3, Dh), lambda i: (0, 0, 0)),
            pl.BlockSpec((1, Dh), lambda i: (0, 0)),
            pl.BlockSpec((Dh, Np), lambda i: (0, 0)),
            pl.BlockSpec((1, Np), lambda i: (0, 0)),
        ],
        out_specs=pl.BlockSpec((1, 1, Np), lambda i: (i, 0, 0)),
        compiler_params=pltpu.CompilerParams(
            dimension_semantics=("parallel",),
            vmem_limit_bytes=VMEM_LIMIT,
        ),
        cost_estimate=cost,
    )(x_s2d, w3, b3, w1, b1, w2, b2)
    return out.reshape(B, Np)


# ----------------------------------------------------------------------------
# Space-to-depth packing (wrapper side, duplication-free: one pad + transpose)
# ----------------------------------------------------------------------------
def _s2d_pack_nchw(x, k, s):
    """(B, Cin, H, W) f32 -> (B, Hs*Ws, s*s*Cin) bf16.
    Folds the NCHW->NHWC transpose and bf16 cast into the s2d transpose."""
    B, Cin, H, W = x.shape
    Ho, Wo, kp, Hs, Ws = _conv_geom(H, W, k, s)
    Hp, Wp = s * Hs, s * Ws
    x = x[:, :, :min(H, Hp), :min(W, Wp)]
    x = jnp.pad(x, ((0, 0), (0, 0), (0, Hp - x.shape[2]), (0, Wp - x.shape[3])))
    x = x.reshape(B, Cin, Hs, s, Ws, s)
    x = x.transpose(0, 2, 4, 3, 5, 1)                       # (B, Hs, Ws, pi, pj, Cin)
    x = x.reshape(B, Hs * Ws, s * s * Cin).astype(jnp.bfloat16)
    return x, (Ho, Wo, kp, Ws)


def _s2d_pack_nhwc(x, H, W, k, s):
    """(B, Hb, Wb, C) bf16 (valid content in [:H, :W]) -> (B, Hs*Ws, s*s*C) bf16.
    The width slice also drops the previous layer's garbage columns."""
    B, Hb, Wb, C = x.shape
    Ho, Wo, kp, Hs, Ws = _conv_geom(H, W, k, s)
    Hp, Wp = s * Hs, s * Ws
    x = x[:, :min(Hb, Hp), :min(Wb, Wp), :]
    x = jnp.pad(x, ((0, 0), (0, Hp - x.shape[1]), (0, Wp - x.shape[2]), (0, 0)))
    x = x.reshape(B, Hs, s, Ws, s, C)
    x = x.transpose(0, 1, 3, 2, 4, 5)                       # (B, Hs, Ws, pi, pj, C)
    x = x.reshape(B, Hs * Ws, s * s * C)
    return x, (Ho, Wo, kp, Ws)


# ----------------------------------------------------------------------------
# Parameters: PyTorch-layout init, then one-time packing to kernel layout
# ----------------------------------------------------------------------------
def init_params_torch(key, in_ch, H, W, num_actions):
    """PyTorch-layout params (kaiming-uniform-style weights, uniform biases)."""
    ks = jax.random.split(key, 10)

    def u(k_, shape, fan_in):
        bound = 1.0 / jnp.sqrt(fan_in)
        return jax.random.uniform(k_, shape, jnp.float32, -bound, bound)

    h3 = _out_sz(_out_sz(_out_sz(H, 8, 4), 4, 2), 3, 2)
    w3 = _out_sz(_out_sz(_out_sz(W, 8, 4), 4, 2), 3, 2)
    flat = 64 * h3 * w3   # nn.LazyLinear in-features (NCHW flatten)

    params = dict(
        c1_w=u(ks[0], (32, in_ch, 8, 8), in_ch * 64), c1_b=u(ks[1], (32,), in_ch * 64),
        c2_w=u(ks[2], (64, 32, 4, 4), 32 * 16),       c2_b=u(ks[3], (64,), 32 * 16),
        c3_w=u(ks[4], (64, 64, 3, 3), 64 * 9),        c3_b=u(ks[5], (64,), 64 * 9),
        fc1_w=u(ks[6], (512, flat), flat),            fc1_b=u(ks[7], (512,), flat),
        fc2_w=u(ks[8], (num_actions, 512), 512),      fc2_b=u(ks[9], (num_actions,), 512),
    )
    return params, (h3, w3)


def _pack_conv(w, b, s):
    """PyTorch conv weight (Cout,Cin,k,k) -> s2d slabs (kp*kp, s*s*Cin, Cout) bf16."""
    Cout, Cin, k, _ = w.shape
    kp = (k - 1) // s + 1
    wt = jnp.transpose(w, (2, 3, 1, 0))                     # (ki, kj, ci, co)
    wt = jnp.pad(wt, ((0, kp * s - k), (0, kp * s - k), (0, 0), (0, 0)))
    wt = wt.reshape(kp, s, kp, s, Cin, Cout)                # (di, pi, dj, pj, ci, co)
    wt = wt.transpose(0, 2, 1, 3, 4, 5)                     # (di, dj, pi, pj, ci, co)
    wt = wt.reshape(kp * kp, s * s * Cin, Cout).astype(jnp.bfloat16)
    bp = b.reshape(1, Cout).astype(jnp.float32)
    return wt, bp


def _pack_fc1(w, b, c3, h3, w3, Ws3):
    """fc1 (512, c3*h3*w3), NCHW flatten -> per-spatial-slot slabs (h3*Ws3, c3, 512).
    Slots with wo >= w3 (flat-shift garbage columns) get zero weights."""
    O = w.shape[0]
    wt = w.reshape(O, c3, h3, w3)
    wt = jnp.transpose(wt, (2, 3, 1, 0))                    # (h3, w3, c3, O)
    wt = jnp.pad(wt, ((0, 0), (0, Ws3 - w3), (0, 0), (0, 0)))
    wt = wt.reshape(h3 * Ws3, c3, O).astype(jnp.bfloat16)
    bp = b.reshape(1, O).astype(jnp.float32)
    return wt, bp


def _pack_fc2(w, b, n_pad):
    O, _ = w.shape
    wp = jnp.pad(w.T, ((0, 0), (0, n_pad - O))).astype(jnp.bfloat16)
    bp = jnp.pad(b, (0, n_pad - O)).reshape(1, n_pad).astype(jnp.float32)
    return wp, bp


def pack_params(tp, h3, w3):
    c1_w, c1_b = _pack_conv(tp["c1_w"], tp["c1_b"], s=4)
    c2_w, c2_b = _pack_conv(tp["c2_w"], tp["c2_b"], s=2)
    c3_w, c3_b = _pack_conv(tp["c3_w"], tp["c3_b"], s=2)
    kp3 = (3 - 1) // 2 + 1
    Ws3 = w3 + kp3 - 1
    fc1_w, fc1_b = _pack_fc1(tp["fc1_w"], tp["fc1_b"], 64, h3, w3, Ws3)
    fc2_w, fc2_b = _pack_fc2(tp["fc2_w"], tp["fc2_b"], FC2_NPAD)
    return dict(c1_w=c1_w, c1_b=c1_b, c2_w=c2_w, c2_b=c2_b, c3_w=c3_w, c3_b=c3_b,
                fc1_w=fc1_w, fc1_b=fc1_b, fc2_w=fc2_w, fc2_b=fc2_b)


# ----------------------------------------------------------------------------
# DQN forward
# ----------------------------------------------------------------------------
def dqn_forward(packed, x):
    """x: (B, T, C, H, W) float32 -> (B, NUM_ACTIONS) float32."""
    B, T, C, H, W = x.shape
    x = x.reshape(B, T * C, H, W)

    # conv1 (k=8, s=4): NCHW->NHWC + bf16 cast folded into the one s2d transpose.
    xs, (Ho, Wo, kp, Ws) = _s2d_pack_nchw(x, k=8, s=4)
    y = conv_s2d(xs, packed["c1_w"], packed["c1_b"], Ho=Ho, Ws=Ws, kp=kp)
    y = y.reshape(B, Ho, Ws, -1)
    H, W = Ho, Wo

    # conv2 (k=4, s=2)
    xs, (Ho, Wo, kp, Ws) = _s2d_pack_nhwc(y, H, W, k=4, s=2)
    y = conv_s2d(xs, packed["c2_w"], packed["c2_b"], Ho=Ho, Ws=Ws, kp=kp)
    y = y.reshape(B, Ho, Ws, -1)
    H, W = Ho, Wo

    # conv3 + flatten + fc1 + SiLU + fc2 fused head (k=3, s=2)
    xs, (Ho, Wo, kp, Ws) = _s2d_pack_nhwc(y, H, W, k=3, s=2)
    y = dqn_head(xs, packed["c3_w"], packed["c3_b"],
                 packed["fc1_w"], packed["fc1_b"],
                 packed["fc2_w"], packed["fc2_b"], Ho=Ho, Ws=Ws, kp=kp)
    return y[:, :NUM_ACTIONS]


if __name__ == "__main__":
    B, T, C, H, W = 2, FRAME_STACK_SIZE, COLOR_CHANNELS, 64, 64

    key = jax.random.PRNGKey(0)
    k_params, k_x = jax.random.split(key)

    torch_params, (h3, w3) = init_params_torch(k_params, in_ch=T * C, H=H, W=W,
                                               num_actions=NUM_ACTIONS)
    packed = pack_params(torch_params, h3=h3, w3=w3)   # one-time weight packing

    x = jax.random.normal(k_x, (B, T, C, H, W), jnp.float32)

    out = jax.jit(dqn_forward)(packed, x)
    out = jax.block_until_ready(out)
    assert out.shape == (B, NUM_ACTIONS), out.shape
    print("KERNEL_OK")
</pallas_src>

<mosaic_0001>
module attributes {stable_mosaic.version = 11 : i64} {
  func.func @_conv_s2d_kernel(%arg0: i32, %arg1: memref<1x272x192xbf16, #tpu.memory_space<vmem>>, %arg2: memref<4x192x32xbf16, #tpu.memory_space<vmem>>, %arg3: memref<1x32xf32, #tpu.memory_space<vmem>>, %arg4: memref<1x240x32xbf16, #tpu.memory_space<vmem>>) attributes {dimension_semantics = [#tpu.dimension_semantics<parallel>], iteration_bounds = array<i64: 2>, scalar_prefetch = 0 : i64, scratch_operands = 0 : i64, tpu.core_type = #tpu.core_type<tc>, window_params = [{transform_indices = @transform_0, window_bounds = array<i64: 1, 272, 192>}, {pipeline_mode = #tpu.pipeline_mode<synchronous>, transform_indices = @transform_1, window_bounds = array<i64: 4, 192, 32>}, {pipeline_mode = #tpu.pipeline_mode<synchronous>, transform_indices = @transform_2, window_bounds = array<i64: 1, 32>}, {transform_indices = @transform_3, window_bounds = array<i64: 1, 240, 32>}]} {
    %c0 = arith.constant 0 : index
    %c0_0 = arith.constant 0 : index
    %c0_1 = arith.constant 0 : index
    %0 = vector.load %arg1[%c0, %c0_0, %c0_1] : memref<1x272x192xbf16, #tpu.memory_space<vmem>>, vector<1x272x192xbf16>
    %1 = vector.shape_cast %0 : vector<1x272x192xbf16> to vector<272x192xbf16>
    %2 = vector.extract_strided_slice %1 {offsets = [0, 0], sizes = [240, 192], strides = [1, 1]} : vector<272x192xbf16> to vector<240x192xbf16>
    %c0_2 = arith.constant 0 : index
    %c0_3 = arith.constant 0 : index
    %c0_4 = arith.constant 0 : index
    %3 = vector.load %arg2[%c0_2, %c0_3, %c0_4] : memref<4x192x32xbf16, #tpu.memory_space<vmem>>, vector<1x192x32xbf16>
    %4 = vector.shape_cast %3 : vector<1x192x32xbf16> to vector<192x32xbf16>
    %cst = arith.constant dense<0.000000e+00> : vector<240x32xf32>
    %5 = tpu.matmul %2, %4, %cst {dimension_numbers = #tpu.dot_dimension_numbers<[1], [0], [0], [1], [0, 0, 1, 1], [], []>} : vector<240x192xbf16>, vector<192x32xbf16>, vector<240x32xf32> -> vector<240x32xf32>
    %6 = vector.extract_strided_slice %1 {offsets = [1, 0], sizes = [240, 192], strides = [1, 1]} : vector<272x192xbf16> to vector<240x192xbf16>
    %c1 = arith.constant 1 : index
    %c0_5 = arith.constant 0 : index
    %c0_6 = arith.constant 0 : index
    %7 = vector.load %arg2[%c1, %c0_5, %c0_6] : memref<4x192x32xbf16, #tpu.memory_space<vmem>>, vector<1x192x32xbf16>
    %8 = vector.shape_cast %7 : vector<1x192x32xbf16> to vector<192x32xbf16>
    %cst_7 = arith.constant dense<0.000000e+00> : vector<240x32xf32>
    %9 = tpu.matmul %6, %8, %cst_7 {dimension_numbers = #tpu.dot_dimension_numbers<[1], [0], [0], [1], [0, 0, 1, 1], [], []>} : vector<240x192xbf16>, vector<192x32xbf16>, vector<240x32xf32> -> vector<240x32xf32>
    %10 = arith.addf %5, %9 : vector<240x32xf32>
    %11 = vector.extract_strided_slice %1 {offsets = [16, 0], sizes = [240, 192], strides = [1, 1]} : vector<272x192xbf16> to vector<240x192xbf16>
    %c2 = arith.constant 2 : index
    %c0_8 = arith.constant 0 : index
    %c0_9 = arith.constant 0 : index
    %12 = vector.load %arg2[%c2, %c0_8, %c0_9] : memref<4x192x32xbf16, #tpu.memory_space<vmem>>, vector<1x192x32xbf16>
    %13 = vector.shape_cast %12 : vector<1x192x32xbf16> to vector<192x32xbf16>
    %cst_10 = arith.constant dense<0.000000e+00> : vector<240x32xf32>
    %14 = tpu.matmul %11, %13, %cst_10 {dimension_numbers = #tpu.dot_dimension_numbers<[1], [0], [0], [1], [0, 0, 1, 1], [], []>} : vector<240x192xbf16>, vector<192x32xbf16>, vector<240x32xf32> -> vector<240x32xf32>
    %15 = arith.addf %10, %14 : vector<240x32xf32>
    %16 = vector.extract_strided_slice %1 {offsets = [17, 0], sizes = [240, 192], strides = [1, 1]} : vector<272x192xbf16> to vector<240x192xbf16>
    %c3 = arith.constant 3 : index
    %c0_11 = arith.constant 0 : index
    %c0_12 = arith.constant 0 : index
    %17 = vector.load %arg2[%c3, %c0_11, %c0_12] : memref<4x192x32xbf16, #tpu.memory_space<vmem>>, vector<1x192x32xbf16>
    %18 = vector.shape_cast %17 : vector<1x192x32xbf16> to vector<192x32xbf16>
    %cst_13 = arith.constant dense<0.000000e+00> : vector<240x32xf32>
    %19 = tpu.matmul %16, %18, %cst_13 {dimension_numbers = #tpu.dot_dimension_numbers<[1], [0], [0], [1], [0, 0, 1, 1], [], []>} : vector<240x192xbf16>, vector<192x32xbf16>, vector<240x32xf32> -> vector<240x32xf32>
    %20 = arith.addf %15, %19 : vector<240x32xf32>
    %c0_14 = arith.constant 0 : index
    %c0_15 = arith.constant 0 : index
    %21 = vector.load %arg3[%c0_14, %c0_15] : memref<1x32xf32, #tpu.memory_space<vmem>>, vector<1x32xf32>
    %22 = vector.broadcast %21 : vector<1x32xf32> to vector<240x32xf32>
    %23 = arith.addf %20, %22 : vector<240x32xf32>
    %24 = arith.negf %23 : vector<240x32xf32>
    %25 = math.exp %24 : vector<240x32xf32>
    %cst_16 = arith.constant 1.000000e+00 : f32
    %26 = vector.broadcast %cst_16 : f32 to vector<240x32xf32>
    %27 = arith.addf %26, %25 : vector<240x32xf32>
    %28 = arith.divf %26, %27 : vector<240x32xf32>
    %29 = arith.mulf %23, %28 : vector<240x32xf32>
    %30 = arith.truncf %29 : vector<240x32xf32> to vector<240x32xbf16>
    %c0_17 = arith.constant 0 : index
    %c0_18 = arith.constant 0 : index
    %c0_19 = arith.constant 0 : index
    %31 = vector.load %arg4[%c0_17, %c0_18, %c0_19] : memref<1x240x32xbf16, #tpu.memory_space<vmem>>, vector<1x240x32xbf16>
    %32 = vector.shape_cast %31 : vector<1x240x32xbf16> to vector<240x32xbf16>
    %33 = vector.shape_cast %30 : vector<240x32xbf16> to vector<1x240x32xbf16>
    tpu.vector_store %arg4[%c0_17, %c0_18, %c0_19], %33 {strides = array<i32>} : memref<1x240x32xbf16, #tpu.memory_space<vmem>>, vector<1x240x32xbf16>,
    return
  }
  func.func @transform_0(%arg0: i32) -> (i32, i32, i32) {
    %c0_i32 = arith.constant 0 : i32
    %c0_i32_0 = arith.constant 0 : i32
    %c0_i32_1 = arith.constant 0 : i32
    return %arg0, %c0_i32, %c0_i32_0 : i32, i32, i32
  }
  func.func @transform_1(%arg0: i32) -> (i32, i32, i32) {
    %c0_i32 = arith.constant 0 : i32
    %c0_i32_0 = arith.constant 0 : i32
    %c0_i32_1 = arith.constant 0 : i32
    %c0_i32_2 = arith.constant 0 : i32
    return %c0_i32, %c0_i32_0, %c0_i32_1 : i32, i32, i32
  }
  func.func @transform_2(%arg0: i32) -> (i32, i32) {
    %c0_i32 = arith.constant 0 : i32
    %c0_i32_0 = arith.constant 0 : i32
    %c0_i32_1 = arith.constant 0 : i32
    return %c0_i32, %c0_i32_0 : i32, i32
  }
  func.func @transform_3(%arg0: i32) -> (i32, i32, i32) {
    %c0_i32 = arith.constant 0 : i32
    %c0_i32_0 = arith.constant 0 : i32
    %c0_i32_1 = arith.constant 0 : i32
    return %arg0, %c0_i32, %c0_i32_0 : i32, i32, i32
  }
}

module attributes {stable_mosaic.version = 11 : i64} {
  func.func @_conv_s2d_kernel(%arg0: i32, %arg1: memref<1x56x128xbf16, #tpu.memory_space<vmem>>, %arg2: memref<4x128x64xbf16, #tpu.memory_space<vmem>>, %arg3: memref<1x64xf32, #tpu.memory_space<vmem>>, %arg4: memref<1x42x64xbf16, #tpu.memory_space<vmem>>) attributes {dimension_semantics = [#tpu.dimension_semantics<parallel>], iteration_bounds = array<i64: 2>, scalar_prefetch = 0 : i64, scratch_operands = 0 : i64, tpu.core_type = #tpu.core_type<tc>, window_params = [{transform_indices = @transform_0, window_bounds = array<i64: 1, 56, 128>}, {pipeline_mode = #tpu.pipeline_mode<synchronous>, transform_indices = @transform_1, window_bounds = array<i64: 4, 128, 64>}, {pipeline_mode = #tpu.pipeline_mode<synchronous>, transform_indices = @transform_2, window_bounds = array<i64: 1, 64>}, {transform_indices = @transform_3, window_bounds = array<i64: 1, 42, 64>}]} {
    %c0 = arith.constant 0 : index
    %c0_0 = arith.constant 0 : index
    %c0_1 = arith.constant 0 : index
    %0 = vector.load %arg1[%c0, %c0_0, %c0_1] : memref<1x56x128xbf16, #tpu.memory_space<vmem>>, vector<1x56x128xbf16>
    %1 = vector.shape_cast %0 : vector<1x56x128xbf16> to vector<56x128xbf16>
    %2 = vector.extract_strided_slice %1 {offsets = [0, 0], sizes = [42, 128], strides = [1, 1]} : vector<56x128xbf16> to vector<42x128xbf16>
    %c0_2 = arith.constant 0 : index
    %c0_3 = arith.constant 0 : index
    %c0_4 = arith.constant 0 : index
    %3 = vector.load %arg2[%c0_2, %c0_3, %c0_4] : memref<4x128x64xbf16, #tpu.memory_space<vmem>>, vector<1x128x64xbf16>
    %4 = vector.shape_cast %3 : vector<1x128x64xbf16> to vector<128x64xbf16>
    %cst = arith.constant dense<0.000000e+00> : vector<42x64xf32>
    %5 = tpu.matmul %2, %4, %cst {dimension_numbers = #tpu.dot_dimension_numbers<[1], [0], [0], [1], [0, 0, 1, 1], [], []>} : vector<42x128xbf16>, vector<128x64xbf16>, vector<42x64xf32> -> vector<42x64xf32>
    %6 = vector.extract_strided_slice %1 {offsets = [1, 0], sizes = [42, 128], strides = [1, 1]} : vector<56x128xbf16> to vector<42x128xbf16>
    %c1 = arith.constant 1 : index
    %c0_5 = arith.constant 0 : index
    %c0_6 = arith.constant 0 : index
    %7 = vector.load %arg2[%c1, %c0_5, %c0_6] : memref<4x128x64xbf16, #tpu.memory_space<vmem>>, vector<1x128x64xbf16>
    %8 = vector.shape_cast %7 : vector<1x128x64xbf16> to vector<128x64xbf16>
    %cst_7 = arith.constant dense<0.000000e+00> : vector<42x64xf32>
    %9 = tpu.matmul %6, %8, %cst_7 {dimension_numbers = #tpu.dot_dimension_numbers<[1], [0], [0], [1], [0, 0, 1, 1], [], []>} : vector<42x128xbf16>, vector<128x64xbf16>, vector<42x64xf32> -> vector<42x64xf32>
    %10 = arith.addf %5, %9 : vector<42x64xf32>
    %11 = vector.extract_strided_slice %1 {offsets = [7, 0], sizes = [42, 128], strides = [1, 1]} : vector<56x128xbf16> to vector<42x128xbf16>
    %c2 = arith.constant 2 : index
    %c0_8 = arith.constant 0 : index
    %c0_9 = arith.constant 0 : index
    %12 = vector.load %arg2[%c2, %c0_8, %c0_9] : memref<4x128x64xbf16, #tpu.memory_space<vmem>>, vector<1x128x64xbf16>
    %13 = vector.shape_cast %12 : vector<1x128x64xbf16> to vector<128x64xbf16>
    %cst_10 = arith.constant dense<0.000000e+00> : vector<42x64xf32>
    %14 = tpu.matmul %11, %13, %cst_10 {dimension_numbers = #tpu.dot_dimension_numbers<[1], [0], [0], [1], [0, 0, 1, 1], [], []>} : vector<42x128xbf16>, vector<128x64xbf16>, vector<42x64xf32> -> vector<42x64xf32>
    %15 = arith.addf %10, %14 : vector<42x64xf32>
    %16 = vector.extract_strided_slice %1 {offsets = [8, 0], sizes = [42, 128], strides = [1, 1]} : vector<56x128xbf16> to vector<42x128xbf16>
    %c3 = arith.constant 3 : index
    %c0_11 = arith.constant 0 : index
    %c0_12 = arith.constant 0 : index
    %17 = vector.load %arg2[%c3, %c0_11, %c0_12] : memref<4x128x64xbf16, #tpu.memory_space<vmem>>, vector<1x128x64xbf16>
    %18 = vector.shape_cast %17 : vector<1x128x64xbf16> to vector<128x64xbf16>
    %cst_13 = arith.constant dense<0.000000e+00> : vector<42x64xf32>
    %19 = tpu.matmul %16, %18, %cst_13 {dimension_numbers = #tpu.dot_dimension_numbers<[1], [0], [0], [1], [0, 0, 1, 1], [], []>} : vector<42x128xbf16>, vector<128x64xbf16>, vector<42x64xf32> -> vector<42x64xf32>
    %20 = arith.addf %15, %19 : vector<42x64xf32>
    %c0_14 = arith.constant 0 : index
    %c0_15 = arith.constant 0 : index
    %21 = vector.load %arg3[%c0_14, %c0_15] : memref<1x64xf32, #tpu.memory_space<vmem>>, vector<1x64xf32>
    %22 = vector.broadcast %21 : vector<1x64xf32> to vector<42x64xf32>
    %23 = arith.addf %20, %22 : vector<42x64xf32>
    %24 = arith.negf %23 : vector<42x64xf32>
    %25 = math.exp %24 : vector<42x64xf32>
    %cst_16 = arith.constant 1.000000e+00 : f32
    %26 = vector.broadcast %cst_16 : f32 to vector<42x64xf32>
    %27 = arith.addf %26, %25 : vector<42x64xf32>
    %28 = arith.divf %26, %27 : vector<42x64xf32>
    %29 = arith.mulf %23, %28 : vector<42x64xf32>
    %30 = arith.truncf %29 : vector<42x64xf32> to vector<42x64xbf16>
    %c0_17 = arith.constant 0 : index
    %c0_18 = arith.constant 0 : index
    %c0_19 = arith.constant 0 : index
    %31 = vector.load %arg4[%c0_17, %c0_18, %c0_19] : memref<1x42x64xbf16, #tpu.memory_space<vmem>>, vector<1x42x64xbf16>
    %32 = vector.shape_cast %31 : vector<1x42x64xbf16> to vector<42x64xbf16>
    %33 = vector.shape_cast %30 : vector<42x64xbf16> to vector<1x42x64xbf16>
    tpu.vector_store %arg4[%c0_17, %c0_18, %c0_19], %33 {strides = array<i32>} : memref<1x42x64xbf16, #tpu.memory_space<vmem>>, vector<1x42x64xbf16>,
    return
  }
  func.func @transform_0(%arg0: i32) -> (i32, i32, i32) {
    %c0_i32 = arith.constant 0 : i32
    %c0_i32_0 = arith.constant 0 : i32
    %c0_i32_1 = arith.constant 0 : i32
    return %arg0, %c0_i32, %c0_i32_0 : i32, i32, i32
  }
  func.func @transform_1(%arg0: i32) -> (i32, i32, i32) {
    %c0_i32 = arith.constant 0 : i32
    %c0_i32_0 = arith.constant 0 : i32
    %c0_i32_1 = arith.constant 0 : i32
    %c0_i32_2 = arith.constant 0 : i32
    return %c0_i32, %c0_i32_0, %c0_i32_1 : i32, i32, i32
  }
  func.func @transform_2(%arg0: i32) -> (i32, i32) {
    %c0_i32 = arith.constant 0 : i32
    %c0_i32_0 = arith.constant 0 : i32
    %c0_i32_1 = arith.constant 0 : i32
    return %c0_i32, %c0_i32_0 : i32, i32
  }
  func.func @transform_3(%arg0: i32) -> (i32, i32, i32) {
    %c0_i32 = arith.constant 0 : i32
    %c0_i32_0 = arith.constant 0 : i32
    %c0_i32_1 = arith.constant 0 : i32
    return %arg0, %c0_i32, %c0_i32_0 : i32, i32, i32
  }
}

module attributes {stable_mosaic.version = 11 : i64} {
  func.func @_head_kernel(%arg0: i32, %arg1: memref<1x12x256xbf16, #tpu.memory_space<vmem>>, %arg2: memref<4x256x64xbf16, #tpu.memory_space<vmem>>, %arg3: memref<1x64xf32, #tpu.memory_space<vmem>>, %arg4: memref<6x64x512xbf16, #tpu.memory_space<vmem>>, %arg5: memref<1x512xf32, #tpu.memory_space<vmem>>, %arg6: memref<512x128xbf16, #tpu.memory_space<vmem>>, %arg7: memref<1x128xf32, #tpu.memory_space<vmem>>, %arg8: memref<1x1x128xf32, #tpu.memory_space<vmem>>) attributes {dimension_semantics = [#tpu.dimension_semantics<parallel>], iteration_bounds = array<i64: 2>, scalar_prefetch = 0 : i64, scratch_operands = 0 : i64, tpu.core_type = #tpu.core_type<tc>, window_params = [{transform_indices = @transform_0, window_bounds = array<i64: 1, 12, 256>}, {pipeline_mode = #tpu.pipeline_mode<synchronous>, transform_indices = @transform_1, window_bounds = array<i64: 4, 256, 64>}, {pipeline_mode = #tpu.pipeline_mode<synchronous>, transform_indices = @transform_2, window_bounds = array<i64: 1, 64>}, {pipeline_mode = #tpu.pipeline_mode<synchronous>, transform_indices = @transform_3, window_bounds = array<i64: 6, 64, 512>}, {pipeline_mode = #tpu.pipeline_mode<synchronous>, transform_indices = @transform_4, window_bounds = array<i64: 1, 512>}, {pipeline_mode = #tpu.pipeline_mode<synchronous>, transform_indices = @transform_5, window_bounds = array<i64: 512, 128>}, {pipeline_mode = #tpu.pipeline_mode<synchronous>, transform_indices = @transform_6, window_bounds = array<i64: 1, 128>}, {transform_indices = @transform_7, window_bounds = array<i64: 1, 1, 128>}]} {
    %c0 = arith.constant 0 : index
    %c0_0 = arith.constant 0 : index
    %c0_1 = arith.constant 0 : index
    %0 = vector.load %arg1[%c0, %c0_0, %c0_1] : memref<1x12x256xbf16, #tpu.memory_space<vmem>>, vector<1x12x256xbf16>
    %1 = vector.shape_cast %0 : vector<1x12x256xbf16> to vector<12x256xbf16>
    %2 = vector.extract_strided_slice %1 {offsets = [0, 0], sizes = [6, 256], strides = [1, 1]} : vector<12x256xbf16> to vector<6x256xbf16>
    %c0_2 = arith.constant 0 : index
    %c0_3 = arith.constant 0 : index
    %c0_4 = arith.constant 0 : index
    %3 = vector.load %arg2[%c0_2, %c0_3, %c0_4] : memref<4x256x64xbf16, #tpu.memory_space<vmem>>, vector<1x256x64xbf16>
    %4 = vector.shape_cast %3 : vector<1x256x64xbf16> to vector<256x64xbf16>
    %cst = arith.constant dense<0.000000e+00> : vector<6x64xf32>
    %5 = tpu.matmul %2, %4, %cst {dimension_numbers = #tpu.dot_dimension_numbers<[1], [0], [0], [1], [0, 0, 1, 1], [], []>} : vector<6x256xbf16>, vector<256x64xbf16>, vector<6x64xf32> -> vector<6x64xf32>
    %6 = vector.extract_strided_slice %1 {offsets = [1, 0], sizes = [6, 256], strides = [1, 1]} : vector<12x256xbf16> to vector<6x256xbf16>
    %c1 = arith.constant 1 : index
    %c0_5 = arith.constant 0 : index
    %c0_6 = arith.constant 0 : index
    %7 = vector.load %arg2[%c1, %c0_5, %c0_6] : memref<4x256x64xbf16, #tpu.memory_space<vmem>>, vector<1x256x64xbf16>
    %8 = vector.shape_cast %7 : vector<1x256x64xbf16> to vector<256x64xbf16>
    %cst_7 = arith.constant dense<0.000000e+00> : vector<6x64xf32>
    %9 = tpu.matmul %6, %8, %cst_7 {dimension_numbers = #tpu.dot_dimension_numbers<[1], [0], [0], [1], [0, 0, 1, 1], [], []>} : vector<6x256xbf16>, vector<256x64xbf16>, vector<6x64xf32> -> vector<6x64xf32>
    %10 = arith.addf %5, %9 : vector<6x64xf32>
    %11 = vector.extract_strided_slice %1 {offsets = [3, 0], sizes = [6, 256], strides = [1, 1]} : vector<12x256xbf16> to vector<6x256xbf16>
    %c2 = arith.constant 2 : index
    %c0_8 = arith.constant 0 : index
    %c0_9 = arith.constant 0 : index
    %12 = vector.load %arg2[%c2, %c0_8, %c0_9] : memref<4x256x64xbf16, #tpu.memory_space<vmem>>, vector<1x256x64xbf16>
    %13 = vector.shape_cast %12 : vector<1x256x64xbf16> to vector<256x64xbf16>
    %cst_10 = arith.constant dense<0.000000e+00> : vector<6x64xf32>
    %14 = tpu.matmul %11, %13, %cst_10 {dimension_numbers = #tpu.dot_dimension_numbers<[1], [0], [0], [1], [0, 0, 1, 1], [], []>} : vector<6x256xbf16>, vector<256x64xbf16>, vector<6x64xf32> -> vector<6x64xf32>
    %15 = arith.addf %10, %14 : vector<6x64xf32>
    %16 = vector.extract_strided_slice %1 {offsets = [4, 0], sizes = [6, 256], strides = [1, 1]} : vector<12x256xbf16> to vector<6x256xbf16>
    %c3 = arith.constant 3 : index
    %c0_11 = arith.constant 0 : index
    %c0_12 = arith.constant 0 : index
    %17 = vector.load %arg2[%c3, %c0_11, %c0_12] : memref<4x256x64xbf16, #tpu.memory_space<vmem>>, vector<1x256x64xbf16>
    %18 = vector.shape_cast %17 : vector<1x256x64xbf16> to vector<256x64xbf16>
    %cst_13 = arith.constant dense<0.000000e+00> : vector<6x64xf32>
    %19 = tpu.matmul %16, %18, %cst_13 {dimension_numbers = #tpu.dot_dimension_numbers<[1], [0], [0], [1], [0, 0, 1, 1], [], []>} : vector<6x256xbf16>, vector<256x64xbf16>, vector<6x64xf32> -> vector<6x64xf32>
    %20 = arith.addf %15, %19 : vector<6x64xf32>
    %c0_14 = arith.constant 0 : index
    %c0_15 = arith.constant 0 : index
    %21 = vector.load %arg3[%c0_14, %c0_15] : memref<1x64xf32, #tpu.memory_space<vmem>>, vector<1x64xf32>
    %22 = vector.broadcast %21 : vector<1x64xf32> to vector<6x64xf32>
    %23 = arith.addf %20, %22 : vector<6x64xf32>
    %24 = arith.negf %23 : vector<6x64xf32>
    %25 = math.exp %24 : vector<6x64xf32>
    %cst_16 = arith.constant 1.000000e+00 : f32
    %26 = vector.broadcast %cst_16 : f32 to vector<6x64xf32>
    %27 = arith.addf %26, %25 : vector<6x64xf32>
    %28 = arith.divf %26, %27 : vector<6x64xf32>
    %29 = arith.mulf %23, %28 : vector<6x64xf32>
    %30 = arith.truncf %29 : vector<6x64xf32> to vector<6x64xbf16>
    %31 = vector.extract_strided_slice %30 {offsets = [0, 0], sizes = [1, 64], strides = [1, 1]} : vector<6x64xbf16> to vector<1x64xbf16>
    %c0_17 = arith.constant 0 : index
    %c0_18 = arith.constant 0 : index
    %c0_19 = arith.constant 0 : index
    %32 = vector.load %arg4[%c0_17, %c0_18, %c0_19] : memref<6x64x512xbf16, #tpu.memory_space<vmem>>, vector<1x64x512xbf16>
    %33 = vector.shape_cast %32 : vector<1x64x512xbf16> to vector<64x512xbf16>
    %cst_20 = arith.constant dense<0.000000e+00> : vector<1x512xf32>
    %34 = tpu.matmul %31, %33, %cst_20 {dimension_numbers = #tpu.dot_dimension_numbers<[1], [0], [0], [1], [0, 0, 1, 1], [], []>} : vector<1x64xbf16>, vector<64x512xbf16>, vector<1x512xf32> -> vector<1x512xf32>
    %35 = vector.extract_strided_slice %30 {offsets = [1, 0], sizes = [1, 64], strides = [1, 1]} : vector<6x64xbf16> to vector<1x64xbf16>
    %c1_21 = arith.constant 1 : index
    %c0_22 = arith.constant 0 : index
    %c0_23 = arith.constant 0 : index
    %36 = vector.load %arg4[%c1_21, %c0_22, %c0_23] : memref<6x64x512xbf16, #tpu.memory_space<vmem>>, vector<1x64x512xbf16>
    %37 = vector.shape_cast %36 : vector<1x64x512xbf16> to vector<64x512xbf16>
    %cst_24 = arith.constant dense<0.000000e+00> : vector<1x512xf32>
    %38 = tpu.matmul %35, %37, %cst_24 {dimension_numbers = #tpu.dot_dimension_numbers<[1], [0], [0], [1], [0, 0, 1, 1], [], []>} : vector<1x64xbf16>, vector<64x512xbf16>, vector<1x512xf32> -> vector<1x512xf32>
    %39 = arith.addf %34, %38 : vector<1x512xf32>
    %40 = vector.extract_strided_slice %30 {offsets = [2, 0], sizes = [1, 64], strides = [1, 1]} : vector<6x64xbf16> to vector<1x64xbf16>
    %c2_25 = arith.constant 2 : index
    %c0_26 = arith.constant 0 : index
    %c0_27 = arith.constant 0 : index
    %41 = vector.load %arg4[%c2_25, %c0_26, %c0_27] : memref<6x64x512xbf16, #tpu.memory_space<vmem>>, vector<1x64x512xbf16>
    %42 = vector.shape_cast %41 : vector<1x64x512xbf16> to vector<64x512xbf16>
    %cst_28 = arith.constant dense<0.000000e+00> : vector<1x512xf32>
    %43 = tpu.matmul %40, %42, %cst_28 {dimension_numbers = #tpu.dot_dimension_numbers<[1], [0], [0], [1], [0, 0, 1, 1], [], []>} : vector<1x64xbf16>, vector<64x512xbf16>, vector<1x512xf32> -> vector<1x512xf32>
    %44 = arith.addf %39, %43 : vector<1x512xf32>
    %45 = vector.extract_strided_slice %30 {offsets = [3, 0], sizes = [1, 64], strides = [1, 1]} : vector<6x64xbf16> to vector<1x64xbf16>
    %c3_29 = arith.constant 3 : index
    %c0_30 = arith.constant 0 : index
    %c0_31 = arith.constant 0 : index
    %46 = vector.load %arg4[%c3_29, %c0_30, %c0_31] : memref<6x64x512xbf16, #tpu.memory_space<vmem>>, vector<1x64x512xbf16>
    %47 = vector.shape_cast %46 : vector<1x64x512xbf16> to vector<64x512xbf16>
    %cst_32 = arith.constant dense<0.000000e+00> : vector<1x512xf32>
    %48 = tpu.matmul %45, %47, %cst_32 {dimension_numbers = #tpu.dot_dimension_numbers<[1], [0], [0], [1], [0, 0, 1, 1], [], []>} : vector<1x64xbf16>, vector<64x512xbf16>, vector<1x512xf32> -> vector<1x512xf32>
    %49 = arith.addf %44, %48 : vector<1x512xf32>
    %50 = vector.extract_strided_slice %30 {offsets = [4, 0], sizes = [1, 64], strides = [1, 1]} : vector<6x64xbf16> to vector<1x64xbf16>
    %c4 = arith.constant 4 : index
    %c0_33 = arith.constant 0 : index
    %c0_34 = arith.constant 0 : index
    %51 = vector.load %arg4[%c4, %c0_33, %c0_34] : memref<6x64x512xbf16, #tpu.memory_space<vmem>>, vector<1x64x512xbf16>
    %52 = vector.shape_cast %51 : vector<1x64x512xbf16> to vector<64x512xbf16>
    %cst_35 = arith.constant dense<0.000000e+00> : vector<1x512xf32>
    %53 = tpu.matmul %50, %52, %cst_35 {dimension_numbers = #tpu.dot_dimension_numbers<[1], [0], [0], [1], [0, 0, 1, 1], [], []>} : vector<1x64xbf16>, vector<64x512xbf16>, vector<1x512xf32> -> vector<1x512xf32>
    %54 = arith.addf %49, %53 : vector<1x512xf32>
    %55 = vector.extract_strided_slice %30 {offsets = [5, 0], sizes = [1, 64], strides = [1, 1]} : vector<6x64xbf16> to vector<1x64xbf16>
    %c5 = arith.constant 5 : index
    %c0_36 = arith.constant 0 : index
    %c0_37 = arith.constant 0 : index
    %56 = vector.load %arg4[%c5, %c0_36, %c0_37] : memref<6x64x512xbf16, #tpu.memory_space<vmem>>, vector<1x64x512xbf16>
    %57 = vector.shape_cast %56 : vector<1x64x512xbf16> to vector<64x512xbf16>
    %cst_38 = arith.constant dense<0.000000e+00> : vector<1x512xf32>
    %58 = tpu.matmul %55, %57, %cst_38 {dimension_numbers = #tpu.dot_dimension_numbers<[1], [0], [0], [1], [0, 0, 1, 1], [], []>} : vector<1x64xbf16>, vector<64x512xbf16>, vector<1x512xf32> -> vector<1x512xf32>
    %59 = arith.addf %54, %58 : vector<1x512xf32>
    %c0_39 = arith.constant 0 : index
    %c0_40 = arith.constant 0 : index
    %60 = vector.load %arg5[%c0_39, %c0_40] : memref<1x512xf32, #tpu.memory_space<vmem>>, vector<1x512xf32>
    %61 = arith.addf %59, %60 : vector<1x512xf32>
    %62 = arith.negf %61 : vector<1x512xf32>
    %63 = math.exp %62 : vector<1x512xf32>
    %cst_41 = arith.constant 1.000000e+00 : f32
    %64 = vector.broadcast %cst_41 : f32 to vector<1x512xf32>
    %65 = arith.addf %64, %63 : vector<1x512xf32>
    %66 = arith.divf %64, %65 : vector<1x512xf32>
    %67 = arith.mulf %61, %66 : vector<1x512xf32>
    %68 = arith.truncf %67 : vector<1x512xf32> to vector<1x512xbf16>
    %c0_42 = arith.constant 0 : index
    %c0_43 = arith.constant 0 : index
    %69 = vector.load %arg6[%c0_42, %c0_43] : memref<512x128xbf16, #tpu.memory_space<vmem>>, vector<512x128xbf16>
    %cst_44 = arith.constant dense<0.000000e+00> : vector<1x128xf32>
    %70 = tpu.matmul %68, %69, %cst_44 {dimension_numbers = #tpu.dot_dimension_numbers<[1], [0], [0], [1], [0, 0, 1, 1], [], []>} : vector<1x512xbf16>, vector<512x128xbf16>, vector<1x128xf32> -> vector<1x128xf32>
    %c0_45 = arith.constant 0 : index
    %c0_46 = arith.constant 0 : index
    %71 = vector.load %arg7[%c0_45, %c0_46] : memref<1x128xf32, #tpu.memory_space<vmem>>, vector<1x128xf32>
    %72 = arith.addf %70, %71 : vector<1x128xf32>
    %c0_47 = arith.constant 0 : index
    %c0_48 = arith.constant 0 : index
    %c0_49 = arith.constant 0 : index
    %73 = vector.load %arg8[%c0_47, %c0_48, %c0_49] : memref<1x1x128xf32, #tpu.memory_space<vmem>>, vector<1x1x128xf32>
    %74 = vector.shape_cast %73 : vector<1x1x128xf32> to vector<1x128xf32>
    %75 = vector.shape_cast %72 : vector<1x128xf32> to vector<1x1x128xf32>
    tpu.vector_store %arg8[%c0_47, %c0_48, %c0_49], %75 {strides = array<i32>} : memref<1x1x128xf32, #tpu.memory_space<vmem>>, vector<1x1x128xf32>,
    return
  }
  func.func @transform_0(%arg0: i32) -> (i32, i32, i32) {
    %c0_i32 = arith.constant 0 : i32
    %c0_i32_0 = arith.constant 0 : i32
    %c0_i32_1 = arith.constant 0 : i32
    return %arg0, %c0_i32, %c0_i32_0 : i32, i32, i32
  }
  func.func @transform_1(%arg0: i32) -> (i32, i32, i32) {
    %c0_i32 = arith.constant 0 : i32
    %c0_i32_0 = arith.constant 0 : i32
    %c0_i32_1 = arith.constant 0 : i32
    %c0_i32_2 = arith.constant 0 : i32
    return %c0_i32, %c0_i32_0, %c0_i32_1 : i32, i32, i32
  }
  func.func @transform_2(%arg0: i32) -> (i32, i32) {
    %c0_i32 = arith.constant 0 : i32
    %c0_i32_0 = arith.constant 0 : i32
    %c0_i32_1 = arith.constant 0 : i32
    return %c0_i32, %c0_i32_0 : i32, i32
  }
  func.func @transform_3(%arg0: i32) -> (i32, i32, i32) {
    %c0_i32 = arith.constant 0 : i32
    %c0_i32_0 = arith.constant 0 : i32
    %c0_i32_1 = arith.constant 0 : i32
    %c0_i32_2 = arith.constant 0 : i32
    return %c0_i32, %c0_i32_0, %c0_i32_1 : i32, i32, i32
  }
  func.func @transform_4(%arg0: i32) -> (i32, i32) {
    %c0_i32 = arith.constant 0 : i32
    %c0_i32_0 = arith.constant 0 : i32
    %c0_i32_1 = arith.constant 0 : i32
    return %c0_i32, %c0_i32_0 : i32, i32
  }
  func.func @transform_5(%arg0: i32) -> (i32, i32) {
    %c0_i32 = arith.constant 0 : i32
    %c0_i32_0 = arith.constant 0 : i32
    %c0_i32_1 = arith.constant 0 : i32
    return %c0_i32, %c0_i32_0 : i32, i32
  }
  func.func @transform_6(%arg0: i32) -> (i32, i32) {
    %c0_i32 = arith.constant 0 : i32
    %c0_i32_0 = arith.constant 0 : i32
    %c0_i32_1 = arith.constant 0 : i32
    return %c0_i32, %c0_i32_0 : i32, i32
  }
  func.func @transform_7(%arg0: i32) -> (i32, i32, i32) {
    %c0_i32 = arith.constant 0 : i32
    %c0_i32_0 = arith.constant 0 : i32
    %c0_i32_1 = arith.constant 0 : i32
    return %arg0, %c0_i32, %c0_i32_0 : i32, i32, i32
  }
}

</mosaic_0001>

<bundles_post_ra>
// kernel: dqn_forward.3
= control target key start
LH: loop header
LB: loop body
LE: loop exit
PB: predicated region body
PF: predicated region fallthrough
CT: control target
= control target key end

     0   :  { %s3322_s12 = smov 0   ;;  %s4510_s0 = inlined_call_operand.vmem [shape: bf16[2,272,192], index: 0, kind: input, shape index: {}]   ;;  %s4511_s1 = inlined_call_operand.vmem [shape: bf16[4,192,32], index: 1, kind: input, shape index: {}]   ;;  %s4512_s2 = inlined_call_operand.vmem [shape: f32[1,32], index: 2, kind: input, shape index: {}]   ;;  %s4513_s3 = inlined_call_operand.vmem [shape: bf16[2,240,32], index: 3, kind: output, shape index: {}]  }
   0x1 LB: > { %s2601_s13 = sadd.s32 4294967295, %s3300_s12   ;;  %p2605_p0 = scmp.ge.s32.totalorder %s3300_s12, 1  ;;  %s3300_s12 = sphi %s3322_s12, %s13_s12  }
   0x2   : > { %p137_p1 = scmp.lt.s32.totalorder %s3300_s12, 3 }
   0x4   : > { %p138_p2 = pnand %p2605_p0, %p137_p1 }
   0x6   : > { %141 = sbr.rel (%p138_p2) target bundleno = 687 (0x2af), region = 32 }
   0xb   : > { %v3133_v0 = vld [vmem:[%s4511_s1 + $0x98] sm:$0xff]  ;;  %p161_p3 = scmp.lt.s32.totalorder %s2601_s13, 1  ;;  %v3132_v3 = vld [vmem:[%s4511_s1 + $0x90] sm:$0xff]  ;;  %v3131_v8 = vld [vmem:[%s4511_s1 + $0x88] sm:$0xff]  ;;  %vm379_vm0 = vsmask.f32 7424 }
   0xc   : > { %v3121_v1 = vld [vmem:[%s4511_s1 + $0x38] sm:$0xff]  ;;  %761 = vmatpush.bf16.msra.mxu0 %v3133_v0  ;;  %v3120_v4 = vld [vmem:[%s4511_s1 + $0x30] sm:$0xff]  ;;  %v3119_v9 = vld [vmem:[%s4511_s1 + $0x28] sm:$0xff]  ;;  %vm715_vm1 = vcmask 523264   ;;  %vm2515_vm6 = vcmask 257024  }
   0xd   : > { %v3125_v2 = vld [vmem:[%s4511_s1 + $0x58] sm:$0xff]  ;;  %1046 = vmatpush.bf16.msra.mxu2 %v3121_v1  ;;  %s4587_s13 = smov (!%p161_p3, %s2601_s13), 1  ;;  %v3124_v6 = vld [vmem:[%s4511_s1 + $0x50] sm:$0xff]  ;;  %v3123_v10 = vld [vmem:[%s4511_s1 + $0x48] sm:$0xff] }
   0xe   : > { %v3137_v5 = vld [vmem:[%s4511_s1 + $0xb8] sm:$0xff]  ;;  %1134 = vmatpush.bf16.msra.mxu3 %v3125_v2  ;;  %v3136_v7 = vld [vmem:[%s4511_s1 + $0xb0] sm:$0xff]  ;;  %s3162_s30 = smul.u32 272, %s4587_s13  ;;  %v3135_v14 = vld [vmem:[%s4511_s1 + $0xa8] sm:$0xff] }
   0xf   : > { %849 = vmatpush.bf16.msra.mxu1 %v3137_v5  ;;  %v3130_v18 = vld [vmem:[%s4511_s1 + $0x80] sm:$0xff]  ;;  %v3149_v28 = vld [vmem:[%s4511_s1 + $0x118] sm:$0xff]  ;;  %v3128_v40 = vld [vmem:[%s4511_s1 + $0x70] sm:$0xff]  ;;  %s3163_s19 = smul.u32 120, %s4587_s13 }
  0x10   : > { %762 = vmatpush.bf16.msra.mxu0 %v3132_v3  ;;  %s3369_s14 = scalar_lea.vmem %s4510_s0, %s3162_s30  ;;  %v3118_v19 = vld [vmem:[%s4511_s1 + $0x20] sm:$0xff]  ;;  %v3145_v30 = vld [vmem:[%s4511_s1 + $0xf8] sm:$0xff]  ;;  %v3116_v43 = vld [vmem:[%s4511_s1 + $0x10] sm:$0xff] }
  0x11   : > { %1047 = vmatpush.bf16.msra.mxu2 %v3120_v4  ;;  %v3084_v11 = vld [vmem:[%s3369_s14 + $0x4] sm:$0xf]  ;;  %v2636_v12 = vld [vmem:[%s3369_s14 + $0x8] sm:$0xf0]  ;;  %v3086_v13 = vld [vmem:[%s3369_s14 + $0x14] sm:$0xf]  ;;  %s4005_s21 = scalar_lea.vmem %s4513_s3, %s3163_s19 }
  0x12   : > { %1135 = vmatpush.bf16.msra.mxu3 %v3124_v6  ;;  %v2639_v15 = vor.u32 %v3084_v11, %v2636_v12  ;;  %v2644_v16 = vld [vmem:[%s3369_s14 + $0x18] sm:$0xf0]  ;;  %v3122_v22 = vld [vmem:[%s4511_s1 + $0x40] sm:$0xff]  ;;  %v3085_v25 = vld [vmem:[%s3369_s14 + $0x4] sm:$0xf0] }
  0x13   : > { %850 = vmatpush.bf16.msra.mxu1 %v3136_v7  ;;  %v3378_v17 = vor.u32 %v3086_v13, %v2644_v16  ;;  %v2634_v24 = vld [vmem:[%s3369_s14] sm:$0xf]  ;;  %v3129_v31 = vld [vmem:[%s4511_s1 + $0x78] sm:$0xff]  ;;  %v2642_v35 = vld [vmem:[%s3369_s14 + $0x10] sm:$0xf] }
  0x14   : > { %763 = vmatpush.bf16.msra.mxu0 %v3131_v8  ;;  %v395_v20 = vshll.u32 %v2639_v15, 16  ;;  %v393_v21 = vshrl.u32 %v2639_v15, 16  ;;  %v3134_v26 = vld [vmem:[%s4511_s1 + $0xa0] sm:$0xff]  ;;  %v2635_v33 = vor.u32 %v3085_v25, %v2634_v24  ;;  %v3117_v34 = vld [vmem:[%s4511_s1 + $0x18] sm:$0xff]  ;;  %v2652_v39 = vld [vmem:[%s3369_s14 + $0x28] sm:$0xf0] }
  0x15   : > { %1048 = vmatpush.bf16.msra.mxu2 %v3119_v9  ;;  %v400_v23 = vshll.u32 %v3378_v17, 16  ;;  %v3087_v36 = vld [vmem:[%s3369_s14 + $0x14] sm:$0xf0]  ;;  %v3088_v38 = vld [vmem:[%s3369_s14 + $0x24] sm:$0xf]  ;;  %v3127_v45 = vld [vmem:[%s4511_s1 + $0x68] sm:$0xff] }
  0x16   : > { %1136 = vmatpush.bf16.msra.mxu3 %v3123_v10  ;;  %v397_v27 = vrot.slane %v395_v20, 1  ;;  %v3416_v41 = vor.u32 %v3087_v36, %v2642_v35  ;;  %v383_v42 = vshll.u32 %v2635_v33, 16  ;;  %v3422_v44 = vor.u32 %v3088_v38, %v2652_v39  ;;  %v3115_v49 = vld [vmem:[%s4511_s1 + $0x8] sm:$0xff]  ;;  %v3126_v52 = vld [vmem:[%s4511_s1 + $0x60] sm:$0xff]  ;;  %v3157_v56 = vld [vmem:[%s4511_s1 + $0x158] sm:$0xff] }
  0x17   : > { %851 = vmatpush.bf16.msra.mxu1 %v3135_v14  ;;  %v402_v29 = vrot.slane %v400_v23, 1  ;;  %v381_v46 = vshrl.u32 %v2635_v33, 16  ;;  %v412_v50 = vshrl.u32 %v3378_v17, 16  ;;  %v3114_v55 = vld [vmem:[%s4511_s1] sm:$0xff]  ;;  %v3161_v57 = vld [vmem:[%s4511_s1 + $0x178] sm:$0xff]  ;;  %v3144_v3 = vld [vmem:[%s4511_s1 + $0xf0] sm:$0xff] }
  0x18   : > { %764 = vmatpush.bf16.msra.mxu0 %v3130_v18  ;;  %v398_v32 = vor.u32 %v397_v27, %v393_v21  ;;  %v385_v47 = vrot.slane %v383_v42, 1  ;;  %v388_v48 = vshll.u32 %v3416_v41, 16  ;;  %v416_v51 = vshll.u32 %v3422_v44, 16  ;;  %v2650_v61 = vld [vmem:[%s3369_s14 + $0x20] sm:$0xf]  ;;  %v3156_v4 = vld [vmem:[%s4511_s1 + $0x150] sm:$0xff] }
  0x19   : > { %1049 = vmatpush.bf16.msra.mxu2 %v3118_v19  ;;  %v414_v58 = vor.u32 %v412_v50, %v402_v29  ;;  %v3089_v62 = vld [vmem:[%s3369_s14 + $0x24] sm:$0xf0]  ;;  %v3090_v0 = vld [vmem:[%s3369_s14 + $0x34] sm:$0xf]  ;;  %v2660_v1 = vld [vmem:[%s3369_s14 + $0x38] sm:$0xf0] }
  0x1a   : > { %1137 = vmatpush.bf16.msra.mxu3 %v3122_v22  ;;  %v403_v37 = vsel %vm379_vm0, %v398_v32, %v402_v29  ;;  %v386_v53 = vor.u32 %v385_v47, %v381_v46  ;;  %v390_v54 = vrot.slane %v388_v48, 1  ;;  %v418_v59 = vrot.slane %v416_v51, 1  ;;  %v3091_v16 = vld [vmem:[%s3369_s14 + $0x34] sm:$0xf0]  ;;  %v3092_v19 = vld [vmem:[%s3369_s14 + $0x44] sm:$0xf] }
  0x1b   : > { %852 = vmatpush.bf16.msra.mxu1 %v3134_v26  ;;  %v3455_v2 = vor.u32 %v3089_v62, %v2650_v61  ;;  %v3465_v5 = vor.u32 %v3090_v0, %v2660_v1  ;;  %v404_v6 = vshrl.u32 %v3416_v41, 16  ;;  %v428_v8 = vshrl.u32 %v3422_v44, 16  ;;  %v2668_v20 = vld [vmem:[%s3369_s14 + $0x48] sm:$0xf0]  ;;  %v3148_v22 = vld [vmem:[%s4511_s1 + $0x110] sm:$0xff] }
  0x1c   : > { %765 = vmatpush.bf16.msra.mxu0 %v3129_v31  ;;  %v391_v60 = vsel %vm379_vm0, %v386_v53, %v390_v54  ;;  %v3449_v63 = vsel %vm379_vm0, %v414_v58, %v418_v59  ;;  %v3160_v23 = vld [vmem:[%s4511_s1 + $0x170] sm:$0xff]  ;;  %v3495_v24 = vor.u32 %v3092_v19, %v2668_v20  ;;  %v3093_v35 = vld [vmem:[%s3369_s14 + $0x44] sm:$0xf0]  ;;  %v2676_v38 = vld [vmem:[%s3369_s14 + $0x58] sm:$0xf0] }
  0x1d   : > { %2863 = vmatmul.msk.bf16.vlgmr.msra.gmra.mxu3 %vm715_vm1, %v2639_v15  ;;  %1050 = vmatpush.bf16.msra.mxu2 %v3117_v34  ;;  %v408_v7 = vshll.u32 %v3455_v2, 16  ;;  %v432_v9 = vshll.u32 %v3465_v5, 16  ;;  %v406_v10 = vor.u32 %v404_v6, %v390_v54  ;;  %v430_v12 = vor.u32 %v428_v8, %v418_v59  ;;  %v2658_v15 = vld [vmem:[%s3369_s14 + $0x30] sm:$0xf]  ;;  %v2666_v34 = vld [vmem:[%s3369_s14 + $0x40] sm:$0xf] }
  0x1e   : > { %1408 = vmatpush.bf16.msrb.mxu3 %v3149_v28  ;;  %2800 = vmatmul.msk.bf16.vlgmr.msra.gmra.mxu1 %vm715_vm1, %v403_v37  ;;  %v3485_v21 = vor.u32 %v3091_v16, %v2658_v15  ;;  %v420_v25 = vshrl.u32 %v3455_v2, 16  ;;  %v444_v27 = vshrl.u32 %v3465_v5, 16  ;;  %v448_v28 = vshll.u32 %v3495_v24, 16  ;;  %v3094_v37 = vld [vmem:[%s3369_s14 + $0x54] sm:$0xf]  ;;  %v3155_v42 = vld [vmem:[%s4511_s1 + $0x148] sm:$0xff] }
  0x1f   : > { %1320 = vmatpush.bf16.msrb.mxu1 %v3145_v30  ;;  %v410_v11 = vrot.slane %v408_v7, 1  ;;  %v434_v13 = vrot.slane %v432_v9, 1  ;;  %v3515_v39 = vor.u32 %v3093_v35, %v2666_v34  ;;  %v460_v47 = vshrl.u32 %v3495_v24, 16  ;;  %v2674_v54 = vld [vmem:[%s3369_s14 + $0x50] sm:$0xf]  ;;  %v3154_v19 = vld [vmem:[%s4511_s1 + $0x140] sm:$0xff] }
  0x20   : > { %766 = vmatpush.bf16.msra.mxu0 %v3128_v40  ;;  %v424_v26 = vshll.u32 %v3485_v21, 16  ;;  %v450_v32 = vrot.slane %v448_v28, 1  ;;  %v3143_v40 = vld [vmem:[%s4511_s1 + $0xe8] sm:$0xff]  ;;  %v2692_v15 = vld [vmem:[%s3369_s14 + $0x78] sm:$0xf0] }
  0x21   : > { %1051 = vmatpush.bf16.msra.mxu2 %v3116_v43  ;;  %v3472_v14 = vsel %vm379_vm0, %v406_v10, %v410_v11  ;;  %v3477_v18 = vsel %vm379_vm0, %v430_v12, %v434_v13  ;;  %v422_v29 = vor.u32 %v420_v25, %v410_v11  ;;  %v446_v31 = vor.u32 %v444_v27, %v434_v13  ;;  %v2684_v58 = vld [vmem:[%s3369_s14 + $0x68] sm:$0xf0]  ;;  %v2682_v10 = vld [vmem:[%s3369_s14 + $0x60] sm:$0xf]  ;;  %v3097_v11 = vld [vmem:[%s3369_s14 + $0x64] sm:$0xf0] }
  0x22   : > { %1409 = vmatpush.bf16.msrb.mxu3 %v3148_v22  ;;  %v426_v30 = vrot.slane %v424_v26, 1  ;;  %v3525_v43 = vor.u32 %v3094_v37, %v2676_v38  ;;  %v440_v46 = vshll.u32 %v3515_v39, 16  ;;  %v462_v51 = vor.u32 %v460_v47, %v450_v32  ;;  %v3098_v13 = vld [vmem:[%s3369_s14 + $0x74] sm:$0xf]  ;;  %v3099_v34 = vld [vmem:[%s3369_s14 + $0x74] sm:$0xf0] }
  0x23   : > { %1321 = vmatpush.bf16.msrb.mxu1 %v3144_v3  ;;  %v3507_v36 = vsel %vm379_vm0, %v446_v31, %v450_v32  ;;  %v452_v62 = vshrl.u32 %v3515_v39, 16  ;;  %v3572_v16 = vor.u32 %v3097_v11, %v2682_v10  ;;  %v3579_v20 = vor.u32 %v3098_v13, %v2692_v15  ;;  %v2690_v32 = vld [vmem:[%s3369_s14 + $0x70] sm:$0xf]  ;;  %v3100_v37 = vld [vmem:[%s3369_s14 + $0x84] sm:$0xf] }
  0x24   : > { %767 = vmatpush.bf16.msra.mxu0 %v3127_v45  ;;  %v436_v45 = vshrl.u32 %v3485_v21, 16  ;;  %v464_v48 = vshll.u32 %v3525_v43, 16  ;;  %v442_v50 = vrot.slane %v440_v46, 1  ;;  %v476_v1 = vshrl.u32 %v3525_v43, 16  ;;  %v2700_v38 = vld [vmem:[%s3369_s14 + $0x88] sm:$0xf0] }
  0x25   : > { %1052 = vmatpush.bf16.msra.mxu2 %v3115_v49  ;;  %v496_v26 = vshll.u32 %v3579_v20, 16  ;;  %v3159_v46 = vld [vmem:[%s4511_s1 + $0x168] sm:$0xff]  ;;  %v484_v47 = vshrl.u32 %v3572_v16, 16 }
  0x26   : > { %v438_v49 = vor.u32 %v436_v45, %v426_v30  ;;  %v3147_v45 = vld [vmem:[%s4511_s1 + $0x108] sm:$0xff] }
  0x27   : > { %1322 = vmatpush.bf16.msrb.mxu1 %v3143_v40  ;;  %v3599_v40 = vor.u32 %v3099_v34, %v2690_v32  ;;  %1410 = vmatpush.bf16.msrb.mxu3 %v3147_v45  ;;  %v2716_v32 = vld [vmem:[%s3369_s14 + $0xa8] sm:$0xf0] }
  0x28   : > { %768 = vmatpush.bf16.msra.mxu0 %v3126_v52  ;;  %v466_v52 = vrot.slane %v464_v48, 1  ;;  %v3532_v53 = vsel %vm379_vm0, %v438_v49, %v442_v50  ;;  %v508_v49 = vshrl.u32 %v3579_v20, 16 }
  0x29   : > { %1053 = vmatpush.bf16.msra.mxu2 %v3114_v55  ;;  %v3095_v55 = vld [vmem:[%s3369_s14 + $0x54] sm:$0xf0]  ;;  %v488_v48 = vshll.u32 %v3599_v40, 16 }
  0x2a   : > { %v3545_v59 = vor.u32 %v3095_v55, %v2674_v54  ;;  %v478_v7 = vor.u32 %v476_v1, %v466_v52 }
  0x2b   : > { %769 = vmatmul.bf16.vlgmr.msra.gmra.mxu0 %v391_v60  ;;  %v3142_v60 = vld [vmem:[%s4511_s1 + $0xe0] sm:$0xff] }
  0x2c   : > { %1653 = vmatpush.bf16.msrb.mxu0 %v3157_v56  ;;  %1054 = vmatmul.bf16.vlgmr.msra.gmra.mxu2 %v2635_v33  ;;  %v3502_v33 = vsel %vm379_vm0, %v422_v29, %v426_v30  ;;  %v3537_v56 = vsel %vm379_vm0, %v462_v51, %v466_v52  ;;  %v456_v0 = vshll.u32 %v3545_v59, 16  ;;  %v468_v22 = vshrl.u32 %v3545_v59, 16 }
  0x2d   : > { %1741 = vmatpush.bf16.msrb.mxu2 %v3161_v57  ;;  %2864 = vmatmul.msk.bf16.gmra.mxu3 %vm715_vm1, %v3378_v17  ;;  %v3096_v57 = vld [vmem:[%s3369_s14 + $0x64] sm:$0xf]  ;;  %v498_v30 = vrot.slane %v496_v26, 1  ;;  %v490_v52 = vrot.slane %v488_v48, 1  ;;  %v2706_v26 = vld [vmem:[%s3369_s14 + $0x90] sm:$0xf] }
  0x2e   : > { %2801 = vmatmul.msk.bf16.gmra.mxu1 %vm715_vm1, %v3449_v63  ;;  %v3552_v61 = vor.u32 %v3096_v57, %v2684_v58  ;;  %v458_v6 = vrot.slane %v456_v0, 1  ;;  %v3141_v57 = vld [vmem:[%s4511_s1 + $0xd8] sm:$0xff] }
  0x2f   : > { %1323 = vmatpush.bf16.msrb.mxu1 %v3142_v60  ;;  %v510_v54 = vor.u32 %v508_v49, %v498_v30  ;;  %v2698_v60 = vld [vmem:[%s3369_s14 + $0x80] sm:$0xf]  ;;  %v3153_v0 = vld [vmem:[%s4511_s1 + $0x138] sm:$0xff] }
  0x30   : > { %1654 = vmatpush.bf16.msrb.mxu0 %v3156_v4  ;;  %v480_v3 = vshll.u32 %v3552_v61, 16  ;;  %v454_v4 = vor.u32 %v452_v62, %v442_v50  ;;  %v492_v25 = vshrl.u32 %v3552_v61, 16  ;;  %v470_v27 = vor.u32 %v468_v22, %v458_v6  ;;  %v3101_v62 = vld [vmem:[%s3369_s14 + $0x84] sm:$0xf0] }
  0x31   : > { %1742 = vmatpush.bf16.msrb.mxu2 %v3160_v23  ;;  %v472_v23 = vshll.u32 %v3572_v16, 16 }
  0x32   : > { %v482_v8 = vrot.slane %v480_v3, 1  ;;  %v3559_v9 = vsel %vm379_vm0, %v454_v4, %v458_v6  ;;  %v3102_v3 = vld [vmem:[%s3369_s14 + $0x94] sm:$0xf]  ;;  %v2708_v4 = vld [vmem:[%s3369_s14 + $0x98] sm:$0xf0]  ;;  %v3635_v6 = vor.u32 %v3101_v62, %v2698_v60 }
  0x33   : > { %v474_v28 = vrot.slane %v472_v23, 1  ;;  %1324 = vmatpush.bf16.msrb.mxu1 %v3141_v57 }
  0x34   : > { %1655 = vmatpush.bf16.msrb.mxu0 %v3155_v42  ;;  %v3564_v12 = vsel %vm379_vm0, %v478_v7, %v482_v8  ;;  %v494_v29 = vor.u32 %v492_v25, %v482_v8  ;;  %v3603_v42 = vor.u32 %v3100_v37, %v2700_v38  ;;  %v3639_v7 = vor.u32 %v3102_v3, %v2708_v4  ;;  %v2714_v3 = vld [vmem:[%s3369_s14 + $0xa0] sm:$0xf]  ;;  %v3105_v4 = vld [vmem:[%s3369_s14 + $0xa4] sm:$0xf0] }
  0x35   : > { %v3586_v31 = vsel %vm379_vm0, %v470_v27, %v474_v28  ;;  %1743 = vmatpush.bf16.msrb.mxu2 %v3159_v46  ;;  %v486_v51 = vor.u32 %v484_v47, %v474_v28  ;;  %v500_v8 = vshrl.u32 %v3599_v40, 16  ;;  %v504_v10 = vshll.u32 %v3635_v6, 16  ;;  %v3103_v27 = vld [vmem:[%s3369_s14 + $0x94] sm:$0xf0] }
  0x36   : > { %v3591_v35 = vsel %vm379_vm0, %v494_v29, %v498_v30  ;;  %v512_v50 = vshll.u32 %v3603_v42, 16  ;;  %v524_v11 = vshrl.u32 %v3603_v42, 16  ;;  %v528_v13 = vshll.u32 %v3639_v7, 16  ;;  %v3104_v30 = vld [vmem:[%s3369_s14 + $0xa4] sm:$0xf] }
  0x37   : > { %v3619_v58 = vsel %vm379_vm0, %v486_v51, %v490_v52  ;;  %v502_v15 = vor.u32 %v500_v8, %v490_v52  ;;  %v3659_v34 = vor.u32 %v3103_v27, %v2706_v26  ;;  %v3663_v37 = vor.u32 %v3104_v30, %v2716_v32 }
  0x38   : > { %1656 = vmatpush.bf16.msrb.mxu0 %v3154_v19  ;;  %v514_v55 = vrot.slane %v512_v50, 1  ;;  %v506_v19 = vrot.slane %v504_v10, 1  ;;  %v530_v23 = vrot.slane %v528_v13, 1  ;;  %v516_v45 = vshrl.u32 %v3635_v6, 16  ;;  %v3140_v50 = vld [vmem:[%s4511_s1 + $0xd0] sm:$0xff] }
  0x39   : > { %4533 = vst [vmem:[#allocation3_spill] sm:$0xff] %v3659_v34  ;;  %v520_v46 = vshll.u32 %v3659_v34, 16  ;;  %v540_v48 = vshrl.u32 %v3639_v7, 16  ;;  %v544_v49 = vshll.u32 %v3663_v37, 16  ;;  %1325 = vmatpush.bf16.msrb.mxu1 %v3140_v50  ;;  %v3106_v13 = vld [vmem:[%s3369_s14 + $0xb4] sm:$0xf] }
  0x3a   : > { %v3627_v1 = vsel %vm379_vm0, %v510_v54, %v514_v55  ;;  %v526_v22 = vor.u32 %v524_v11, %v514_v55  ;;  %v3646_v25 = vsel %vm379_vm0, %v502_v15, %v506_v19  ;;  %4534 = vst [vmem:[#allocation4_spill] sm:$0xff] %v3663_v37  ;;  %v518_v51 = vor.u32 %v516_v45, %v506_v19  ;;  %v3152_v11 = vld [vmem:[%s4511_s1 + $0x130] sm:$0xff]  ;;  %v2724_v15 = vld [vmem:[%s3369_s14 + $0xb8] sm:$0xf0] }
  0x3b   : > { %774 = vmatmul.bf16.gmra.mxu0 %v3472_v14  ;;  %v522_v52 = vrot.slane %v520_v46, 1  ;;  %v542_v54 = vor.u32 %v540_v48, %v530_v23  ;;  %v546_v55 = vrot.slane %v544_v49, 1  ;;  %v3689_v19 = vor.u32 %v3105_v4, %v2714_v3 }
  0x3c   : > { %1059 = vmatmul.bf16.gmra.mxu2 %v3416_v41  ;;  %1657 = vmatpush.bf16.msrb.mxu0 %v3153_v0  ;;  %v3651_v29 = vsel %vm379_vm0, %v526_v22, %v530_v23  ;;  %v3693_v22 = vor.u32 %v3106_v13, %v2724_v15  ;;  %v532_v30 = vshrl.u32 %v3659_v34, 16  ;;  %v556_v49 = vshrl.u32 %v3663_v37, 16  ;;  %v2722_v15 = vld [vmem:[%s3369_s14 + $0xb0] sm:$0xf] }
  0x3d   : > { %2865 = vmatmul.msk.bf16.gmra.mxu3 %vm715_vm1, %v3422_v44  ;;  %4532 = vst [vmem:[#allocation2_spill] sm:$0xff] %v3651_v29  ;;  %v3673_v62 = vsel %vm379_vm0, %v518_v51, %v522_v52  ;;  %v3678_v10 = vsel %vm379_vm0, %v542_v54, %v546_v55  ;;  %v536_v32 = vshll.u32 %v3689_v19, 16 }
  0x3e   : > { %2802 = vmatmul.msk.bf16.gmra.mxu1 %vm715_vm1, %v3477_v18  ;;  %4535 = vst [vmem:[#allocation5_spill] sm:$0xff] %v3678_v10  ;;  %v560_v50 = vshll.u32 %v3693_v22, 16  ;;  %v534_v51 = vor.u32 %v532_v30, %v522_v52  ;;  %v2732_v30 = vld [vmem:[%s3369_s14 + $0xc8] sm:$0xf0] }
  0x3f   : > { %4536 = vst [vmem:[#allocation6_spill] sm:$0xff] %v3689_v19  ;;  %v538_v54 = vrot.slane %v536_v32, 1 }
  0x40   : > { %1658 = vmatpush.bf16.msrb.mxu0 %v3152_v11  ;;  %4537 = vst [vmem:[#allocation7_spill] sm:$0xff] %v3693_v22 }
  0x4b   : > { %779 = vmatmul.bf16.gmra.mxu0 %v3502_v33 }
  0x4c   : > { %1064 = vmatmul.bf16.gmra.mxu2 %v3455_v2 }
  0x4d   : > { %2866 = vmatmul.msk.bf16.gmra.mxu3 %vm715_vm1, %v3465_v5 }
  0x4e   : > { %2803 = vmatmul.msk.bf16.gmra.mxu1 %vm715_vm1, %v3507_v36 }
  0x5b   : > { %784 = vmatmul.bf16.gmra.mxu0 %v3532_v53 }
  0x5c   : > { %1069 = vmatmul.bf16.gmra.mxu2 %v3485_v21 }
  0x5d   : > { %2867 = vmatmul.msk.bf16.gmra.mxu3 %vm715_vm1, %v3495_v24 }
  0x5e   : > { %2804 = vmatmul.msk.bf16.gmra.mxu1 %vm715_vm1, %v3537_v56 }
  0x6b   : > { %789 = vmatmul.bf16.gmra.mxu0 %v3559_v9 }
  0x6c   : > { %1074 = vmatmul.bf16.gmra.mxu2 %v3515_v39 }
  0x6d   : > { %2868 = vmatmul.msk.bf16.gmra.mxu3 %vm715_vm1, %v3525_v43 }
  0x6e   : > { %2805 = vmatmul.msk.bf16.gmra.mxu1 %vm715_vm1, %v3564_v12 }
  0x7b   : > { %794 = vmatmul.bf16.gmra.mxu0 %v3586_v31 }
  0x7c   : > { %1079 = vmatmul.bf16.gmra.mxu2 %v3545_v59 }
  0x7d   : > { %2869 = vmatmul.msk.bf16.gmra.mxu3 %vm715_vm1, %v3552_v61 }
  0x7e   : > { %2806 = vmatmul.msk.bf16.gmra.mxu1 %vm715_vm1, %v3591_v35 }
  0x8b   : > { %799 = vmatmul.bf16.gmra.mxu0 %v3619_v58 }
  0x8c   : > { %1084 = vmatmul.bf16.gmra.mxu2 %v3572_v16 }
  0x8d   : > { %2870 = vmatmul.msk.bf16.gmra.mxu3 %vm715_vm1, %v3579_v20 }
  0x8e   : > { %2807 = vmatmul.msk.bf16.gmra.mxu1 %vm715_vm1, %v3627_v1 }
  0x9b   : > { %v854_v28 = vpop.f32.mrf.mxu1  ;;  %804 = vmatmul.bf16.gmra.mxu0 %v3646_v25 }
  0x9c   : > { %1089 = vmatmul.bf16.gmra.mxu2 %v3599_v40 }
  0x9d   : > { %2871 = vmatmul.msk.bf16.gmra.mxu3 %vm715_vm1, %v3603_v42 }
  0x9e   : > { %2808 = vmatmul.msk.bf16.gmra.mxu1 %vm715_vm1, %v3651_v29 }
  0xa0   : > { %v1139_v38 = vpop.f32.mrf.mxu3 }
  0xa3   : > { %v856_v47 = vpop.f32.mrf.mxu1 }
  0xa8   : > { %v1141_v57 = vpop.f32.mrf.mxu3  ;;  %v770_v60 = vpop.f32.mrf.mxu0 }
  0xa9   : > { %v855_v0 = vadd.f32 %v854_v28, %v770_v60  ;;  %v558_v60 = vor.u32 %v556_v49, %v546_v55  ;;  %v3108_v55 = vld [vmem:[%s3369_s14 + $0xc4] sm:$0xf] }
  0xab   : > { %v859_v8 = vpop.f32.mrf.mxu1  ;;  %809 = vmatmul.bf16.gmra.mxu0 %v3673_v62 }
  0xac   : > { %1094 = vmatmul.bf16.gmra.mxu2 %v3635_v6 }
  0xad   : > { %2872 = vmatmul.msk.bf16.gmra.mxu3 %vm715_vm1, %v3639_v7 }
  0xae   : > { %2809 = vmatmul.msk.bf16.gmra.mxu1 %vm715_vm1, %v3678_v10 }
  0xaf   : > { %v1055_v23 = vpop.f32.mrf.mxu2 }
  0xb0   : > { %v1144_v26 = vpop.f32.mrf.mxu3  ;;  %v1056_v27 = vadd.f32 %v1055_v23, %v855_v0  ;;  %v772_v28 = vpop.f32.mrf.mxu0  ;;  %v562_v0 = vrot.slane %v560_v50, 1  ;;  %v3107_v23 = vld [vmem:[%s3369_s14 + $0xb4] sm:$0xf0] }
  0xb1   : > { %v857_v45 = vadd.f32 %v856_v47, %v772_v28  ;;  %v3702_v47 = vsel %vm379_vm0, %v534_v51, %v538_v54  ;;  %v3717_v32 = vor.u32 %v3107_v23, %v2722_v15  ;;  %v572_v23 = vshrl.u32 %v3693_v22, 16 }
  0xb2   : > { %v3697_v46 = vadd.f32 %v1139_v38, %v1056_v27  ;;  %4539 = vst [vmem:[#allocation9_spill] sm:$0xff] %v3702_v47  ;;  %v3709_v52 = vsel %vm379_vm0, %v558_v60, %v562_v0  ;;  %v548_v60 = vshrl.u32 %v3689_v19, 16 }
  0xb3   : > { %v861_v48 = vpop.f32.mrf.mxu1  ;;  %4541 = vst [vmem:[#allocation11_spill] sm:$0xff] %v3709_v52 }
  0xb4   : > { %4538 = vst [vmem:[#allocation8_spill] sm:$0xff] %v3697_v46 }
  0xb5   : > { %4542 = vst [vmem:[#allocation12_spill] sm:$0xff] %v3717_v32 }
  0xb7   : > { %v1057_v3 = vpop.f32.mrf.mxu2 }
  0xb8   : > { %v1146_v4 = vpop.f32.mrf.mxu3  ;;  %v1058_v11 = vadd.f32 %v1057_v3, %v857_v45  ;;  %v775_v13 = vpop.f32.mrf.mxu0  ;;  %v552_v3 = vshll.u32 %v3717_v32, 16 }
  0xb9   : > { %v860_v38 = vadd.f32 %v859_v8, %v775_v13  ;;  %v3724_v8 = vor.u32 %v3108_v55, %v2732_v30  ;;  %v3158_v55 = vld [vmem:[%s4511_s1 + $0x160] sm:$0xff] }
  0xba   : > { %v3706_v27 = vadd.f32 %v1141_v57, %v1058_v11  ;;  %v3146_v57 = vld [vmem:[%s4511_s1 + $0x100] sm:$0xff]  ;;  %v554_v30 = vrot.slane %v552_v3, 1  ;;  %1744 = vmatpush.bf16.msrb.mxu2 %v3158_v55 }
  0xbb   : > { %v864_v28 = vpop.f32.mrf.mxu1  ;;  %814 = vmatmul.bf16.gmra.mxu0 %v3702_v47  ;;  %4543 = vst [vmem:[#allocation13_spill] sm:$0xff] %v3724_v8  ;;  %1411 = vmatpush.bf16.msrb.mxu3 %v3146_v57  ;;  %v574_v57 = vor.u32 %v572_v23, %v562_v0  ;;  %v3109_v47 = vld [vmem:[%s3369_s14 + $0xc4] sm:$0xf0]  ;;  %v3110_v0 = vld [vmem:[%s3369_s14 + $0xd4] sm:$0xf]  ;;  %v564_v23 = vshrl.u32 %v3717_v32, 16 }
  0xbc   : > { %4540 = vst [vmem:[#allocation10_spill] sm:$0xff] %v3706_v27  ;;  %1099 = vmatmul.bf16.gmra.mxu2 %v3659_v34  ;;  %v576_v27 = vshll.u32 %v3724_v8, 16 }
  0xbd   : > { %2873 = vmatmul.msk.bf16.gmra.mxu3 %vm715_vm1, %v3663_v37  ;;  %v2730_v37 = vld [vmem:[%s3369_s14 + $0xc0] sm:$0xf] }
  0xbe   : > { %2810 = vmatmul.msk.bf16.gmra.mxu1 %vm715_vm1, %v3709_v52  ;;  %v3757_v3 = vor.u32 %v3109_v47, %v2730_v37  ;;  %v588_v47 = vshrl.u32 %v3724_v8, 16 }
  0xbf   : > { %v1060_v45 = vpop.f32.mrf.mxu2 }
  0xc0   : > { %v1149_v49 = vpop.f32.mrf.mxu3  ;;  %v1061_v50 = vadd.f32 %v1060_v45, %v860_v38  ;;  %v777_v51 = vpop.f32.mrf.mxu0  ;;  %v3139_v38 = vld [vmem:[%s4511_s1 + $0xc8] sm:$0xff]  ;;  %v578_v45 = vrot.slane %v576_v27, 1  ;;  %v2740_v27 = vld [vmem:[%s3369_s14 + $0xd8] sm:$0xf0]  ;;  %v568_v55 = vshll.u32 %v3757_v3, 16 }
  0xc1   : > { %v862_v11 = vadd.f32 %v861_v48, %v777_v51  ;;  %v550_v48 = vor.u32 %v548_v60, %v538_v54  ;;  %1326 = vmatpush.bf16.msrb.mxu1 %v3139_v38 }
  0xc2   : > { %v3728_v13 = vadd.f32 %v1144_v26, %v1061_v50  ;;  %v3151_v26 = vld [vmem:[%s4511_s1 + $0x128] sm:$0xff]  ;;  %v3749_v60 = vsel %vm379_vm0, %v574_v57, %v578_v45  ;;  %v566_v57 = vor.u32 %v564_v23, %v554_v30 }
  0xc3   : > { %v866_v15 = vpop.f32.mrf.mxu1  ;;  %1659 = vmatpush.bf16.msrb.mxu0 %v3151_v26  ;;  %v3742_v46 = vsel %vm379_vm0, %v550_v48, %v554_v30  ;;  %4547 = vst [vmem:[#allocation17_spill] sm:$0xff] %v3749_v60  ;;  %v2748_v23 = vld [vmem:[%s3369_s14 + $0xe8] sm:$0xf0] }
  0xc4   : > { %4544 = vst [vmem:[#allocation14_spill] sm:$0xff] %v3728_v13 }
  0xc5   : > { %4545 = vst [vmem:[#allocation15_spill] sm:$0xff] %v3742_v46 }
  0xc7   : > { %v1062_v50 = vpop.f32.mrf.mxu2 }
  0xc8   : > { %v1151_v51 = vpop.f32.mrf.mxu3  ;;  %v1063_v13 = vadd.f32 %v1062_v50, %v862_v11  ;;  %v780_v52 = vpop.f32.mrf.mxu0  ;;  %v570_v50 = vrot.slane %v568_v55, 1 }
  0xc9   : > { %v865_v10 = vadd.f32 %v864_v28, %v780_v52 }
  0xca   : > { %v3746_v34 = vadd.f32 %v1146_v4, %v1063_v13  ;;  %v3761_v4 = vor.u32 %v3110_v0, %v2740_v27 }
  0xcb   : > { %v869_v54 = vpop.f32.mrf.mxu1  ;;  %819 = vmatmul.bf16.gmra.mxu0 %v3742_v46  ;;  %v3113_v46 = vld [vmem:[%s3369_s14 + $0xe4] sm:$0xf0] }
  0xcc   : > { %4546 = vst [vmem:[#allocation16_spill] sm:$0xff] %v3746_v34  ;;  %1104 = vmatmul.bf16.gmra.mxu2 %v3689_v19  ;;  %v592_v48 = vshll.u32 %v3761_v4, 16 }
  0xcd   : > { %2874 = vmatmul.msk.bf16.gmra.mxu3 %vm715_vm1, %v3693_v22  ;;  %4548 = vst [vmem:[#allocation18_spill] sm:$0xff] %v3761_v4 }
  0xce   : > { %2811 = vmatmul.msk.bf16.gmra.mxu1 %vm715_vm1, %v3749_v60  ;;  %v594_v0 = vrot.slane %v592_v48, 1 }
  0xcf   : > { %v1065_v28 = vpop.f32.mrf.mxu2 }
  0xd0   : > { %v1154_v52 = vpop.f32.mrf.mxu3  ;;  %v1066_v11 = vadd.f32 %v1065_v28, %v865_v10  ;;  %v782_v13 = vpop.f32.mrf.mxu0  ;;  %v590_v10 = vor.u32 %v588_v47, %v578_v45  ;;  %v3112_v45 = vld [vmem:[%s3369_s14 + $0xe4] sm:$0xf]  ;;  %v580_v47 = vshrl.u32 %v3757_v3, 16 }
  0xd1   : > { %v867_v38 = vadd.f32 %v866_v15, %v782_v13  ;;  %v3770_v15 = vsel %vm379_vm0, %v566_v57, %v570_v50  ;;  %v3111_v13 = vld [vmem:[%s3369_s14 + $0xd4] sm:$0xf0] }
  0xd2   : > { %v3765_v26 = vadd.f32 %v1149_v49, %v1066_v11  ;;  %4550 = vst [vmem:[#allocation20_spill] sm:$0xff] %v3770_v15  ;;  %v2738_v11 = vld [vmem:[%s3369_s14 + $0xd0] sm:$0xf]  ;;  %v3777_v30 = vsel %vm379_vm0, %v590_v10, %v594_v0 }
  0xd3   : > { %v871_v37 = vpop.f32.mrf.mxu1  ;;  %4552 = vst [vmem:[#allocation22_spill] sm:$0xff] %v3777_v30  ;;  %v3785_v55 = vor.u32 %v3111_v13, %v2738_v11  ;;  %v604_v11 = vshrl.u32 %v3761_v4, 16 }
  0xd4   : > { %4549 = vst [vmem:[#allocation19_spill] sm:$0xff] %v3765_v26 }
  0xd5   : > { %v584_v48 = vshll.u32 %v3785_v55, 16 }
  0xd7   : > { %v1067_v27 = vpop.f32.mrf.mxu2 }
  0xd8   : > { %v1156_v28 = vpop.f32.mrf.mxu3  ;;  %v1068_v60 = vadd.f32 %v1067_v27, %v867_v38  ;;  %v785_v34 = vpop.f32.mrf.mxu0 }
  0xd9   : > { %v870_v49 = vadd.f32 %v869_v54, %v785_v34  ;;  %v3789_v34 = vor.u32 %v3112_v45, %v2748_v23  ;;  %v3138_v45 = vld [vmem:[%s4511_s1 + $0xc0] sm:$0xff]  ;;  %v582_v23 = vor.u32 %v580_v47, %v570_v50 }
  0xda   : > { %v3774_v26 = vadd.f32 %v1151_v51, %v1068_v60  ;;  %1327 = vmatpush.bf16.msrb.mxu1 %v3138_v45 }
  0xdb   : > { %v874_v22 = vpop.f32.mrf.mxu1  ;;  %824 = vmatmul.bf16.gmra.mxu0 %v3770_v15  ;;  %v608_v13 = vshll.u32 %v3789_v34, 16 }
  0xdc   : > { %4551 = vst [vmem:[#allocation21_spill] sm:$0xff] %v3774_v26  ;;  %1109 = vmatmul.bf16.gmra.mxu2 %v3717_v32  ;;  %v2746_v32 = vld [vmem:[%s3369_s14 + $0xe0] sm:$0xf] }
  0xdd   : > { %2875 = vmatmul.msk.bf16.gmra.mxu3 %vm715_vm1, %v3724_v8 }
  0xde   : > { %2812 = vmatmul.msk.bf16.gmra.mxu1 %vm715_vm1, %v3777_v30 }
  0xdf   : > { %v1070_v51 = vpop.f32.mrf.mxu2 }
  0xe0   : > { %v1159_v54 = vpop.f32.mrf.mxu3  ;;  %v1071_v60 = vadd.f32 %v1070_v51, %v870_v49  ;;  %v787_v38 = vpop.f32.mrf.mxu0  ;;  %v3150_v49 = vld [vmem:[%s4511_s1 + $0x120] sm:$0xff]  ;;  %v586_v51 = vrot.slane %v584_v48, 1 }
  0xe1   : > { %v872_v57 = vadd.f32 %v871_v37, %v787_v38  ;;  %1660 = vmatpush.bf16.msrb.mxu0 %v3150_v49  ;;  %v610_v37 = vrot.slane %v608_v13, 1 }
  0xe2   : > { %v3793_v10 = vadd.f32 %v1154_v52, %v1071_v60  ;;  %v606_v52 = vor.u32 %v604_v11, %v594_v0  ;;  %v3805_v8 = vsel %vm379_vm0, %v582_v23, %v586_v51  ;;  %v3820_v0 = vor.u32 %v3113_v46, %v2746_v32 }
  0xe3   : > { %v876_v27 = vpop.f32.mrf.mxu1  ;;  %4554 = vst [vmem:[#allocation24_spill] sm:$0xff] %v3805_v8  ;;  %v620_v46 = vshrl.u32 %v3789_v34, 16 }
  0xe4   : > { %4553 = vst [vmem:[#allocation23_spill] sm:$0xff] %v3793_v10  ;;  %v202_v10 = vld [vmem:[%s3369_s14 + $0xf0] sm:$0xff]  ;;  %v3812_v50 = vsel %vm379_vm0, %v606_v52, %v610_v37  ;;  %v600_v11 = vshll.u32 %v3820_v0, 16 }
  0xe5   : > { %4556 = vst [vmem:[#allocation26_spill] sm:$0xff] %v3812_v50  ;;  %v3814_v47 = vunpack.c.h.b16 %v202_v10 }
  0xe6   : > { %v602_v52 = vrot.slane %v600_v11, 1 }
  0xe7   : > { %v1072_v60 = vpop.f32.mrf.mxu2  ;;  %4557 = vst [vmem:[#allocation27_spill] sm:$0xff] %v3814_v47 }
  0xe8   : > { %v1161_v38 = vpop.f32.mrf.mxu3  ;;  %v1073_v30 = vadd.f32 %v1072_v60, %v872_v57  ;;  %v790_v26 = vpop.f32.mrf.mxu0  ;;  %v596_v57 = vshrl.u32 %v3785_v55, 16  ;;  %v3831_v60 = vor.u32 %v620_v46, %v610_v37 }
  0xe9   : > { %v875_v15 = vadd.f32 %v874_v22, %v790_v26  ;;  %v378_v22 = vpack.c.b16 %v3814_v47, %v3814_v47 }
  0xea   : > { %v3809_v19 = vadd.f32 %v1156_v28, %v1073_v30  ;;  %v598_v23 = vor.u32 %v596_v57, %v586_v51 }
  0xeb   : > { %v879_v29 = vpop.f32.mrf.mxu1  ;;  %829 = vmatmul.bf16.gmra.mxu0 %v3805_v8  ;;  %v624_v32 = vshll.u32 %v378_v22, 16  ;;  %v3836_v8 = vunpack.c.l.b16 %v202_v10  ;;  %v612_v22 = vshrl.u32 %v3820_v0, 16 }
  0xec   : > { %4555 = vst [vmem:[#allocation25_spill] sm:$0xff] %v3809_v19  ;;  %1114 = vmatmul.bf16.gmra.mxu2 %v3757_v3 }
  0xed   : > { %2876 = vmatmul.msk.bf16.gmra.mxu3 %vm715_vm1, %v3761_v4  ;;  %v3834_v4 = vsel %vm379_vm0, %v598_v23, %v602_v52  ;;  %v377_v37 = vpack.c.b16 %v3836_v8, %v3836_v8 }
  0xee   : > { %2813 = vmatmul.msk.bf16.gmra.mxu1 %vm715_vm1, %v3812_v50  ;;  %v626_v50 = vrot.slane %v624_v32, 1 }
  0xef   : > { %v1075_v26 = vpop.f32.mrf.mxu2 }
  0xf0   : > { %v1164_v28 = vpop.f32.mrf.mxu3  ;;  %v1076_v30 = vadd.f32 %v1075_v26, %v875_v15  ;;  %v792_v48 = vpop.f32.mrf.mxu0  ;;  %v627_v51 = vsel %vm379_vm0, %v3831_v60, %v626_v50 }
  0xf1   : > { %v877_v13 = vadd.f32 %v876_v27, %v792_v48  ;;  %v616_v48 = vshll.u32 %v377_v37, 16 }
  0xf2   : > { %v3828_v45 = vadd.f32 %v1159_v54, %v1076_v30 }
  0xf3   : > { %v881_v49 = vpop.f32.mrf.mxu1  ;;  %v618_v46 = vrot.slane %v616_v48, 1 }
  0xf7   : > { %v1077_v47 = vpop.f32.mrf.mxu2 }
  0xf8   : > { %v1166_v19 = vpop.f32.mrf.mxu3  ;;  %v1078_v15 = vadd.f32 %v1077_v47, %v877_v13  ;;  %v795_v26 = vpop.f32.mrf.mxu0  ;;  %v3852_v13 = vor.u32 %v612_v22, %v602_v52 }
  0xf9   : > { %v880_v54 = vadd.f32 %v879_v29, %v795_v26 }
  0xfa   : > { %v3838_v27 = vadd.f32 %v1161_v38, %v1078_v15 }
  0xfb   : > { %v884_v30 = vpop.f32.mrf.mxu1  ;;  %834 = vmatmul.bf16.gmra.mxu0 %v3834_v4 }
  0xfc   : > { %4558 = vst [vmem:[#allocation28_spill] sm:$0xff] %v3838_v27  ;;  %1119 = vmatmul.bf16.gmra.mxu2 %v3785_v55 }
  0xfd   : > { %2877 = vmatmul.msk.bf16.gmra.mxu3 %vm715_vm1, %v3789_v34 }
  0xfe   : > { %2814 = vmatmul.msk.bf16.gmra.mxu1 %vm715_vm1, %v627_v51  ;;  %v619_v51 = vsel %vm379_vm0, %v3852_v13, %v618_v46 }
  0xff   : > { %v1080_v10 = vpop.f32.mrf.mxu2 }
 0x100   : > { %v1169_v29 = vpop.f32.mrf.mxu3  ;;  %v1081_v38 = vadd.f32 %v1080_v10, %v880_v54  ;;  %v797_v47 = vpop.f32.mrf.mxu0 }
 0x101   : > { %v882_v50 = vadd.f32 %v881_v49, %v797_v47 }
 0x102   : > { %v3850_v57 = vadd.f32 %v1164_v28, %v1081_v38 }
 0x103   : > { %v886_v11 = vpop.f32.mrf.mxu1 }
 0x107   : > { %v1082_v32 = vpop.f32.mrf.mxu2 }
 0x108   : > { %v1171_v23 = vpop.f32.mrf.mxu3  ;;  %v1083_v15 = vadd.f32 %v1082_v32, %v882_v50  ;;  %v800_v26 = vpop.f32.mrf.mxu0 }
 0x109   : > { %v885_v27 = vadd.f32 %v884_v30, %v800_v26 }
 0x10a   : > { %v3856_v54 = vadd.f32 %v1166_v19, %v1083_v15 }
 0x10b   : > { %v889_v10 = vpop.f32.mrf.mxu1  ;;  %839 = vmatmul.bf16.gmra.mxu0 %v619_v51 }
 0x10c   : > { %1124 = vmatmul.bf16.gmra.mxu2 %v3820_v0 }
 0x10d   : > { %2950 = vmatmul.msk.bf16.vlgmr.msrb.gmra.mxu3 %vm715_vm1, %v3378_v17 }
 0x10e   : > { %1328 = vmatmul.bf16.vlgmr.msrb.gmra.mxu1 %v3416_v41 }
 0x10f   : > { %v1085_v28 = vpop.f32.mrf.mxu2 }
 0x110   : > { %v1174_v49 = vpop.f32.mrf.mxu3  ;;  %v1086_v52 = vadd.f32 %v1085_v28, %v885_v27  ;;  %v802_v37 = vpop.f32.mrf.mxu0 }
 0x111   : > { %v887_v38 = vadd.f32 %v886_v11, %v802_v37 }
 0x112   : > { %v3862_v47 = vadd.f32 %v1169_v29, %v1086_v52 }
 0x113   : > { %v891_v22 = vpop.f32.mrf.mxu1 }
 0x117   : > { %v1087_v30 = vpop.f32.mrf.mxu2 }
 0x118   : > { %v1176_v19 = vpop.f32.mrf.mxu3  ;;  %v1088_v48 = vadd.f32 %v1087_v30, %v887_v38  ;;  %v805_v50 = vpop.f32.mrf.mxu0 }
 0x119   : > { %v890_v46 = vadd.f32 %v889_v10, %v805_v50 }
 0x11a   : > { %v3864_v32 = vadd.f32 %v1171_v23, %v1088_v48 }
 0x11b   : > { %v894_v15 = vpop.f32.mrf.mxu1  ;;  %1661 = vmatmul.bf16.vlgmr.msrb.gmra.mxu0 %v3472_v14 }
 0x11c   : > { %3037 = vmatmul.msk.bf16.vlgmr.msrb.gmra.mxu2 %vm715_vm1, %v3449_v63 }
 0x11d   : > { %2951 = vmatmul.msk.bf16.gmra.mxu3 %vm715_vm1, %v3422_v44 }
 0x11e   : > { %1333 = vmatmul.bf16.gmra.mxu1 %v3455_v2 }
 0x11f   : > { %v1090_v17 = vpop.f32.mrf.mxu2 }
 0x120   : > { %v1179_v41 = vpop.f32.mrf.mxu3  ;;  %v1091_v27 = vadd.f32 %v1090_v17, %v890_v46  ;;  %v807_v29 = vpop.f32.mrf.mxu0 }
 0x121   : > { %v892_v11 = vadd.f32 %v891_v22, %v807_v29 }
 0x122   : > { %v3872_v26 = vadd.f32 %v1174_v49, %v1091_v27 }
 0x123   : > { %v896_v23 = vpop.f32.mrf.mxu1 }
 0x127   : > { %v1092_v51 = vpop.f32.mrf.mxu2 }
 0x128   : > { %v1181_v10 = vpop.f32.mrf.mxu3  ;;  %v1093_v28 = vadd.f32 %v1092_v51, %v892_v11  ;;  %v810_v14 = vpop.f32.mrf.mxu0 }
 0x129   : > { %v895_v52 = vadd.f32 %v894_v15, %v810_v14 }
 0x12a   : > { %v3874_v37 = vadd.f32 %v1176_v19, %v1093_v28 }
 0x12b   : > { %v899_v44 = vpop.f32.mrf.mxu1  ;;  %1666 = vmatmul.bf16.gmra.mxu0 %v3502_v33 }
 0x12c   : > { %3038 = vmatmul.msk.bf16.gmra.mxu2 %vm715_vm1, %v3477_v18 }
 0x12d   : > { %2952 = vmatmul.msk.bf16.gmra.mxu3 %vm715_vm1, %v3465_v5 }
 0x12e   : > { %1338 = vmatmul.bf16.gmra.mxu1 %v3485_v21 }
 0x12f   : > { %v1095_v63 = vpop.f32.mrf.mxu2 }
 0x130   : > { %v1184_v2 = vpop.f32.mrf.mxu3  ;;  %v1096_v49 = vadd.f32 %v1095_v63, %v895_v52  ;;  %v812_v38 = vpop.f32.mrf.mxu0 }
 0x131   : > { %v897_v22 = vadd.f32 %v896_v23, %v812_v38 }
 0x132   : > { %v3882_v30 = vadd.f32 %v1179_v41, %v1096_v49 }
 0x133   : > { %v901_v19 = vpop.f32.mrf.mxu1 }
 0x137   : > { %v1097_v48 = vpop.f32.mrf.mxu2 }
 0x138   : > { %v1186_v50 = vpop.f32.mrf.mxu3  ;;  %v1098_v46 = vadd.f32 %v1097_v48, %v897_v22  ;;  %v815_v33 = vpop.f32.mrf.mxu0 }
 0x139   : > { %v900_v15 = vadd.f32 %v899_v44, %v815_v33 }
 0x13a   : > { %v3884_v17 = vadd.f32 %v1181_v10, %v1098_v46 }
 0x13b   : > { %v904_v5 = vpop.f32.mrf.mxu1  ;;  %1671 = vmatmul.bf16.gmra.mxu0 %v3532_v53 }
 0x13c   : > { %3039 = vmatmul.msk.bf16.gmra.mxu2 %vm715_vm1, %v3507_v36 }
 0x13d   : > { %2953 = vmatmul.msk.bf16.gmra.mxu3 %vm715_vm1, %v3495_v24 }
 0x13e   : > { %1343 = vmatmul.bf16.gmra.mxu1 %v3515_v39 }
 0x13f   : > { %v1100_v18 = vpop.f32.mrf.mxu2 }
 0x140   : > { %v1189_v21 = vpop.f32.mrf.mxu3  ;;  %v1101_v41 = vadd.f32 %v1100_v18, %v900_v15  ;;  %v817_v27 = vpop.f32.mrf.mxu0 }
 0x141   : > { %v902_v29 = vadd.f32 %v901_v19, %v817_v27 }
 0x142   : > { %v3892_v11 = vadd.f32 %v1184_v2, %v1101_v41 }
 0x143   : > { %v906_v23 = vpop.f32.mrf.mxu1 }
 0x147   : > { %v1102_v51 = vpop.f32.mrf.mxu2 }
 0x148   : > { %v1191_v10 = vpop.f32.mrf.mxu3  ;;  %v1103_v28 = vadd.f32 %v1102_v51, %v902_v29  ;;  %v820_v53 = vpop.f32.mrf.mxu0 }
 0x149   : > { %v905_v14 = vadd.f32 %v904_v5, %v820_v53 }
 0x14a   : > { %v3894_v52 = vadd.f32 %v1186_v50, %v1103_v28 }
 0x14b   : > { %v909_v24 = vpop.f32.mrf.mxu1  ;;  %1676 = vmatmul.bf16.gmra.mxu0 %v3559_v9 }
 0x14c   : > { %3040 = vmatmul.msk.bf16.gmra.mxu2 %vm715_vm1, %v3537_v56 }
 0x14d   : > { %2954 = vmatmul.msk.bf16.gmra.mxu3 %vm715_vm1, %v3525_v43 }
 0x14e   : > { %1348 = vmatmul.bf16.gmra.mxu1 %v3545_v59 }
 0x14f   : > { %v1105_v36 = vpop.f32.mrf.mxu2 }
 0x150   : > { %v1194_v39 = vpop.f32.mrf.mxu3  ;;  %v1106_v44 = vadd.f32 %v1105_v36, %v905_v14  ;;  %v822_v63 = vpop.f32.mrf.mxu0 }
 0x151   : > { %v907_v2 = vadd.f32 %v906_v23, %v822_v63 }
 0x152   : > { %v3902_v49 = vadd.f32 %v1189_v21, %v1106_v44 }
 0x153   : > { %v911_v38 = vpop.f32.mrf.mxu1 }
 0x157   : > { %v1107_v22 = vpop.f32.mrf.mxu2 }
 0x158   : > { %v1196_v19 = vpop.f32.mrf.mxu3  ;;  %v1108_v48 = vadd.f32 %v1107_v22, %v907_v2  ;;  %v825_v9 = vpop.f32.mrf.mxu0 }
 0x159   : > { %v910_v50 = vadd.f32 %v909_v24, %v825_v9 }
 0x15a   : > { %v3904_v46 = vadd.f32 %v1191_v10, %v1108_v48 }
 0x15b   : > { %v914_v43 = vpop.f32.mrf.mxu1  ;;  %1681 = vmatmul.bf16.gmra.mxu0 %v3586_v31 }
 0x15c   : > { %3041 = vmatmul.msk.bf16.gmra.mxu2 %vm715_vm1, %v3564_v12 }
 0x15d   : > { %2955 = vmatmul.msk.bf16.gmra.mxu3 %vm715_vm1, %v3552_v61 }
 0x15e   : > { %1353 = vmatmul.bf16.gmra.mxu1 %v3572_v16 }
 0x15f   : > { %v1110_v56 = vpop.f32.mrf.mxu2 }
 0x160   : > { %v1199_v59 = vpop.f32.mrf.mxu3  ;;  %v1111_v33 = vadd.f32 %v1110_v56, %v910_v50  ;;  %v827_v15 = vpop.f32.mrf.mxu0 }
 0x161   : > { %v912_v5 = vadd.f32 %v911_v38, %v827_v15 }
 0x162   : > { %v3912_v18 = vadd.f32 %v1194_v39, %v1111_v33 }
 0x163   : > { %v916_v21 = vpop.f32.mrf.mxu1 }
 0x167   : > { %v1112_v41 = vpop.f32.mrf.mxu2 }
 0x168   : > { %v1201_v27 = vpop.f32.mrf.mxu3  ;;  %v1113_v29 = vadd.f32 %v1112_v41, %v912_v5  ;;  %v830_v31 = vpop.f32.mrf.mxu0 }
 0x169   : > { %v915_v23 = vadd.f32 %v914_v43, %v830_v31 }
 0x16a   : > { %v3914_v51 = vadd.f32 %v1196_v19, %v1113_v29 }
 0x16b   : > { %v919_v61 = vpop.f32.mrf.mxu1  ;;  %1686 = vmatmul.bf16.gmra.mxu0 %v3619_v58 }
 0x16c   : > { %3042 = vmatmul.msk.bf16.gmra.mxu2 %vm715_vm1, %v3591_v35 }
 0x16d   : > { %2956 = vmatmul.msk.bf16.gmra.mxu3 %vm715_vm1, %v3579_v20 }
 0x16e   : > { %1358 = vmatmul.bf16.gmra.mxu1 %v3599_v40 }
 0x16f   : > { %v1115_v12 = vpop.f32.mrf.mxu2 }
 0x170   : > { %v1204_v16 = vpop.f32.mrf.mxu3  ;;  %v1116_v10 = vadd.f32 %v1115_v12, %v915_v23  ;;  %v832_v28 = vpop.f32.mrf.mxu0 }
 0x171   : > { %v917_v53 = vadd.f32 %v916_v21, %v832_v28 }
 0x172   : > { %v3922_v14 = vadd.f32 %v1199_v59, %v1116_v10  ;;  %v4561_v10 = vld [vmem:[#allocation9_spill] sm:$0xff] }
 0x173   : > { %v921_v24 = vpop.f32.mrf.mxu1 }
 0x177   : > { %v1117_v36 = vpop.f32.mrf.mxu2 }
 0x178   : > { %v1206_v39 = vpop.f32.mrf.mxu3  ;;  %v1118_v44 = vadd.f32 %v1117_v36, %v917_v53  ;;  %v835_v58 = vpop.f32.mrf.mxu0  ;;  %v4562_v53 = vld [vmem:[#allocation4_spill] sm:$0xff]  ;;  %v4564_v36 = vld [vmem:[#allocation6_spill] sm:$0xff] }
 0x179   : > { %v920_v63 = vadd.f32 %v919_v61, %v835_v58  ;;  %v4565_v58 = vld [vmem:[#allocation8_spill] sm:$0xff] }
 0x17a   : > { %v3924_v2 = vadd.f32 %v1201_v27, %v1118_v44 }
 0x17b   : > { %v924_v20 = vpop.f32.mrf.mxu1  ;;  %1691 = vmatmul.bf16.gmra.mxu0 %v3646_v25 }
 0x17c   : > { %3043 = vmatmul.msk.bf16.gmra.mxu2 %vm715_vm1, %v3627_v1  ;;  %v4559_v1 = vld [vmem:[#allocation2_spill] sm:$0xff] }
 0x17d   : > { %2957 = vmatmul.msk.bf16.gmra.mxu3 %vm715_vm1, %v3603_v42 }
 0x17e   : > { %1363 = vmatmul.bf16.gmra.mxu1 %v3635_v6  ;;  %v4560_v6 = vld [vmem:[#allocation3_spill] sm:$0xff] }
 0x17f   : > { %v1120_v35 = vpop.f32.mrf.mxu2 }
 0x180   : > { %v1209_v40 = vpop.f32.mrf.mxu3  ;;  %v1121_v38 = vadd.f32 %v1120_v35, %v920_v63  ;;  %v837_v22 = vpop.f32.mrf.mxu0  ;;  %v3956_v35 = vld [vmem:[%s4512_s2] ss:$0 sm:$0xff] }
 0x181   : > { %v922_v19 = vadd.f32 %v921_v24, %v837_v22  ;;  %v4563_v24 = vld [vmem:[#allocation5_spill] sm:$0xff] }
 0x182   : > { %v3932_v48 = vadd.f32 %v1204_v16, %v1121_v38 }
 0x183   : > { %v926_v9 = vpop.f32.mrf.mxu1 }
 0x187   : > { %v1122_v50 = vpop.f32.mrf.mxu2 }
 0x188   : > { %v1211_v43 = vpop.f32.mrf.mxu3  ;;  %v1123_v56 = vadd.f32 %v1122_v50, %v922_v19  ;;  %v840_v25 = vpop.f32.mrf.mxu0 }
 0x189   : > { %v925_v59 = vadd.f32 %v924_v20, %v840_v25  ;;  %v4566_v25 = vld [vmem:[#allocation10_spill] sm:$0xff] }
 0x18a   : > { %v3934_v33 = vadd.f32 %v1206_v39, %v1123_v56 }
 0x18b   : > { %v1329_v42 = vpop.f32.mrf.mxu1  ;;  %1696 = vmatmul.bf16.gmra.mxu0 %v3673_v62 }
 0x18c   : > { %3044 = vmatmul.msk.bf16.gmra.mxu2 %vm715_vm1, %v4559_v1 }
 0x18d   : > { %2958 = vmatmul.msk.bf16.gmra.mxu3 %vm715_vm1, %v3639_v7 }
 0x18e   : > { %1368 = vmatmul.bf16.gmra.mxu1 %v4560_v6 }
 0x18f   : > { %v1125_v15 = vpop.f32.mrf.mxu2 }
 0x190   : > { %v1413_v5 = vpop.f32.mrf.mxu3  ;;  %v1126_v21 = vadd.f32 %v1125_v15, %v925_v59  ;;  %v842_v41 = vpop.f32.mrf.mxu0 }
 0x191   : > { %v927_v27 = vadd.f32 %v926_v9, %v842_v41  ;;  %v1414_v28 = vadd.f32 %v1413_v5, %v1329_v42  ;;  %v4567_v5 = vld [vmem:[#allocation15_spill] sm:$0xff] }
 0x192   : > { %v3942_v29 = vadd.f32 %v1209_v40, %v1126_v21 }
 0x193   : > { %v1331_v31 = vpop.f32.mrf.mxu1  ;;  %v1488_v63 = vadd.f32 %v1414_v28, %v4565_v58 }
 0x197   : > { %v1127_v23 = vpop.f32.mrf.mxu2 }
 0x198   : > { %v1415_v61 = vpop.f32.mrf.mxu3  ;;  %v1128_v12 = vadd.f32 %v1127_v23, %v927_v27  ;;  %v1662_v62 = vpop.f32.mrf.mxu0  ;;  %v4568_v27 = vld [vmem:[#allocation7_spill] sm:$0xff]  ;;  %v4570_v23 = vld [vmem:[#allocation12_spill] sm:$0xff] }
 0x199   : > { %v1416_v19 = vadd.f32 %v1415_v61, %v1331_v31  ;;  %v4569_v31 = vld [vmem:[#allocation11_spill] sm:$0xff] }
 0x19a   : > { %v3944_v16 = vadd.f32 %v1211_v43, %v1128_v12 }
 0x19b   : > { %v1334_v7 = vpop.f32.mrf.mxu1  ;;  %1701 = vmatmul.bf16.gmra.mxu0 %v4561_v10  ;;  %v1489_v59 = vadd.f32 %v1416_v19, %v4566_v25 }
 0x19c   : > { %3045 = vmatmul.msk.bf16.gmra.mxu2 %vm715_vm1, %v4563_v24 }
 0x19d   : > { %2959 = vmatmul.msk.bf16.gmra.mxu3 %vm715_vm1, %v4562_v53  ;;  %v4571_v53 = vld [vmem:[#allocation14_spill] sm:$0xff] }
 0x19e   : > { %1373 = vmatmul.bf16.gmra.mxu1 %v4564_v36 }
 0x19f   : > { %v1746_v44 = vpop.f32.mrf.mxu2 }
 0x1a0   : > { %v1418_v39 = vpop.f32.mrf.mxu3  ;;  %v1747_v20 = vadd.f32 %v1746_v44, %v1662_v62  ;;  %v1664_v40 = vpop.f32.mrf.mxu0 }
 0x1a1   : > { %v1419_v21 = vadd.f32 %v1418_v39, %v1334_v7 }
 0x1a2   : > { %v1821_v38 = vadd.f32 %v1747_v20, %v1488_v63 }
 0x1a3   : > { %v1336_v22 = vpop.f32.mrf.mxu1  ;;  %v1490_v24 = vadd.f32 %v1419_v21, %v4571_v53 }
 0x1a4   : > { %v3959_v9 = vadd.f32 %v3956_v35, %v1821_v38 }
 0x1a6   : > { %v3052_v50 = vmul.f32 -1.442695, %v3959_v9 }
 0x1a7   : > { %v1748_v56 = vpop.f32.mrf.mxu2 }
 0x1a8   : > { %v1420_v43 = vpop.f32.mrf.mxu3  ;;  %3173 = vpow2.f32 %v3052_v50  ;;  %v1749_v42 = vadd.f32 %v1748_v56, %v1664_v40  ;;  %v1667_v1 = vpop.f32.mrf.mxu0 }
 0x1a9   : > { %v1421_v20 = vadd.f32 %v1420_v43, %v1336_v22  ;;  %v4573_v43 = vld [vmem:[#allocation20_spill] sm:$0xff] }
 0x1aa   : > { %v1822_v6 = vadd.f32 %v1749_v42, %v1489_v59 }
 0x1ab   : > { %v1339_v15 = vpop.f32.mrf.mxu1  ;;  %1706 = vmatmul.bf16.gmra.mxu0 %v4567_v5 }
 0x1ac   : > { %v3965_v41 = vadd.f32 %v3956_v35, %v1822_v6  ;;  %3046 = vmatmul.msk.bf16.gmra.mxu2 %vm715_vm1, %v4569_v31 }
 0x1ad   : > { %2960 = vmatmul.msk.bf16.gmra.mxu3 %vm715_vm1, %v4568_v27 }
 0x1ae   : > { %1378 = vmatmul.bf16.gmra.mxu1 %v4570_v23  ;;  %v3174_v61 = vpop.eup %3173  ;;  %v3053_v12 = vmul.f32 -1.442695, %v3965_v41 }
 0x1af   : > { %v1975_v62 = vadd.f32 1.0, %v3174_v61  ;;  %v1751_v28 = vpop.f32.mrf.mxu2  ;;  %v4574_v61 = vld [vmem:[#allocation13_spill] sm:$0xff] }
 0x1b0   : > { %v1423_v10 = vpop.f32.mrf.mxu3  ;;  %3175 = vpow2.f32 %v3053_v12  ;;  %v1752_v7 = vadd.f32 %v1751_v28, %v1667_v1  ;;  %v1669_v36 = vpop.f32.mrf.mxu0  ;;  %v4572_v1 = vld [vmem:[#allocation16_spill] sm:$0xff]  ;;  %v4575_v12 = vld [vmem:[#allocation17_spill] sm:$0xff] }
 0x1b1   : > { %3177 = vrcp.f32 %v1975_v62  ;;  %v1491_v6 = vadd.f32 %v1421_v20, %v4572_v1  ;;  %v2016_v22 = vand.u32 2147483648, %v1975_v62  ;;  %v2014_v31 = vand.u32 2147483647, %v1975_v62 }
 0x1b2   : > { %v1823_v39 = vadd.f32 %v1752_v7, %v1490_v24  ;;  %vm2010_vm3 = vweird.f32 %v1975_v62 }
 0x1b3   : > { %v1341_v44 = vpop.f32.mrf.mxu1  ;;  %vm2015_vm5 = vcmp.eq.f32.partialorder %v2014_v31, 8.507059e+37 }
 0x1b4   : > { %v3975_v58 = vadd.f32 %v3956_v35, %v1823_v39  ;;  %v1424_v39 = vadd.f32 %v1423_v10, %v1339_v15  ;;  %v4576_v10 = vld [vmem:[#allocation19_spill] sm:$0xff] }
 0x1b6   : > { %v3176_v63 = vpop.eup %3175  ;;  %v3054_v40 = vmul.f32 -1.442695, %v3975_v58 }
 0x1b7   : > { %v3178_v38 = vpop.eup %3177  ;;  %v3978_v19 = vadd.f32 1.0, %v3176_v63  ;;  %v1753_v56 = vpop.f32.mrf.mxu2 }
 0x1b8   : > { %v1425_v50 = vpop.f32.mrf.mxu3  ;;  %v2006_v25 = vmul.f32 %v3178_v38, %v1975_v62  ;;  %3179 = vpow2.f32 %v3054_v40  ;;  %v1672_v59 = vpop.f32.mrf.mxu0  ;;  %v1754_v5 = vadd.f32 %v1753_v56, %v1669_v36  ;;  %vm2011_vm2 = vweird.f32 %v3178_v38 }
 0x1b9   : > { %3181 = vrcp.f32 %v3978_v19  ;;  %vm2012_vm4 = vmor %vm2010_vm3, %vm2011_vm2  ;;  %v2017_v36 = vor.u32 1.1754944e-38, %v2016_v22  ;;  %v2031_v15 = vand.u32 2147483648, %v3978_v19  ;;  %vm2025_vm8 = vweird.f32 %v3978_v19 }
 0x1ba   : > { %v2007_v42 = vsub.f32 1.0, %v2006_v25  ;;  %v1824_v23 = vadd.f32 %v1754_v5, %v1491_v6 }
 0x1bb   : > { %v3982_v21 = vpop.f32.mrf.mxu1  ;;  %1711 = vmatmul.bf16.gmra.mxu0 %v4573_v43 }
 0x1bc   : > { %v2008_v27 = vmul.f32 %v3178_v38, %v2007_v42  ;;  %3047 = vmatmul.msk.bf16.gmra.mxu2 %vm715_vm1, %v4575_v12  ;;  %v3991_v24 = vadd.f32 %v3956_v35, %v1824_v23 }
 0x1bd   : > { %2961 = vmatmul.msk.bf16.gmra.mxu3 %vm715_vm1, %v4574_v61  ;;  %v1426_v61 = vadd.f32 %v1425_v50, %v1341_v44 }
 0x1be   : > { %1383 = vmatmul.bf16.gmra.mxu1 %v3757_v3  ;;  %v3180_v28 = vpop.eup %3179  ;;  %v2009_v53 = vadd.f32 %v3178_v38, %v2008_v27  ;;  %v3055_v3 = vmul.f32 -1.442695, %v3991_v24 }
 0x1bf   : > { %v3182_v7 = vpop.eup %3181  ;;  %v3994_v63 = vadd.f32 1.0, %v3180_v28  ;;  %v1756_v40 = vpop.f32.mrf.mxu2  ;;  %v2032_v28 = vor.u32 1.1754944e-38, %v2031_v15 }
 0x1c0   : > { %v1428_v20 = vpop.f32.mrf.mxu3  ;;  %v2013_v56 = vsel %vm2012_vm4, %v3178_v38, %v2009_v53  ;;  %v2021_v25 = vmul.f32 %v3182_v7, %v3978_v19  ;;  %v1674_v42 = vpop.f32.mrf.mxu0  ;;  %v1492_v38 = vadd.f32 %v1424_v39, %v4576_v10  ;;  %v1757_v22 = vadd.f32 %v1756_v40, %v1672_v59 }
 0x1c1   : > { %v2018_v62 = vsel %vm2015_vm5, %v2017_v36, %v2013_v56  ;;  %3183 = vrcp.f32 %v3994_v63  ;;  %vm2026_vm7 = vweird.f32 %v3182_v7  ;;  %vm2040_vm12 = vweird.f32 %v3994_v63 }
 0x1c2   : > { %v2455_v1 = vmul.f32 %v2018_v62, %v3959_v9  ;;  %v2022_v6 = vsub.f32 1.0, %v2021_v25  ;;  %3185 = vpow2.f32 %v3055_v3  ;;  %v2029_v9 = vand.u32 2147483647, %v3978_v19  ;;  %vm2027_vm9 = vmor %vm2025_vm8, %vm2026_vm7 }
 0x1c3   : > { %v4000_v5 = vpop.f32.mrf.mxu1  ;;  %v1825_v31 = vadd.f32 %v1757_v22, %v1492_v38  ;;  %v2046_v38 = vand.u32 2147483648, %v3994_v63  ;;  %v4578_v22 = vld [vmem:[#allocation24_spill] sm:$0xff] }
 0x1c4   : > { %v2485_v43 = vpack.c.bf16 %v2455_v1, %v2455_v1  ;;  %v2023_v27 = vmul.f32 %v3182_v7, %v2022_v6  ;;  %vm2030_vm10 = vcmp.eq.f32.partialorder %v2029_v9, 8.507059e+37  ;;  %v4577_v6 = vld [vmem:[#allocation21_spill] sm:$0xff]  ;;  %v4580_v9 = vld [vmem:[#allocation22_spill] sm:$0xff] }
 0x1c5   : > { %v4014_v53 = vadd.f32 %v3956_v35, %v1825_v31  ;;  %v1493_v15 = vadd.f32 %v1426_v61, %v4577_v6  ;;  %v1429_v31 = vadd.f32 %v1428_v20, %v3982_v21 }
 0x1c6   : > { %2516 = vst.msk [vmem:[%s4005_s21] sm:$0xf] %vm2515_vm6, %v2485_v43  ;;  %v2024_v23 = vadd.f32 %v3182_v7, %v2023_v27 }
 0x1c7   : > { %v3184_v12 = vpop.eup %3183  ;;  %v1758_v59 = vpop.f32.mrf.mxu2  ;;  %v3056_v19 = vmul.f32 -1.442695, %v4014_v53 }
 0x1c8   : > { %v1430_v36 = vpop.f32.mrf.mxu3  ;;  %v3186_v39 = vpop.eup %3185  ;;  %v2028_v40 = vsel %vm2027_vm9, %v3182_v7, %v2024_v23  ;;  %v2036_v56 = vmul.f32 %v3184_v12, %v3994_v63  ;;  %v1759_v44 = vadd.f32 %v1758_v59, %v1674_v42  ;;  %vm2041_vm11 = vweird.f32 %v3184_v12 }
 0x1c9   : > { %v1677_v25 = vpop.f32.mrf.mxu0  ;;  %v2033_v3 = vsel %vm2030_vm10, %v2032_v28, %v2028_v40  ;;  %v4017_v62 = vadd.f32 1.0, %v3186_v39  ;;  %v2044_v7 = vand.u32 2147483647, %v3994_v63  ;;  %vm2042_vm13 = vmor %vm2040_vm12, %vm2041_vm11  ;;  %v2047_v28 = vor.u32 1.1754944e-38, %v2046_v38 }
 0x1ca   : > { %v2456_v50 = vmul.f32 %v2033_v3, %v3965_v41  ;;  %v2037_v1 = vsub.f32 1.0, %v2036_v56  ;;  %v1826_v42 = vadd.f32 %v1759_v44, %v1493_v15  ;;  %v4579_v41 = vld [vmem:[#allocation18_spill] sm:$0xff]  ;;  %v203_v15 = vld [vmem:[%s3369_s14 + $0xf8] sm:$0xff] }
 0x1cb   : > { %v4022_v10 = vpop.f32.mrf.mxu1  ;;  %3187 = vrcp.f32 %v4017_v62  ;;  %1716 = vmatmul.bf16.gmra.mxu0 %v4578_v22  ;;  %vm2045_vm14 = vcmp.eq.f32.partialorder %v2044_v7, 8.507059e+37  ;;  %v1431_v7 = vadd.f32 %v1430_v36, %v4000_v5  ;;  %vm2055_vm2 = vweird.f32 %v4017_v62 }
 0x1cc   : > { %v2486_v43 = vpack.c.bf16 %v2456_v50, %v2456_v50  ;;  %v2038_v27 = vmul.f32 %v3184_v12, %v2037_v1  ;;  %3189 = vpow2.f32 %v3056_v19  ;;  %3048 = vmatmul.msk.bf16.gmra.mxu2 %vm715_vm1, %v4580_v9  ;;  %v4038_v61 = vadd.f32 %v3956_v35, %v1826_v42  ;;  %v4581_v19 = vld [vmem:[#allocation23_spill] sm:$0xff]  ;;  %v4582_v9 = vld [vmem:[#allocation25_spill] sm:$0xff] }
 0x1cd   : > { %2962 = vmatmul.msk.bf16.gmra.mxu3 %vm715_vm1, %v4579_v41  ;;  %v1494_v63 = vadd.f32 %v1429_v31, %v4581_v19  ;;  %v2059_v42 = vand.u32 2147483647, %v4017_v62  ;;  %v1495_v31 = vadd.f32 %v1431_v7, %v4582_v9 }
 0x1ce   : > { %1388 = vmatmul.bf16.gmra.mxu1 %v3785_v55  ;;  %2517 = vst.msk [vmem:[%s4005_s21 + $0x4] sm:$0xf] %vm2515_vm6, %v2486_v43  ;;  %v2039_v23 = vadd.f32 %v3184_v12, %v2038_v27  ;;  %v3057_v21 = vmul.f32 -1.442695, %v4038_v61  ;;  %v2061_v43 = vand.u32 2147483648, %v4017_v62  ;;  %v1240_v27 = vunpack.c.l.b16 %v203_v15 }
 0x1cf   : > { %v1761_v39 = vpop.f32.mrf.mxu2  ;;  %vm2060_vm4 = vcmp.eq.f32.partialorder %v2059_v42, 8.507059e+37 }
 0x1d0   : > { %v1433_v59 = vpop.f32.mrf.mxu3  ;;  %v2043_v40 = vsel %vm2042_vm13, %v3184_v12, %v2039_v23  ;;  %v1762_v20 = vadd.f32 %v1761_v39, %v1677_v25  ;;  %3191 = vpow2.f32 %v3057_v21  ;;  %v1241_v23 = vunpack.c.h.b16 %v203_v15 }
 0x1d1   : > { %v1679_v55 = vpop.f32.mrf.mxu0  ;;  %v3188_v56 = vpop.eup %3187  ;;  %v2048_v3 = vsel %vm2045_vm14, %v2047_v28, %v2043_v40 }
 0x1d2   : > { %v3190_v44 = vpop.eup %3189  ;;  %v2457_v50 = vmul.f32 %v2048_v3, %v3975_v58  ;;  %v2051_v1 = vmul.f32 %v3188_v56, %v4017_v62  ;;  %v1827_v25 = vadd.f32 %v1762_v20, %v1494_v63  ;;  %vm2056_vm15 = vweird.f32 %v3188_v56  ;;  %v4583_v62 = vld [vmem:[#allocation27_spill] sm:$0xff] }
 0x1d3   : > { %v4045_v6 = vpop.f32.mrf.mxu1  ;;  %v4048_v12 = vadd.f32 1.0, %v3190_v44  ;;  %vm2057_vm3 = vmor %vm2055_vm2, %vm2056_vm15  ;;  %v2062_v3 = vor.u32 1.1754944e-38, %v2061_v43  ;;  %v4067_v63 = vpack.c.b16 %v1240_v27, %v3836_v8 }
 0x1d4   : > { %v2487_v38 = vpack.c.bf16 %v2457_v50, %v2457_v50  ;;  %v2052_v22 = vsub.f32 1.0, %v2051_v1  ;;  %v4057_v41 = vadd.f32 %v3956_v35, %v1827_v25 }
 0x1d5   : > { %3193 = vrcp.f32 %v4048_v12  ;;  %v2076_v27 = vand.u32 2147483648, %v4048_v12  ;;  %vm2070_vm7 = vweird.f32 %v4048_v12 }
 0x1d6   : > { %2518 = vst.msk [vmem:[%s4005_s21 + $0x8] sm:$0xf] %vm2515_vm6, %v2487_v38  ;;  %v2053_v58 = vmul.f32 %v3188_v56, %v2052_v22  ;;  %v3192_v28 = vpop.eup %3191  ;;  %v3058_v40 = vmul.f32 -1.442695, %v4057_v41 }
 0x1d7   : > { %v1763_v36 = vpop.f32.mrf.mxu2  ;;  %v4064_v19 = vadd.f32 1.0, %v3192_v28 }
 0x1d8   : > { %v4060_v5 = vpop.f32.mrf.mxu3  ;;  %v2054_v39 = vadd.f32 %v3188_v56, %v2053_v58  ;;  %v1764_v21 = vadd.f32 %v1763_v36, %v1679_v55  ;;  %3195 = vpow2.f32 %v3058_v40  ;;  %v4074_v55 = vpack.c.b16 %v1241_v23, %v4583_v62 }
 0x1d9   : > { %v1682_v20 = vpop.f32.mrf.mxu0  ;;  %3197 = vrcp.f32 %v4064_v19  ;;  %v2074_v36 = vand.u32 2147483647, %v4048_v12  ;;  %vm2085_vm11 = vweird.f32 %v4064_v19 }
 0x1da   : > { %v2058_v44 = vsel %vm2057_vm3, %v3188_v56, %v2054_v39  ;;  %v1828_v50 = vadd.f32 %v1764_v21, %v1495_v31  ;;  %v4584_v56 = vld [vmem:[#allocation26_spill] sm:$0xff]  ;;  %v1553_v9 = vshll.u32 %v4074_v55, 16 }
 0x1db   : > { %v4069_v1 = vpop.f32.mrf.mxu1  ;;  %v3194_v15 = vpop.eup %3193  ;;  %v2063_v7 = vsel %vm2060_vm4, %v2062_v3, %v2058_v44  ;;  %1721 = vmatmul.bf16.gmra.mxu0 %v3834_v4  ;;  %v1549_v4 = vshll.u32 %v4067_v63, 16  ;;  %v204_v39 = vld [vmem:[%s3369_s14 + $0x100] sm:$0xff]  ;;  %vm2075_vm9 = vcmp.eq.f32.partialorder %v2074_v36, 8.507059e+37 }
 0x1dc   : > { %v2458_v25 = vmul.f32 %v2063_v7, %v3991_v24  ;;  %v2066_v8 = vmul.f32 %v3194_v15, %v4048_v12  ;;  %3049 = vmatmul.msk.bf16.gmra.mxu2 %vm715_vm1, %v4584_v56  ;;  %v4083_v38 = vadd.f32 %v3956_v35, %v1828_v50  ;;  %v1434_v24 = vadd.f32 %v1433_v59, %v4022_v10 }
 0x1dd   : > { %2963 = vmatmul.msk.bf16.gmra.mxu3 %vm715_vm1, %v3789_v34  ;;  %vm2071_vm5 = vweird.f32 %v3194_v15  ;;  %v4099_v40 = vrot.slane %v1549_v4, 1  ;;  %v2077_v7 = vor.u32 1.1754944e-38, %v2076_v27  ;;  %v1544_v62 = vunpack.c.l.b16 %v204_v39 }
 0x1de   : > { %1393 = vmatmul.bf16.gmra.mxu1 %v3820_v0  ;;  %v2488_v22 = vpack.c.bf16 %v2458_v25, %v2458_v25  ;;  %v2067_v43 = vsub.f32 1.0, %v2066_v8  ;;  %v3059_v58 = vmul.f32 -1.442695, %v4083_v38  ;;  %v3196_v31 = vpop.eup %3195  ;;  %v1496_v44 = vadd.f32 %v1434_v24, %v3828_v45  ;;  %vm2072_vm8 = vmor %vm2070_vm7, %vm2071_vm5 }
 0x1df   : > { %v1766_v42 = vpop.f32.mrf.mxu2  ;;  %v3198_v10 = vpop.eup %3197  ;;  %v4097_v59 = vadd.f32 1.0, %v3196_v31  ;;  %v2089_v12 = vand.u32 2147483647, %v4064_v19  ;;  %v1552_v31 = vsel %vm379_vm0, %v3852_v13, %v4099_v40 }
 0x1e0   : > { %v4090_v34 = vpop.f32.mrf.mxu3  ;;  %2519 = vst.msk [vmem:[%s4005_s21 + $0xc] sm:$0xf] %vm2515_vm6, %v2488_v22  ;;  %v2068_v0 = vmul.f32 %v3194_v15, %v2067_v43  ;;  %v1767_v23 = vadd.f32 %v1766_v42, %v1682_v20  ;;  %3199 = vpow2.f32 %v3059_v58  ;;  %v2081_v3 = vmul.f32 %v3198_v10, %v4064_v19 }
 0x1e1   : > { %v1684_v28 = vpop.f32.mrf.mxu0  ;;  %3201 = vrcp.f32 %v4097_v59  ;;  %v4107_v20 = vrot.slane %v1553_v9, 1  ;;  %v2091_v22 = vand.u32 2147483648, %v4064_v19  ;;  %v1545_v43 = vunpack.c.h.b16 %v204_v39 }
 0x1e2   : > { %v2069_v21 = vadd.f32 %v3194_v15, %v2068_v0  ;;  %v2082_v8 = vsub.f32 1.0, %v2081_v3  ;;  %v1829_v56 = vadd.f32 %v1767_v23, %v1496_v44  ;;  %vm2086_vm10 = vweird.f32 %v3198_v10 }
 0x1e3   : > { %v4104_v50 = vpop.f32.mrf.mxu1  ;;  %vm2087_vm12 = vmor %vm2085_vm11, %vm2086_vm10  ;;  %v1556_v3 = vsel %vm379_vm0, %v3831_v60, %v4107_v20  ;;  %v1547_v44 = vpack.c.b16 %v1545_v43, %v1545_v43  ;;  %vm2090_vm13 = vcmp.eq.f32.partialorder %v2089_v12, 8.507059e+37  ;;  %v2106_v12 = vand.u32 2147483648, %v4097_v59 }
 0x1e4   : > { %v2073_v25 = vsel %vm2072_vm8, %v3194_v15, %v2069_v21  ;;  %v2083_v24 = vmul.f32 %v3198_v10, %v2082_v8  ;;  %v4113_v27 = vadd.f32 %v3956_v35, %v1829_v56  ;;  %v1436_v15 = vadd.f32 %v4060_v5, %v4045_v6  ;;  %v4585_v8 = vld [vmem:[#allocation28_spill] sm:$0xff] }
 0x1e5   : > { %v2078_v4 = vsel %vm2075_vm9, %v2077_v7, %v2073_v25  ;;  %v2092_v6 = vor.u32 1.1754944e-38, %v2091_v22  ;;  %vm2100_vm15 = vweird.f32 %v4097_v59 }
 0x1e6   : > { %v2459_v45 = vmul.f32 %v2078_v4, %v4014_v53  ;;  %v3200_v58 = vpop.eup %3199  ;;  %v1546_v53 = vpack.c.b16 %v1544_v62, %v1544_v62  ;;  %v2084_v36 = vadd.f32 %v3198_v10, %v2083_v24  ;;  %v3060_v39 = vmul.f32 -1.442695, %v4113_v27 }
 0x1e7   : > { %v1768_v9 = vpop.f32.mrf.mxu2  ;;  %v4123_v23 = vadd.f32 1.0, %v3200_v58  ;;  %v3202_v19 = vpop.eup %3201  ;;  %v1497_v56 = vadd.f32 %v1436_v15, %v4585_v8  ;;  %v1569_v24 = vshll.u32 %v1547_v44, 16 }
 0x1e8   : > { %v4118_v42 = vpop.f32.mrf.mxu3  ;;  %v2489_v0 = vpack.c.bf16 %v2459_v45, %v2459_v45  ;;  %v1769_v5 = vadd.f32 %v1768_v9, %v1684_v28  ;;  %v2088_v13 = vsel %vm2087_vm12, %v3198_v10, %v2084_v36  ;;  %v2096_v7 = vmul.f32 %v3202_v19, %v4097_v59 }
 0x1e9   : > { %v1687_v21 = vpop.f32.mrf.mxu0  ;;  %3203 = vrcp.f32 %v4123_v23  ;;  %v2093_v25 = vsel %vm2090_vm13, %v2092_v6, %v2088_v13  ;;  %v1557_v28 = vshrl.u32 %v4067_v63, 16  ;;  %v1561_v4 = vshll.u32 %v1546_v53, 16 }
 0x1ea   : > { %2520 = vst.msk [vmem:[%s4005_s21 + $0x10] sm:$0xf] %vm2515_vm6, %v2489_v0  ;;  %v2460_v60 = vmul.f32 %v2093_v25, %v4038_v61  ;;  %v2097_v22 = vsub.f32 1.0, %v2096_v7  ;;  %v1439_v10 = vadd.f32 %v4090_v34, %v4069_v1  ;;  %3205 = vpow2.f32 %v3060_v39 }
 0x1eb   : > { %v4134_v62 = vpop.f32.mrf.mxu1  ;;  %1726 = vmatmul.bf16.gmra.mxu0 %v1552_v31  ;;  %v1830_v43 = vadd.f32 %v1769_v5, %v1497_v56  ;;  %v1565_v45 = vshrl.u32 %v4074_v55, 16  ;;  %vm2101_vm14 = vweird.f32 %v3202_v19  ;;  %v2104_v1 = vand.u32 2147483647, %v4097_v59 }
 0x1ec   : > { %3050 = vmatmul.msk.bf16.gmra.mxu2 %vm715_vm1, %v1556_v3  ;;  %v2490_v61 = vpack.c.bf16 %v2460_v60, %v2460_v60  ;;  %v2098_v58 = vmul.f32 %v3202_v19, %v2097_v22  ;;  %v1559_v31 = vor.u32 %v1557_v28, %v4099_v40  ;;  %v1563_v53 = vrot.slane %v1561_v4, 1  ;;  %vm2102_vm2 = vmor %vm2100_vm15, %vm2101_vm14 }
 0x1ed   : > { %2964 = vmatmul.msk.bf16.gmra.mxu3 %vm715_vm1, %v4074_v55  ;;  %v4149_v34 = vadd.f32 %v3956_v35, %v1830_v43  ;;  %v1498_v55 = vadd.f32 %v1439_v10, %v3850_v57  ;;  %v2107_v6 = vor.u32 1.1754944e-38, %v2106_v12  ;;  %v1567_v44 = vor.u32 %v1565_v45, %v4107_v20 }
 0x1ee   : > { %1398 = vmatmul.bf16.gmra.mxu1 %v4067_v63  ;;  %2521 = vst.msk [vmem:[%s4005_s21 + $0x14] sm:$0xf] %vm2515_vm6, %v2490_v61  ;;  %v2099_v63 = vadd.f32 %v3202_v19, %v2098_v58  ;;  %vm2105_vm3 = vcmp.eq.f32.partialorder %v2104_v1, 8.507059e+37  ;;  %v1571_v8 = vrot.slane %v1569_v24, 1  ;;  %v2121_v28 = vand.u32 2147483648, %v4123_v23 }
 0x1ef   : > { %v1771_v9 = vpop.f32.mrf.mxu2  ;;  %v3204_v0 = vpop.eup %3203  ;;  %v3061_v3 = vmul.f32 -1.442695, %v4149_v34  ;;  %v1441_v20 = vadd.f32 %v4118_v42, %v4104_v50  ;;  %v2119_v60 = vand.u32 2147483647, %v4123_v23  ;;  %vm2115_vm5 = vweird.f32 %v4123_v23 }
 0x1f0   : > { %v1443_v15 = vpop.f32.mrf.mxu3  ;;  %v1772_v36 = vadd.f32 %v1771_v9, %v1687_v21  ;;  %v2111_v5 = vmul.f32 %v3204_v0, %v4123_v23  ;;  %v3206_v40 = vpop.eup %3205  ;;  %v2103_v13 = vsel %vm2102_vm2, %v3202_v19, %v2099_v63  ;;  %vm2116_vm4 = vweird.f32 %v3204_v0 }
 0x1f1   : > { %v1689_v39 = vpop.f32.mrf.mxu0  ;;  %v2108_v59 = vsel %vm2105_vm3, %v2107_v6, %v2103_v13  ;;  %v4161_v57 = vadd.f32 1.0, %v3206_v40  ;;  %3207 = vpow2.f32 %v3061_v3  ;;  %v1564_v45 = vsel %vm379_vm0, %v1559_v31, %v1563_v53  ;;  %vm2117_vm7 = vmor %vm2115_vm5, %vm2116_vm4 }
 0x1f2   : > { %v1831_v7 = vadd.f32 %v1772_v36, %v1498_v55  ;;  %v2112_v56 = vsub.f32 1.0, %v2111_v5  ;;  %v2461_v21 = vmul.f32 %v2108_v59, %v4057_v41  ;;  %v2122_v50 = vor.u32 1.1754944e-38, %v2121_v28 }
 0x1f3   : > { %v4159_v25 = vpop.f32.mrf.mxu1  ;;  %3209 = vrcp.f32 %v4161_v57  ;;  %v1499_v42 = vadd.f32 %v1441_v20, %v3856_v54  ;;  %vm2120_vm8 = vcmp.eq.f32.partialorder %v2119_v60, 8.507059e+37  ;;  %v1572_v9 = vsel %vm379_vm0, %v1567_v44, %v1571_v8 }
 0x1f4   : > { %v4168_v19 = vadd.f32 %v3956_v35, %v1831_v7  ;;  %v2113_v4 = vmul.f32 %v3204_v0, %v2112_v56  ;;  %v2491_v22 = vpack.c.bf16 %v2461_v21, %v2461_v21  ;;  %v1444_v54 = vadd.f32 %v1443_v15, %v4134_v62 }
 0x1f5   : > { %v2134_v44 = vand.u32 2147483647, %v4161_v57 }
 0x1f6   : > { %v3062_v10 = vmul.f32 -1.442695, %v4168_v19  ;;  %v2114_v12 = vadd.f32 %v3204_v0, %v2113_v4  ;;  %2522 = vst.msk [vmem:[%s4005_s21 + $0x18] sm:$0xf] %vm2515_vm6, %v2491_v22  ;;  %v1500_v62 = vadd.f32 %v1444_v54, %v3862_v47 }
 0x1f7   : > { %v1773_v43 = vpop.f32.mrf.mxu2  ;;  %v3208_v58 = vpop.eup %3207  ;;  %vm2135_vm10 = vcmp.eq.f32.partialorder %v2134_v44, 8.507059e+37 }
 0x1f8   : > { %v1445_v41 = vpop.f32.mrf.mxu3  ;;  %3211 = vpow2.f32 %v3062_v10  ;;  %v1774_v24 = vadd.f32 %v1773_v43, %v1689_v39  ;;  %v2118_v1 = vsel %vm2117_vm7, %v3204_v0, %v2114_v12  ;;  %v4179_v63 = vadd.f32 1.0, %v3208_v58 }
 0x1f9   : > { %v1692_v61 = vpop.f32.mrf.mxu0  ;;  %v2123_v23 = vsel %vm2120_vm8, %v2122_v50, %v2118_v1  ;;  %v3210_v53 = vpop.eup %3209 }
 0x1fa   : > { %v1832_v55 = vadd.f32 %v1774_v24, %v1499_v42  ;;  %v2462_v36 = vmul.f32 %v2123_v23, %v4083_v38  ;;  %v2126_v39 = vmul.f32 %v3210_v53, %v4161_v57  ;;  %3213 = vrcp.f32 %v4179_v63 }
 0x1fb   : > { %v4181_v31 = vpop.f32.mrf.mxu1  ;;  %1731 = vmatmul.bf16.gmra.mxu0 %v1564_v45  ;;  %v2136_v38 = vand.u32 2147483648, %v4161_v57  ;;  %vm2131_vm0 = vweird.f32 %v3210_v53  ;;  %v2151_v50 = vand.u32 2147483648, %v4179_v63  ;;  %v2149_v58 = vand.u32 2147483647, %v4179_v63 }
 0x1fc   : > { %3051 = vmatmul.msk.bf16.gmra.mxu2 %vm715_vm1, %v1572_v9  ;;  %v2492_v0 = vpack.c.bf16 %v2462_v36, %v2462_v36  ;;  %v4189_v6 = vadd.f32 %v3956_v35, %v1832_v55  ;;  %v2127_v3 = vsub.f32 1.0, %v2126_v39  ;;  %vm2130_vm1 = vweird.f32 %v4161_v57 }
 0x1fd   : > { %vm2132_vm9 = vmor %vm2130_vm1, %vm2131_vm0  ;;  %v2137_v47 = vor.u32 1.1754944e-38, %v2136_v38  ;;  %v1446_v57 = vadd.f32 %v1445_v41, %v4159_v25  ;;  %vm2145_vm12 = vweird.f32 %v4179_v63  ;;  %v2152_v54 = vor.u32 1.1754944e-38, %v2151_v50 }
 0x1fe   : > { %v3212_v5 = vpop.eup %3211  ;;  %2523 = vst.msk [vmem:[%s4005_s21 + $0x1c] sm:$0xf] %vm2515_vm6, %v2492_v0  ;;  %v2128_v7 = vmul.f32 %v3210_v53, %v2127_v3  ;;  %v3063_v8 = vmul.f32 -1.442695, %v4189_v6  ;;  %vm2150_vm14 = vcmp.eq.f32.partialorder %v2149_v58, 8.507059e+37 }
 0x1ff   : > { %v4196_v15 = vadd.f32 1.0, %v3212_v5  ;;  %v1776_v13 = vpop.f32.mrf.mxu2  ;;  %v1501_v0 = vadd.f32 %v1446_v57, %v3864_v32 }
 0x200   : > { %v1448_v40 = vpop.f32.mrf.mxu3  ;;  %v1777_v59 = vadd.f32 %v1776_v13, %v1692_v61  ;;  %v3214_v21 = vpop.eup %3213  ;;  %v2129_v28 = vadd.f32 %v3210_v53, %v2128_v7 }
 0x201   : > { %v1694_v56 = vpop.f32.mrf.mxu0  ;;  %3215 = vrcp.f32 %v4196_v15  ;;  %v2141_v60 = vmul.f32 %v3214_v21, %v4179_v63  ;;  %vm2146_vm11 = vweird.f32 %v3214_v21  ;;  %v2166_v44 = vand.u32 2147483648, %v4196_v15 }
 0x202   : > { %3217 = vpow2.f32 %v3063_v8  ;;  %v1833_v20 = vadd.f32 %v1777_v59, %v1500_v62  ;;  %v2133_v22 = vsel %vm2132_vm9, %v3210_v53, %v2129_v28  ;;  %vm2147_vm13 = vmor %vm2145_vm12, %vm2146_vm11  ;;  %v2164_v62 = vand.u32 2147483647, %v4196_v15 }
 0x203   : > { %v4201_v4 = vpop.f32.mrf.mxu1  ;;  %v2138_v12 = vsel %vm2135_vm10, %v2137_v47, %v2133_v22  ;;  %v2142_v43 = vsub.f32 1.0, %v2141_v60  ;;  %v1449_v7 = vadd.f32 %v1448_v40, %v4181_v31  ;;  %vm2160_vm2 = vweird.f32 %v4196_v15 }
 0x204   : > { %v4205_v10 = vadd.f32 %v3956_v35, %v1833_v20  ;;  %v2463_v45 = vmul.f32 %v2138_v12, %v4113_v27  ;;  %vm2165_vm4 = vcmp.eq.f32.partialorder %v2164_v62, 8.507059e+37 }
 0x205   : > { %v2143_v61 = vmul.f32 %v3214_v21, %v2142_v43 }
 0x206   : > { %v3064_v42 = vmul.f32 -1.442695, %v4205_v10  ;;  %v2493_v55 = vpack.c.bf16 %v2463_v45, %v2463_v45 }
 0x207   : > { %v3216_v24 = vpop.eup %3215  ;;  %v1778_v9 = vpop.f32.mrf.mxu2  ;;  %v2144_v36 = vadd.f32 %v3214_v21, %v2143_v61 }
 0x208   : > { %v1450_v1 = vpop.f32.mrf.mxu3  ;;  %v3218_v23 = vpop.eup %3217  ;;  %v2156_v53 = vmul.f32 %v3216_v24, %v4196_v15  ;;  %3219 = vpow2.f32 %v3064_v42  ;;  %v1779_v41 = vadd.f32 %v1778_v9, %v1694_v56  ;;  %2524 = vst.msk [vmem:[%s4005_s21 + $0x20] sm:$0xf] %vm2515_vm6, %v2493_v55  ;;  %vm2161_vm15 = vweird.f32 %v3216_v24 }
 0x209   : > { %v1697_v27 = vpop.f32.mrf.mxu0  ;;  %v4214_v25 = vadd.f32 1.0, %v3218_v23  ;;  %v2148_v3 = vsel %vm2147_vm13, %v3214_v21, %v2144_v36  ;;  %vm2162_vm3 = vmor %vm2160_vm2, %vm2161_vm15  ;;  %v2167_v21 = vor.u32 1.1754944e-38, %v2166_v44  ;;  %v1502_v15 = vadd.f32 %v1449_v7, %v3872_v26 }
 0x20a   : > { %v2157_v39 = vsub.f32 1.0, %v2156_v53  ;;  %v2153_v38 = vsel %vm2150_vm14, %v2152_v54, %v2148_v3  ;;  %v1834_v8 = vadd.f32 %v1779_v41, %v1501_v0  ;;  %v1451_v9 = vadd.f32 %v1450_v1, %v4201_v4 }
 0x20b   : > { %v4219_v5 = vpop.f32.mrf.mxu1  ;;  %3221 = vrcp.f32 %v4214_v25  ;;  %v2464_v13 = vmul.f32 %v2153_v38, %v4149_v34  ;;  %v2181_v58 = vand.u32 2147483648, %v4214_v25  ;;  %v2179_v23 = vand.u32 2147483647, %v4214_v25 }
 0x20c   : > { %v2158_v63 = vmul.f32 %v3216_v24, %v2157_v39  ;;  %v4230_v20 = vadd.f32 %v3956_v35, %v1834_v8  ;;  %vm2175_vm7 = vweird.f32 %v4214_v25  ;;  %v1503_v39 = vadd.f32 %v1451_v9, %v3874_v37 }
 0x20d   : > { %v2494_v56 = vpack.c.bf16 %v2464_v13, %v2464_v13  ;;  %v2182_v54 = vor.u32 1.1754944e-38, %v2181_v58  ;;  %vm2180_vm0 = vcmp.eq.f32.partialorder %v2179_v23, 8.507059e+37 }
 0x20e   : > { %v3220_v32 = vpop.eup %3219  ;;  %v2159_v59 = vadd.f32 %v3216_v24, %v2158_v63  ;;  %v3065_v57 = vmul.f32 -1.442695, %v4230_v20 }
 0x20f   : > { %v4227_v28 = vadd.f32 1.0, %v3220_v32  ;;  %v1781_v60 = vpop.f32.mrf.mxu2  ;;  %2525 = vst.msk [vmem:[%s4005_s21 + $0x24] sm:$0xf] %vm2515_vm6, %v2494_v56 }
 0x210   : > { %v1453_v47 = vpop.f32.mrf.mxu3  ;;  %v2163_v22 = vsel %vm2162_vm3, %v3216_v24, %v2159_v59  ;;  %v1782_v34 = vadd.f32 %v1781_v60, %v1697_v27 }
 0x211   : > { %v1699_v31 = vpop.f32.mrf.mxu0  ;;  %v3222_v40 = vpop.eup %3221  ;;  %v2168_v12 = vsel %vm2165_vm4, %v2167_v21, %v2163_v22  ;;  %3223 = vrcp.f32 %v4227_v28  ;;  %v2194_v13 = vand.u32 2147483647, %v4227_v28  ;;  %v1454_v59 = vadd.f32 %v1453_v47, %v4219_v5 }
 0x212   : > { %v2465_v43 = vmul.f32 %v2168_v12, %v4168_v19  ;;  %v2171_v45 = vmul.f32 %v3222_v40, %v4214_v25  ;;  %v1835_v42 = vadd.f32 %v1782_v34, %v1502_v15  ;;  %3225 = vpow2.f32 %v3065_v57 }
 0x213   : > { %v4238_v50 = vpop.f32.mrf.mxu1  ;;  %vm2176_vm5 = vweird.f32 %v3222_v40  ;;  %v2196_v25 = vand.u32 2147483648, %v4227_v28  ;;  %vm2190_vm9 = vweird.f32 %v4227_v28  ;;  %vm2195_vm11 = vcmp.eq.f32.partialorder %v2194_v13, 8.507059e+37 }
 0x214   : > { %v2495_v24 = vpack.c.bf16 %v2465_v43, %v2465_v43  ;;  %v2172_v61 = vsub.f32 1.0, %v2171_v45  ;;  %v4244_v26 = vadd.f32 %v3956_v35, %v1835_v42  ;;  %vm2177_vm8 = vmor %vm2175_vm7, %vm2176_vm5 }
 0x215   : > { %v2197_v34 = vor.u32 1.1754944e-38, %v2196_v25 }
 0x216   : > { %2526 = vst.msk [vmem:[%s4005_s21 + $0x28] sm:$0xf] %vm2515_vm6, %v2495_v24  ;;  %v2173_v19 = vmul.f32 %v3222_v40, %v2172_v61  ;;  %v3066_v53 = vmul.f32 -1.442695, %v4244_v26 }
 0x217   : > { %v3224_v55 = vpop.eup %3223  ;;  %v1783_v36 = vpop.f32.mrf.mxu2 }
 0x218   : > { %v1455_v27 = vpop.f32.mrf.mxu3  ;;  %v2174_v41 = vadd.f32 %v3222_v40, %v2173_v19  ;;  %v2186_v4 = vmul.f32 %v3224_v55, %v4227_v28  ;;  %3227 = vpow2.f32 %v3066_v53  ;;  %v1784_v0 = vadd.f32 %v1783_v36, %v1699_v31  ;;  %v3226_v63 = vpop.eup %3225 }
 0x219   : > { %v1702_v1 = vpop.f32.mrf.mxu0  ;;  %vm2191_vm1 = vweird.f32 %v3224_v55  ;;  %v1988_v37 = vadd.f32 1.0, %v3226_v63  ;;  %v1504_v28 = vadd.f32 %v1454_v59, %v3882_v30  ;;  %v1456_v42 = vadd.f32 %v1455_v27, %v4238_v50 }
 0x21a   : > { %v2178_v3 = vsel %vm2177_vm8, %v3222_v40, %v2174_v41  ;;  %v2187_v44 = vsub.f32 1.0, %v2186_v4  ;;  %v1836_v7 = vadd.f32 %v1784_v0, %v1503_v39  ;;  %vm2192_vm10 = vmor %vm2190_vm9, %vm2191_vm1 }
 0x21b   : > { %v4253_v38 = vpop.f32.mrf.mxu1  ;;  %v2183_v62 = vsel %vm2180_vm0, %v2182_v54, %v2178_v3  ;;  %3229 = vrcp.f32 %v1988_v37  ;;  %v2209_v4 = vand.u32 2147483647, %v1988_v37  ;;  %v2211_v50 = vand.u32 2147483648, %v1988_v37 }
 0x21c   : > { %v2466_v8 = vmul.f32 %v2183_v62, %v4189_v6  ;;  %v2188_v32 = vmul.f32 %v3224_v55, %v2187_v44  ;;  %v4260_v56 = vadd.f32 %v3956_v35, %v1836_v7  ;;  %vm2205_vm13 = vweird.f32 %v1988_v37 }
 0x21d   : > { %vm2210_vm15 = vcmp.eq.f32.partialorder %v2209_v4, 8.507059e+37  ;;  %v2212_v63 = vor.u32 1.1754944e-38, %v2211_v50 }
 0x21e   : > { %v2496_v21 = vpack.c.bf16 %v2466_v8, %v2466_v8  ;;  %v2189_v60 = vadd.f32 %v3224_v55, %v2188_v32  ;;  %v3228_v22 = vpop.eup %3227  ;;  %v3067_v31 = vmul.f32 -1.442695, %v4260_v56  ;;  %v4292_v8 = vld [vmem:[%s4512_s2] ss:$0 sm:$0xff] }
 0x21f   : > { %v1786_v40 = vpop.f32.mrf.mxu2  ;;  %v4266_v5 = vadd.f32 1.0, %v3228_v22 }
 0x220   : > { %v1458_v6 = vpop.f32.mrf.mxu3  ;;  %2527 = vst.msk [vmem:[%s4005_s21 + $0x2c] sm:$0xf] %vm2515_vm6, %v2496_v21  ;;  %v2193_v12 = vsel %vm2192_vm10, %v3224_v55, %v2189_v60  ;;  %v1787_v47 = vadd.f32 %v1786_v40, %v1702_v1  ;;  %3231 = vpow2.f32 %v3067_v31  ;;  %v1505_v55 = vadd.f32 %v1456_v42, %v3884_v17 }
 0x221   : > { %v1704_v15 = vpop.f32.mrf.mxu0  ;;  %v2198_v43 = vsel %vm2195_vm11, %v2197_v34, %v2193_v12  ;;  %3233 = vrcp.f32 %v4266_v5  ;;  %v3230_v61 = vpop.eup %3229  ;;  %v2224_v62 = vand.u32 2147483647, %v4266_v5  ;;  %v2226_v13 = vand.u32 2147483648, %v4266_v5 }
 0x222   : > { %v2467_v45 = vmul.f32 %v2198_v43, %v4205_v10  ;;  %v1837_v24 = vadd.f32 %v1787_v47, %v1504_v28  ;;  %v2201_v9 = vmul.f32 %v3230_v61, %v1988_v37  ;;  %vm2206_vm12 = vweird.f32 %v3230_v61 }
 0x223   : > { %v4271_v57 = vpop.f32.mrf.mxu1  ;;  %vm2207_vm14 = vmor %vm2205_vm13, %vm2206_vm12  ;;  %v1459_v59 = vadd.f32 %v1458_v6, %v4253_v38  ;;  %vm2220_vm3 = vweird.f32 %v4266_v5  ;;  %v2227_v47 = vor.u32 1.1754944e-38, %v2226_v13  ;;  %vm2225_vm5 = vcmp.eq.f32.partialorder %v2224_v62, 8.507059e+37 }
 0x224   : > { %v2497_v58 = vpack.c.bf16 %v2467_v45, %v2467_v45  ;;  %v4275_v19 = vadd.f32 %v3956_v35, %v1837_v24  ;;  %v2202_v30 = vsub.f32 1.0, %v2201_v9 }
 0x226   : > { %2528 = vst.msk [vmem:[%s4005_s21 + $0x30] sm:$0xf] %vm2515_vm6, %v2497_v58  ;;  %v3232_v23 = vpop.eup %3231  ;;  %v3068_v10 = vmul.f32 -1.442695, %v4275_v19  ;;  %v2203_v39 = vmul.f32 %v3230_v61, %v2202_v30 }
 0x227   : > { %v1788_v36 = vpop.f32.mrf.mxu2  ;;  %v3234_v41 = vpop.eup %3233  ;;  %v4281_v27 = vadd.f32 1.0, %v3232_v23 }
 0x228   : > { %v1460_v53 = vpop.f32.mrf.mxu3  ;;  %v1789_v1 = vadd.f32 %v1788_v36, %v1704_v15  ;;  %v2216_v35 = vmul.f32 %v3234_v41, %v4266_v5  ;;  %3235 = vpow2.f32 %v3068_v10  ;;  %v2204_v17 = vadd.f32 %v3230_v61, %v2203_v39 }
 0x229   : > { %v1707_v54 = vpop.f32.mrf.mxu0  ;;  %3237 = vrcp.f32 %v4281_v27  ;;  %vm2221_vm2 = vweird.f32 %v3234_v41  ;;  %v1506_v5 = vadd.f32 %v1459_v59, %v3892_v11  ;;  %v2241_v58 = vand.u32 2147483648, %v4281_v27 }
 0x22a   : > { %v2217_v3 = vsub.f32 1.0, %v2216_v35  ;;  %v1838_v44 = vadd.f32 %v1789_v1, %v1505_v55  ;;  %v2208_v25 = vsel %vm2207_vm14, %v3230_v61, %v2204_v17  ;;  %vm2222_vm4 = vmor %vm2220_vm3, %vm2221_vm2  ;;  %v1461_v9 = vadd.f32 %v1460_v53, %v4271_v57 }
 0x22b   : > { %v4285_v0 = vpop.f32.mrf.mxu1  ;;  %v2213_v37 = vsel %vm2210_vm15, %v2212_v63, %v2208_v25  ;;  %v2239_v11 = vand.u32 2147483647, %v4281_v27  ;;  %vm2235_vm8 = vweird.f32 %v4281_v27  ;;  %v2242_v50 = vor.u32 1.1754944e-38, %v2241_v58 }
 0x22c   : > { %v2218_v7 = vmul.f32 %v3234_v41, %v2217_v3  ;;  %v4295_v32 = vadd.f32 %v4292_v8, %v1838_v44  ;;  %v2468_v60 = vmul.f32 %v2213_v37, %v4230_v20  ;;  %v1507_v17 = vadd.f32 %v1461_v9, %v3894_v52 }
 0x22d   : > { %vm2240_vm1 = vcmp.eq.f32.partialorder %v2239_v11, 8.507059e+37 }
 0x22e   : > { %v3236_v21 = vpop.eup %3235  ;;  %v2219_v22 = vadd.f32 %v3234_v41, %v2218_v7  ;;  %v3069_v34 = vmul.f32 -1.442695, %v4295_v32  ;;  %v2498_v45 = vpack.c.bf16 %v2468_v60, %v2468_v60 }
 0x22f   : > { %v1791_v40 = vpop.f32.mrf.mxu2  ;;  %v3238_v12 = vpop.eup %3237  ;;  %v4301_v15 = vadd.f32 1.0, %v3236_v21 }
 0x230   : > { %v1463_v31 = vpop.f32.mrf.mxu3  ;;  %v1792_v43 = vadd.f32 %v1791_v40, %v1707_v54  ;;  %v2223_v38 = vsel %vm2222_vm4, %v3234_v41, %v2219_v22  ;;  %v2231_v20 = vmul.f32 %v3238_v12, %v4281_v27  ;;  %2529 = vst.msk [vmem:[%s4005_s21 + $0x34] sm:$0xf] %vm2515_vm6, %v2498_v45  ;;  %vm2236_vm7 = vweird.f32 %v3238_v12 }
 0x231   : > { %v1709_v28 = vpop.f32.mrf.mxu0  ;;  %v2228_v6 = vsel %vm2225_vm5, %v2227_v47, %v2223_v38  ;;  %3239 = vrcp.f32 %v4301_v15  ;;  %vm2237_vm0 = vmor %vm2235_vm8, %vm2236_vm7  ;;  %v2254_v25 = vand.u32 2147483647, %v4301_v15  ;;  %v2256_v7 = vand.u32 2147483648, %v4301_v15 }
 0x232   : > { %v2469_v24 = vmul.f32 %v2228_v6, %v4244_v26  ;;  %v2232_v61 = vsub.f32 1.0, %v2231_v20  ;;  %3241 = vpow2.f32 %v3069_v34  ;;  %v1839_v23 = vadd.f32 %v1792_v43, %v1506_v5 }
 0x233   : > { %v4306_v42 = vpop.f32.mrf.mxu1  ;;  %v1464_v37 = vadd.f32 %v1463_v31, %v4285_v0  ;;  %vm2250_vm10 = vweird.f32 %v4301_v15  ;;  %vm2255_vm12 = vcmp.eq.f32.partialorder %v2254_v25, 8.507059e+37 }
 0x234   : > { %v2499_v30 = vpack.c.bf16 %v2469_v24, %v2469_v24  ;;  %v2233_v55 = vmul.f32 %v3238_v12, %v2232_v61  ;;  %v4315_v10 = vadd.f32 %v4292_v8, %v1839_v23 }
 0x235   : > { %v1508_v0 = vadd.f32 %v1464_v37, %v3902_v49 }
 0x236   : > { %2530 = vst.msk [vmem:[%s4005_s21 + $0x38] sm:$0xf] %vm2515_vm6, %v2499_v30  ;;  %v2234_v36 = vadd.f32 %v3238_v12, %v2233_v55  ;;  %v3070_v57 = vmul.f32 -1.442695, %v4315_v10 }
 0x237   : > { %v1793_v41 = vpop.f32.mrf.mxu2  ;;  %v3240_v4 = vpop.eup %3239 }
 0x238   : > { %v1465_v26 = vpop.f32.mrf.mxu3  ;;  %v1794_v53 = vadd.f32 %v1793_v41, %v1709_v28  ;;  %v3242_v54 = vpop.eup %3241  ;;  %v2238_v39 = vsel %vm2237_vm0, %v3238_v12, %v2234_v36  ;;  %v2246_v35 = vmul.f32 %v3240_v4, %v4301_v15  ;;  %3243 = vpow2.f32 %v3070_v57 }
 0x239   : > { %v1712_v1 = vpop.f32.mrf.mxu0  ;;  %v2243_v3 = vsel %vm2240_vm1, %v2242_v50, %v2238_v39  ;;  %v4323_v44 = vadd.f32 1.0, %v3242_v54  ;;  %vm2251_vm9 = vweird.f32 %v3240_v4  ;;  %v2257_v12 = vor.u32 1.1754944e-38, %v2256_v7 }
 0x23a   : > { %v2470_v63 = vmul.f32 %v2243_v3, %v4260_v56  ;;  %v2247_v62 = vsub.f32 1.0, %v2246_v35  ;;  %v1840_v13 = vadd.f32 %v1794_v53, %v1507_v17  ;;  %vm2252_vm11 = vmor %vm2250_vm10, %vm2251_vm9  ;;  %v1466_v9 = vadd.f32 %v1465_v26, %v4306_v42 }
 0x23b   : > { %v4325_v27 = vpop.f32.mrf.mxu1  ;;  %3245 = vrcp.f32 %v4323_v44  ;;  %v2271_v58 = vand.u32 2147483648, %v4323_v44  ;;  %v2269_v55 = vand.u32 2147483647, %v4323_v44  ;;  %vm2265_vm14 = vweird.f32 %v4323_v44 }
 0x23c   : > { %v2500_v52 = vpack.c.bf16 %v2470_v63, %v2470_v63  ;;  %v2248_v59 = vmul.f32 %v3240_v4, %v2247_v62  ;;  %v4333_v21 = vadd.f32 %v4292_v8, %v1840_v13 }
 0x23d   : > { %v2272_v42 = vor.u32 1.1754944e-38, %v2271_v58  ;;  %vm2270_vm2 = vcmp.eq.f32.partialorder %v2269_v55, 8.507059e+37 }
 0x23e   : > { %2531 = vst.msk [vmem:[%s4005_s21 + $0x3c] sm:$0xf] %vm2515_vm6, %v2500_v52  ;;  %v2249_v60 = vadd.f32 %v3240_v4, %v2248_v59  ;;  %v3071_v56 = vmul.f32 -1.442695, %v4333_v21  ;;  %v3244_v40 = vpop.eup %3243 }
 0x23f   : > { %v1796_v34 = vpop.f32.mrf.mxu2  ;;  %v4340_v28 = vadd.f32 1.0, %v3244_v40 }
 0x240   : > { %v1468_v22 = vpop.f32.mrf.mxu3  ;;  %v1797_v31 = vadd.f32 %v1796_v34, %v1712_v1  ;;  %v2253_v43 = vsel %vm2252_vm11, %v3240_v4, %v2249_v60  ;;  %3247 = vpow2.f32 %v3071_v56  ;;  %v1509_v1 = vadd.f32 %v1466_v9, %v3904_v46 }
 0x241   : > { %v1714_v47 = vpop.f32.mrf.mxu0  ;;  %v3246_v45 = vpop.eup %3245  ;;  %v2258_v38 = vsel %vm2255_vm12, %v2257_v12, %v2253_v43  ;;  %3249 = vrcp.f32 %v4340_v28  ;;  %v2286_v63 = vand.u32 2147483648, %v4340_v28  ;;  %v1469_v62 = vadd.f32 %v1468_v22, %v4325_v27 }
 0x242   : > { %v1841_v15 = vadd.f32 %v1797_v31, %v1508_v0  ;;  %v2471_v20 = vmul.f32 %v2258_v38, %v4275_v19  ;;  %v2261_v6 = vmul.f32 %v3246_v45, %v4323_v44  ;;  %vm2266_vm13 = vweird.f32 %v3246_v45 }
 0x243   : > { %v4348_v49 = vpop.f32.mrf.mxu1  ;;  %vm2267_vm15 = vmor %vm2265_vm14, %vm2266_vm13  ;;  %v2284_v25 = vand.u32 2147483647, %v4340_v28  ;;  %vm2280_vm4 = vweird.f32 %v4340_v28  ;;  %v2287_v40 = vor.u32 1.1754944e-38, %v2286_v63  ;;  %v1510_v0 = vadd.f32 %v1469_v62, %v3912_v18 }
 0x244   : > { %v4346_v5 = vadd.f32 %v4292_v8, %v1841_v15  ;;  %v2501_v24 = vpack.c.bf16 %v2471_v20, %v2471_v20  ;;  %v2262_v61 = vsub.f32 1.0, %v2261_v6 }
 0x245   : > { %vm2285_vm7 = vcmp.eq.f32.partialorder %v2284_v25, 8.507059e+37 }
 0x246   : > { %v3072_v23 = vmul.f32 -1.442695, %v4346_v5  ;;  %v3248_v30 = vpop.eup %3247  ;;  %2532 = vst.msk [vmem:[%s4005_s21 + $0x40] sm:$0xf] %vm2515_vm6, %v2501_v24  ;;  %v2263_v19 = vmul.f32 %v3246_v45, %v2262_v61 }
 0x247   : > { %v1798_v36 = vpop.f32.mrf.mxu2  ;;  %v4356_v41 = vadd.f32 1.0, %v3248_v30  ;;  %v3250_v57 = vpop.eup %3249 }
 0x248   : > { %v1470_v11 = vpop.f32.mrf.mxu3  ;;  %3251 = vpow2.f32 %v3072_v23  ;;  %v1799_v4 = vadd.f32 %v1798_v36, %v1714_v47  ;;  %v2264_v53 = vadd.f32 %v3246_v45, %v2263_v19  ;;  %v2276_v26 = vmul.f32 %v3250_v57, %v4340_v28 }
 0x249   : > { %v1717_v50 = vpop.f32.mrf.mxu0  ;;  %3253 = vrcp.f32 %v4356_v41  ;;  %vm2281_vm3 = vweird.f32 %v3250_v57  ;;  %v2301_v38 = vand.u32 2147483648, %v4356_v41  ;;  %v1471_v15 = vadd.f32 %v1470_v11, %v4348_v49 }
 0x24a   : > { %v2268_v54 = vsel %vm2267_vm15, %v3246_v45, %v2264_v53  ;;  %v2277_v35 = vsub.f32 1.0, %v2276_v26  ;;  %v1842_v17 = vadd.f32 %v1799_v4, %v1509_v1  ;;  %vm2282_vm5 = vmor %vm2280_vm4, %vm2281_vm3  ;;  %v2299_v6 = vand.u32 2147483647, %v4356_v41 }
 0x24b   : > { %v2273_v39 = vsel %vm2270_vm2, %v2272_v42, %v2268_v54  ;;  %v4369_v7 = vpop.f32.mrf.mxu1  ;;  %vm2295_vm0 = vweird.f32 %v4356_v41  ;;  %v2302_v49 = vor.u32 1.1754944e-38, %v2301_v38  ;;  %v1511_v19 = vadd.f32 %v1471_v15, %v3914_v51 }
 0x24c   : > { %v2472_v3 = vmul.f32 %v2273_v39, %v4295_v32  ;;  %v2278_v13 = vmul.f32 %v3250_v57, %v2277_v35  ;;  %v4367_v46 = vadd.f32 %v4292_v8, %v1842_v17  ;;  %vm2300_vm9 = vcmp.eq.f32.partialorder %v2299_v6, 8.507059e+37 }
 0x24e   : > { %v3252_v44 = vpop.eup %3251  ;;  %v2502_v37 = vpack.c.bf16 %v2472_v3, %v2472_v3  ;;  %v2279_v56 = vadd.f32 %v3250_v57, %v2278_v13  ;;  %v3073_v27 = vmul.f32 -1.442695, %v4367_v46 }
 0x24f   : > { %v4371_v52 = vadd.f32 1.0, %v3252_v44  ;;  %v1801_v32 = vpop.f32.mrf.mxu2  ;;  %v3254_v60 = vpop.eup %3253 }
 0x250   : > { %v1473_v59 = vpop.f32.mrf.mxu3  ;;  %v1802_v22 = vadd.f32 %v1801_v32, %v1717_v50  ;;  %2533 = vst.msk [vmem:[%s4005_s21 + $0x44] sm:$0xf] %vm2515_vm6, %v2502_v37  ;;  %v2291_v12 = vmul.f32 %v3254_v60, %v4356_v41  ;;  %v2283_v31 = vsel %vm2282_vm5, %v3250_v57, %v2279_v56  ;;  %vm2296_vm8 = vweird.f32 %v3254_v60 }
 0x251   : > { %v1719_v34 = vpop.f32.mrf.mxu0  ;;  %3255 = vrcp.f32 %v4371_v52  ;;  %v2288_v47 = vsel %vm2285_vm7, %v2287_v40, %v2283_v31  ;;  %vm2297_vm1 = vmor %vm2295_vm0, %vm2296_vm8  ;;  %v2316_v1 = vand.u32 2147483648, %v4371_v52  ;;  %v2314_v54 = vand.u32 2147483647, %v4371_v52 }
 0x252   : > { %3257 = vpow2.f32 %v3073_v27  ;;  %v2292_v43 = vsub.f32 1.0, %v2291_v12  ;;  %v1843_v28 = vadd.f32 %v1802_v22, %v1510_v0  ;;  %v2473_v45 = vmul.f32 %v2288_v47, %v4315_v10 }
 0x253   : > { %v1391_v55 = vpop.f32.mrf.mxu1  ;;  %vm2310_vm11 = vweird.f32 %v4371_v52  ;;  %v1474_v3 = vadd.f32 %v1473_v59, %v4369_v7  ;;  %v2317_v62 = vor.u32 1.1754944e-38, %v2316_v1  ;;  %vm2315_vm13 = vcmp.eq.f32.partialorder %v2314_v54, 8.507059e+37 }
 0x254   : > { %v2293_v20 = vmul.f32 %v3254_v60, %v2292_v43  ;;  %v4386_v18 = vadd.f32 %v4292_v8, %v1843_v28  ;;  %v2503_v24 = vpack.c.bf16 %v2473_v45, %v2473_v45 }
 0x255   : > { %v1512_v56 = vadd.f32 %v1474_v3, %v3922_v14 }
 0x256   : > { %v2294_v58 = vadd.f32 %v3254_v60, %v2293_v20  ;;  %v3074_v9 = vmul.f32 -1.442695, %v4386_v18  ;;  %2534 = vst.msk [vmem:[%s4005_s21 + $0x48] sm:$0xf] %vm2515_vm6, %v2503_v24 }
 0x257   : > { %v3256_v61 = vpop.eup %3255  ;;  %v1803_v23 = vpop.f32.mrf.mxu2 }
 0x258   : > { %v3258_v10 = vpop.eup %3257  ;;  %v2306_v30 = vmul.f32 %v3256_v61, %v4371_v52  ;;  %v1804_v11 = vadd.f32 %v1803_v23, %v1719_v34  ;;  %v2298_v4 = vsel %vm2297_vm1, %v3254_v60, %v2294_v58  ;;  %3259 = vpow2.f32 %v3074_v9  ;;  %v1475_v41 = vpop.f32.mrf.mxu3 }
 0x259   : > { %v1722_v36 = vpop.f32.mrf.mxu0  ;;  %v4394_v50 = vadd.f32 1.0, %v3258_v10  ;;  %v2303_v57 = vsel %vm2300_vm9, %v2302_v49, %v2298_v4  ;;  %vm2311_vm10 = vweird.f32 %v3256_v61  ;;  %v1476_v31 = vadd.f32 %v1475_v41, %v1391_v55 }
 0x25a   : > { %v2307_v53 = vsub.f32 1.0, %v2306_v30  ;;  %v1844_v42 = vadd.f32 %v1804_v11, %v1511_v19  ;;  %v2474_v26 = vmul.f32 %v2303_v57, %v4333_v21  ;;  %vm2312_vm12 = vmor %vm2310_vm11, %vm2311_vm10 }
 0x25b   : > { %3261 = vrcp.f32 %v4394_v50  ;;  %v1394_v27 = vpop.f32.mrf.mxu1  ;;  %v2331_v0 = vand.u32 2147483648, %v4394_v50  ;;  %vm2325_vm15 = vweird.f32 %v4394_v50  ;;  %v1513_v58 = vadd.f32 %v1476_v31, %v3924_v2 }
 0x25c   : > { %v2308_v51 = vmul.f32 %v3256_v61, %v2307_v53  ;;  %v4401_v39 = vadd.f32 %v4292_v8, %v1844_v42  ;;  %v2504_v35 = vpack.c.bf16 %v2474_v26, %v2474_v26 }
 0x25d   : > { %v2332_v24 = vor.u32 1.1754944e-38, %v2331_v0 }
 0x25e   : > { %v2309_v17 = vadd.f32 %v3256_v61, %v2308_v51  ;;  %v3075_v63 = vmul.f32 -1.442695, %v4401_v39  ;;  %v3260_v21 = vpop.eup %3259  ;;  %2535 = vst.msk [vmem:[%s4005_s21 + $0x4c] sm:$0xf] %vm2515_vm6, %v2504_v35 }
 0x25f   : > { %v1806_v44 = vpop.f32.mrf.mxu2  ;;  %v4408_v25 = vadd.f32 1.0, %v3260_v21 }
 0x260   : > { %v2313_v13 = vsel %vm2312_vm12, %v3256_v61, %v2309_v17  ;;  %3263 = vpow2.f32 %v3075_v63  ;;  %v1807_v52 = vadd.f32 %v1806_v44, %v1722_v36  ;;  %v1478_v22 = vpop.f32.mrf.mxu3 }
 0x261   : > { %v1724_v37 = vpop.f32.mrf.mxu0  ;;  %v3262_v32 = vpop.eup %3261  ;;  %v2318_v60 = vsel %vm2315_vm13, %v2317_v62, %v2313_v13  ;;  %3265 = vrcp.f32 %v4408_v25  ;;  %v2346_v55 = vand.u32 2147483648, %v4408_v25  ;;  %v1479_v11 = vadd.f32 %v1478_v22, %v1394_v27 }
 0x262   : > { %v2475_v7 = vmul.f32 %v2318_v60, %v4346_v5  ;;  %v2321_v59 = vmul.f32 %v3262_v32, %v4394_v50  ;;  %v1845_v12 = vadd.f32 %v1807_v52, %v1512_v56  ;;  %vm2326_vm14 = vweird.f32 %v3262_v32 }
 0x263   : > { %v2329_v5 = vand.u32 2147483647, %v4394_v50  ;;  %vm2327_vm2 = vmor %vm2325_vm15, %vm2326_vm14  ;;  %v1396_v36 = vpop.f32.mrf.mxu1  ;;  %v2344_v2 = vand.u32 2147483647, %v4408_v25  ;;  %vm2340_vm5 = vweird.f32 %v4408_v25  ;;  %v2347_v51 = vor.u32 1.1754944e-38, %v2346_v55 }
 0x264   : > { %v2505_v34 = vpack.c.bf16 %v2475_v7, %v2475_v7  ;;  %v2322_v40 = vsub.f32 1.0, %v2321_v59  ;;  %v4419_v28 = vadd.f32 %v4292_v8, %v1845_v12  ;;  %v1514_v35 = vadd.f32 %v1479_v11, %v3932_v48 }
 0x265   : > { %vm2330_vm3 = vcmp.eq.f32.partialorder %v2329_v5, 8.507059e+37  ;;  %vm2345_vm8 = vcmp.eq.f32.partialorder %v2344_v2, 8.507059e+37 }
 0x266   : > { %v3264_v47 = vpop.eup %3263  ;;  %2536 = vst.msk [vmem:[%s4005_s21 + $0x50] sm:$0xf] %vm2515_vm6, %v2505_v34  ;;  %v2323_v43 = vmul.f32 %v3262_v32, %v2322_v40  ;;  %v3076_v20 = vmul.f32 -1.442695, %v4419_v28 }
 0x267   : > { %v4421_v14 = vadd.f32 1.0, %v3264_v47  ;;  %v1808_v45 = vpop.f32.mrf.mxu2  ;;  %v3266_v38 = vpop.eup %3265 }
 0x268   : > { %v2324_v15 = vadd.f32 %v3262_v32, %v2323_v43  ;;  %v1809_v6 = vadd.f32 %v1808_v45, %v1724_v37  ;;  %v2336_v61 = vmul.f32 %v3266_v38, %v4408_v25  ;;  %vm2341_vm4 = vweird.f32 %v3266_v38  ;;  %v1480_v50 = vpop.f32.mrf.mxu3 }
 0x269   : > { %3267 = vrcp.f32 %v4421_v14  ;;  %v1727_v9 = vpop.f32.mrf.mxu0  ;;  %vm2342_vm7 = vmor %vm2340_vm5, %vm2341_vm4  ;;  %v2361_v25 = vand.u32 2147483648, %v4421_v14  ;;  %v2359_v48 = vand.u32 2147483647, %v4421_v14  ;;  %vm2355_vm1 = vweird.f32 %v4421_v14 }
 0x26a   : > { %v2328_v23 = vsel %vm2327_vm2, %v3262_v32, %v2324_v15  ;;  %3269 = vpow2.f32 %v3076_v20  ;;  %v2337_v49 = vsub.f32 1.0, %v2336_v61  ;;  %v1846_v30 = vadd.f32 %v1809_v6, %v1513_v58 }
 0x26b   : > { %v2333_v10 = vsel %vm2330_vm3, %v2332_v24, %v2328_v23  ;;  %v1481_v59 = vadd.f32 %v1480_v50, %v1396_v36  ;;  %v1399_v56 = vpop.f32.mrf.mxu1  ;;  %v2362_v22 = vor.u32 1.1754944e-38, %v2361_v25  ;;  %vm2360_vm10 = vcmp.eq.f32.partialorder %v2359_v48, 8.507059e+37 }
 0x26c   : > { %v2476_v19 = vmul.f32 %v2333_v10, %v4367_v46  ;;  %v2338_v4 = vmul.f32 %v3266_v38, %v2337_v49  ;;  %v4432_v41 = vadd.f32 %v4292_v8, %v1846_v30 }
 0x26d   : > { %v1515_v45 = vadd.f32 %v1481_v59, %v3934_v33 }
 0x26e   : > { %v2506_v57 = vpack.c.bf16 %v2476_v19, %v2476_v19  ;;  %v2339_v42 = vadd.f32 %v3266_v38, %v2338_v4  ;;  %v3077_v46 = vmul.f32 -1.442695, %v4432_v41 }
 0x26f   : > { %v3268_v53 = vpop.eup %3267  ;;  %v1811_v26 = vpop.f32.mrf.mxu2 }
 0x270   : > { %v3270_v1 = vpop.eup %3269  ;;  %2537 = vst.msk [vmem:[%s4005_s21 + $0x54] sm:$0xf] %vm2515_vm6, %v2506_v57  ;;  %v2351_v54 = vmul.f32 %v3268_v53, %v4421_v14  ;;  %v1812_v17 = vadd.f32 %v1811_v26, %v1727_v9  ;;  %v2343_v3 = vsel %vm2342_vm7, %v3266_v38, %v2339_v42  ;;  %3271 = vpow2.f32 %v3077_v46  ;;  %v1483_v34 = vpop.f32.mrf.mxu3 }
 0x271   : > { %v4440_v63 = vadd.f32 1.0, %v3270_v1  ;;  %v2348_v21 = vsel %vm2345_vm8, %v2347_v51, %v2343_v3  ;;  %v1729_v37 = vpop.f32.mrf.mxu0  ;;  %vm2356_vm0 = vweird.f32 %v3268_v53  ;;  %v1484_v24 = vadd.f32 %v1483_v34, %v1399_v56 }
 0x272   : > { %v2352_v62 = vsub.f32 1.0, %v2351_v54  ;;  %v1847_v44 = vadd.f32 %v1812_v17, %v1514_v35  ;;  %v2477_v13 = vmul.f32 %v2348_v21, %v4386_v18  ;;  %vm2357_vm9 = vmor %vm2355_vm1, %vm2356_vm0 }
 0x273   : > { %3273 = vrcp.f32 %v4440_v63  ;;  %v2376_v6 = vand.u32 2147483648, %v4440_v63  ;;  %vm2370_vm12 = vweird.f32 %v4440_v63  ;;  %v1516_v4 = vadd.f32 %v1484_v24, %v3942_v29  ;;  %v1401_v2 = vpop.f32.mrf.mxu1 }
 0x274   : > { %v2353_v32 = vmul.f32 %v3268_v53, %v2352_v62  ;;  %v4447_v60 = vadd.f32 %v4292_v8, %v1847_v44  ;;  %v2507_v52 = vpack.c.bf16 %v2477_v13, %v2477_v13 }
 0x275   : > { %v2377_v11 = vor.u32 1.1754944e-38, %v2376_v6 }
 0x276   : > { %v2354_v7 = vadd.f32 %v3268_v53, %v2353_v32  ;;  %v3078_v18 = vmul.f32 -1.442695, %v4447_v60  ;;  %v3272_v27 = vpop.eup %3271  ;;  %2538 = vst.msk [vmem:[%s4005_s21 + $0x58] sm:$0xf] %vm2515_vm6, %v2507_v52 }
 0x277   : > { %v1813_v40 = vpop.f32.mrf.mxu2  ;;  %v4453_v0 = vadd.f32 1.0, %v3272_v27 }
 0x278   : > { %v2358_v12 = vsel %vm2357_vm9, %v3268_v53, %v2354_v7  ;;  %3275 = vpow2.f32 %v3078_v18  ;;  %v1814_v43 = vadd.f32 %v1813_v40, %v1729_v37  ;;  %v1485_v50 = vpop.f32.mrf.mxu3 }
 0x279   : > { %v3274_v31 = vpop.eup %3273  ;;  %v2363_v47 = vsel %vm2360_vm10, %v2362_v22, %v2358_v12  ;;  %3277 = vrcp.f32 %v4453_v0  ;;  %v1732_v61 = vpop.f32.mrf.mxu0  ;;  %v2391_v1 = vand.u32 2147483648, %v4453_v0  ;;  %v1486_v51 = vadd.f32 %v1485_v50, %v1401_v2 }
 0x27a   : > { %v2478_v5 = vmul.f32 %v2363_v47, %v4401_v39  ;;  %v2366_v14 = vmul.f32 %v3274_v31, %v4440_v63  ;;  %v1848_v20 = vadd.f32 %v1814_v43, %v1515_v45  ;;  %vm2371_vm11 = vweird.f32 %v3274_v31 }
 0x27b   : > { %v2374_v39 = vand.u32 2147483647, %v4440_v63  ;;  %vm2372_vm13 = vmor %vm2370_vm12, %vm2371_vm11  ;;  %v2389_v29 = vand.u32 2147483647, %v4453_v0  ;;  %vm2385_vm2 = vweird.f32 %v4453_v0  ;;  %v2392_v13 = vor.u32 1.1754944e-38, %v2391_v1 }
 0x27c   : > { %v2508_v38 = vpack.c.bf16 %v2478_v5, %v2478_v5  ;;  %v2367_v15 = vsub.f32 1.0, %v2366_v14  ;;  %v4464_v23 = vadd.f32 %v4292_v8, %v1848_v20  ;;  %v1517_v37 = vadd.f32 %v1486_v51, %v3944_v16 }
 0x27d   : > { %vm2375_vm14 = vcmp.eq.f32.partialorder %v2374_v39, 8.507059e+37  ;;  %vm2390_vm4 = vcmp.eq.f32.partialorder %v2389_v29, 8.507059e+37 }
 0x27e   : > { %v3276_v58 = vpop.eup %3275  ;;  %2539 = vst.msk [vmem:[%s4005_s21 + $0x5c] sm:$0xf] %vm2515_vm6, %v2508_v38  ;;  %v2368_v9 = vmul.f32 %v3274_v31, %v2367_v15  ;;  %v3079_v19 = vmul.f32 -1.442695, %v4464_v23 }
 0x27f   : > { %v4466_v33 = vadd.f32 1.0, %v3276_v58  ;;  %v1816_v10 = vpop.f32.mrf.mxu2  ;;  %v3278_v49 = vpop.eup %3277 }
 0x280   : > { %v2369_v30 = vadd.f32 %v3274_v31, %v2368_v9  ;;  %v1817_v55 = vadd.f32 %v1816_v10, %v1732_v61  ;;  %v2381_v36 = vmul.f32 %v3278_v49, %v4453_v0  ;;  %vm2386_vm15 = vweird.f32 %v3278_v49 }
 0x281   : > { %3279 = vrcp.f32 %v4466_v33  ;;  %v1734_v62 = vpop.f32.mrf.mxu0  ;;  %vm2387_vm3 = vmor %vm2385_vm2, %vm2386_vm15  ;;  %v2406_v27 = vand.u32 2147483648, %v4466_v33  ;;  %v2404_v34 = vand.u32 2147483647, %v4466_v33  ;;  %vm2400_vm7 = vweird.f32 %v4466_v33 }
 0x282   : > { %v2373_v57 = vsel %vm2372_vm13, %v3274_v31, %v2369_v30  ;;  %3281 = vpow2.f32 %v3079_v19  ;;  %v2382_v42 = vsub.f32 1.0, %v2381_v36  ;;  %v1849_v46 = vadd.f32 %v1817_v55, %v1516_v4 }
 0x283   : > { %v2378_v53 = vsel %vm2375_vm14, %v2377_v11, %v2373_v57  ;;  %vm2405_vm0 = vcmp.eq.f32.partialorder %v2404_v34, 8.507059e+37 }
 0x284   : > { %v2479_v26 = vmul.f32 %v2378_v53, %v4419_v28  ;;  %v2383_v54 = vmul.f32 %v3278_v49, %v2382_v42  ;;  %v4477_v35 = vadd.f32 %v4292_v8, %v1849_v46 }
 0x286   : > { %v2509_v17 = vpack.c.bf16 %v2479_v26, %v2479_v26  ;;  %v2384_v63 = vadd.f32 %v3278_v49, %v2383_v54  ;;  %v3080_v21 = vmul.f32 -1.442695, %v4477_v35 }
 0x287   : > { %v3280_v3 = vpop.eup %3279  ;;  %v1818_v44 = vpop.f32.mrf.mxu2 }
 0x288   : > { %v3282_v28 = vpop.eup %3281  ;;  %2540 = vst.msk [vmem:[%s4005_s21 + $0x60] sm:$0xf] %vm2515_vm6, %v2509_v17  ;;  %v2396_v25 = vmul.f32 %v3280_v3, %v4466_v33  ;;  %v1819_v32 = vadd.f32 %v1818_v44, %v1734_v62  ;;  %v2388_v48 = vsel %vm2387_vm3, %v3278_v49, %v2384_v63  ;;  %3283 = vpow2.f32 %v3080_v21 }
 0x289   : > { %v2002_v52 = vadd.f32 1.0, %v3282_v28  ;;  %v2393_v7 = vsel %vm2390_vm4, %v2392_v13, %v2388_v48  ;;  %vm2401_vm5 = vweird.f32 %v3280_v3 }
 0x28a   : > { %v2397_v59 = vsub.f32 1.0, %v2396_v25  ;;  %v1850_v56 = vadd.f32 %v1819_v32, %v1517_v37  ;;  %v2480_v18 = vmul.f32 %v2393_v7, %v4432_v41  ;;  %vm2402_vm8 = vmor %vm2400_vm7, %vm2401_vm5  ;;  %v2407_v41 = vor.u32 1.1754944e-38, %v2406_v27 }
 0x28b   : > { %3285 = vrcp.f32 %v2002_v52  ;;  %v2421_v20 = vand.u32 2147483648, %v2002_v52  ;;  %v2419_v61 = vand.u32 2147483647, %v2002_v52  ;;  %vm2415_vm9 = vweird.f32 %v2002_v52 }
 0x28c   : > { %v2398_v22 = vmul.f32 %v3280_v3, %v2397_v59  ;;  %v4489_v16 = vadd.f32 %v4292_v8, %v1850_v56  ;;  %v2510_v40 = vpack.c.bf16 %v2480_v18, %v2480_v18 }
 0x28d   : > { %v2422_v33 = vor.u32 1.1754944e-38, %v2421_v20  ;;  %vm2420_vm11 = vcmp.eq.f32.partialorder %v2419_v61, 8.507059e+37 }
 0x28e   : > { %v2399_v12 = vadd.f32 %v3280_v3, %v2398_v22  ;;  %v3081_v0 = vmul.f32 -1.442695, %v4489_v16  ;;  %v3284_v31 = vpop.eup %3283  ;;  %2541 = vst.msk [vmem:[%s4005_s21 + $0x64] sm:$0xf] %vm2515_vm6, %v2510_v40 }
 0x28f   : > { %v2003_v43 = vadd.f32 1.0, %v3284_v31 }
 0x290   : > { %v2403_v47 = vsel %vm2402_vm8, %v3280_v3, %v2399_v12  ;;  %3287 = vpow2.f32 %v3081_v0 }
 0x291   : > { %v3286_v5 = vpop.eup %3285  ;;  %v2408_v14 = vsel %vm2405_vm0, %v2407_v41, %v2403_v47  ;;  %3289 = vrcp.f32 %v2003_v43  ;;  %v2436_v55 = vand.u32 2147483648, %v2003_v43  ;;  %v2434_v36 = vand.u32 2147483647, %v2003_v43 }
 0x292   : > { %v2481_v8 = vmul.f32 %v2408_v14, %v4447_v60  ;;  %v2411_v45 = vmul.f32 %v3286_v5, %v2002_v52  ;;  %vm2416_vm1 = vweird.f32 %v3286_v5  ;;  %vm2430_vm13 = vweird.f32 %v2003_v43 }
 0x293   : > { %vm2417_vm10 = vmor %vm2415_vm9, %vm2416_vm1  ;;  %v2437_v57 = vor.u32 1.1754944e-38, %v2436_v55  ;;  %vm2435_vm15 = vcmp.eq.f32.partialorder %v2434_v36, 8.507059e+37 }
 0x294   : > { %v2511_v38 = vpack.c.bf16 %v2481_v8, %v2481_v8  ;;  %v2412_v15 = vsub.f32 1.0, %v2411_v45 }
 0x296   : > { %v3288_v6 = vpop.eup %3287  ;;  %2542 = vst.msk [vmem:[%s4005_s21 + $0x68] sm:$0xf] %vm2515_vm6, %v2511_v38  ;;  %v2413_v24 = vmul.f32 %v3286_v5, %v2412_v15 }
 0x297   : > { %v2004_v58 = vadd.f32 1.0, %v3288_v6  ;;  %v3290_v9 = vpop.eup %3289 }
 0x298   : > { %v2414_v39 = vadd.f32 %v3286_v5, %v2413_v24  ;;  %v2426_v10 = vmul.f32 %v3290_v9, %v2003_v43  ;;  %vm2431_vm12 = vweird.f32 %v3290_v9 }
 0x299   : > { %3291 = vrcp.f32 %v2004_v58  ;;  %vm2432_vm14 = vmor %vm2430_vm13, %vm2431_vm12  ;;  %v2451_v1 = vand.u32 2147483648, %v2004_v58  ;;  %v2449_v54 = vand.u32 2147483647, %v2004_v58  ;;  %vm2445_vm3 = vweird.f32 %v2004_v58 }
 0x29a   : > { %v2418_v60 = vsel %vm2417_vm10, %v3286_v5, %v2414_v39  ;;  %v2427_v30 = vsub.f32 1.0, %v2426_v10 }
 0x29b   : > { %v2423_v49 = vsel %vm2420_vm11, %v2422_v33, %v2418_v60  ;;  %v2452_v3 = vor.u32 1.1754944e-38, %v2451_v1  ;;  %vm2450_vm5 = vcmp.eq.f32.partialorder %v2449_v54, 8.507059e+37 }
 0x29c   : > { %v2482_v19 = vmul.f32 %v2423_v49, %v4464_v23  ;;  %v2428_v11 = vmul.f32 %v3290_v9, %v2427_v30 }
 0x29e   : > { %v2512_v4 = vpack.c.bf16 %v2482_v19, %v2482_v19  ;;  %v2429_v50 = vadd.f32 %v3290_v9, %v2428_v11 }
 0x29f   : > { %v3292_v2 = vpop.eup %3291 }
 0x2a0   : > { %2543 = vst.msk [vmem:[%s4005_s21 + $0x6c] sm:$0xf] %vm2515_vm6, %v2512_v4  ;;  %v2441_v53 = vmul.f32 %v3292_v2, %v2004_v58  ;;  %v2433_v42 = vsel %vm2432_vm14, %v3290_v9, %v2429_v50  ;;  %vm2446_vm2 = vweird.f32 %v3292_v2 }
 0x2a1   : > { %v2438_v46 = vsel %vm2435_vm15, %v2437_v57, %v2433_v42  ;;  %vm2447_vm4 = vmor %vm2445_vm3, %vm2446_vm2 }
 0x2a2   : > { %v2442_v26 = vsub.f32 1.0, %v2441_v53  ;;  %v2483_v23 = vmul.f32 %v2438_v46, %v4477_v35 }
 0x2a4   : > { %v2443_v51 = vmul.f32 %v3292_v2, %v2442_v26  ;;  %v2513_v29 = vpack.c.bf16 %v2483_v23, %v2483_v23 }
 0x2a6   : > { %v2444_v17 = vadd.f32 %v3292_v2, %v2443_v51  ;;  %2544 = vst.msk [vmem:[%s4005_s21 + $0x70] sm:$0xf] %vm2515_vm6, %v2513_v29 }
 0x2a8   : > { %v2448_v63 = vsel %vm2447_vm4, %v3292_v2, %v2444_v17 }
 0x2a9   : > { %v2453_v21 = vsel %vm2450_vm5, %v2452_v3, %v2448_v63 }
 0x2aa   : > { %v2484_v62 = vmul.f32 %v2453_v21, %v4489_v16 }
 0x2ac   : > { %v2514_v44 = vpack.c.bf16 %v2484_v62, %v2484_v62 }
 0x2ae   : > { %2545 = vst.msk [vmem:[%s4005_s21 + $0x74] sm:$0xf] %vm2515_vm6, %v2514_v44 }
 0x2af PF: > { %s13_s12 = sadd.s32 1, %s3300_s12  }
 0x2b0   : > { %p10_p4 = scmp.ge.s32.totalorder %s13_s12, 4  }
 0x2b2   :  { %12 = sbr.rel (!%p10_p4) target bundleno = 1 (0x1), region = 65 }

// kernel: dqn_forward.4
= control target key start
LH: loop header
LB: loop body
LE: loop exit
PB: predicated region body
PF: predicated region fallthrough
CT: control target
= control target key end

     0   :  { %s1132_s12 = smov 0   ;;  %s1311_s0 = inlined_call_operand.vmem [shape: bf16[2,56,128], index: 0, kind: input, shape index: {}]   ;;  %s1312_s1 = inlined_call_operand.vmem [shape: bf16[4,128,64], index: 1, kind: input, shape index: {}]   ;;  %s1313_s2 = inlined_call_operand.vmem [shape: f32[1,64], index: 2, kind: input, shape index: {}]   ;;  %s1314_s3 = inlined_call_operand.vmem [shape: bf16[2,42,64], index: 3, kind: output, shape index: {}]  }
   0x1 LB: > { %s818_s13 = sadd.s32 4294967295, %s1110_s12   ;;  %p822_p0 = scmp.ge.s32.totalorder %s1110_s12, 1  ;;  %s1110_s12 = sphi %s1132_s12, %s13_s12  }
   0x2   : > { %p137_p1 = scmp.lt.s32.totalorder %s1110_s12, 3 }
   0x4   : > { %p138_p2 = pnand %p822_p0, %p137_p1 }
   0x5   : > { %p161_p3 = scmp.lt.s32.totalorder (!%p138_p2), %s818_s13, 1 }
   0x6   : > { %141 = sbr.rel (%p138_p2) target bundleno = 260 (0x104), region = 32 }
   0xb   : > { %v1024_v0 = vld [vmem:[%s1312_s1 + $0x78] sm:$0xff]  ;;  %v1023_v4 = vld [vmem:[%s1312_s1 + $0x70] sm:$0xff]  ;;  %s1316_s13 = smov (!%p161_p3, %s818_s13), 1  ;;  %v1022_v8 = vld [vmem:[%s1312_s1 + $0x68] sm:$0xff]  ;;  %vm226_vm0 = vsmask.f32 7424 }
   0xc   : > { %v1016_v1 = vld [vmem:[%s1312_s1 + $0x38] sm:$0xff]  ;;  %301 = vmatpush.bf16.msra.mxu0 %v1024_v0  ;;  %v1015_v5 = vld [vmem:[%s1312_s1 + $0x30] sm:$0xff]  ;;  %v1014_v9 = vld [vmem:[%s1312_s1 + $0x28] sm:$0xff]  ;;  %s1069_s11 = smul.u32 28, %s1316_s13  ;;  %vm420_vm1 = vsmask.f32 4352 }
   0xd   : > { %v1032_v2 = vld [vmem:[%s1312_s1 + $0xb8] sm:$0xff]  ;;  %376 = vmatpush.bf16.msra.mxu1 %v1016_v1  ;;  %v1031_v6 = vld [vmem:[%s1312_s1 + $0xb0] sm:$0xff]  ;;  %v1030_v10 = vld [vmem:[%s1312_s1 + $0xa8] sm:$0xff]  ;;  %s1070_s7 = smul.u32 24, %s1316_s13  ;;  %vm755_vm6 = vcmask 519168  }
   0xe   : > { %v1040_v3 = vld [vmem:[%s1312_s1 + $0xf8] sm:$0xff]  ;;  %488 = vmatpush.bf16.msra.mxu2 %v1032_v2  ;;  %v1039_v7 = vld [vmem:[%s1312_s1 + $0xf0] sm:$0xff]  ;;  %v1038_v11 = vld [vmem:[%s1312_s1 + $0xe8] sm:$0xff]  ;;  %s1194_s24 = scalar_lea.vmem %s1311_s0, %s1069_s11 }
   0xf   : > { %589 = vmatpush.bf16.msra.mxu3 %v1040_v3  ;;  %v1021_v12 = vld [vmem:[%s1312_s1 + $0x60] sm:$0xff]  ;;  %v1020_v16 = vld [vmem:[%s1312_s1 + $0x58] sm:$0xff]  ;;  %v1210_v21 = vld [vmem:[%s1194_s24 + $0x8] sm:$0xff]   ;;  %s1282_s10 = scalar_lea.vmem %s1314_s3, %s1070_s7 }
  0x10   : > { %302 = vmatpush.bf16.msra.mxu0 %v1023_v4  ;;  %v1013_v13 = vld [vmem:[%s1312_s1 + $0x20] sm:$0xff]  ;;  %v1012_v17 = vld [vmem:[%s1312_s1 + $0x18] sm:$0xff]  ;;  %v1019_v22 = vld [vmem:[%s1312_s1 + $0x50] sm:$0xff]  ;;  %v235_v28 = vshll.u32 %v1210_v21, 16  ;;  %v239_v29 = vshrl.u32 %v1210_v21, 16 }
  0x11   : > { %377 = vmatpush.bf16.msra.mxu1 %v1015_v5  ;;  %v1029_v14 = vld [vmem:[%s1312_s1 + $0xa0] sm:$0xff]  ;;  %v1028_v18 = vld [vmem:[%s1312_s1 + $0x98] sm:$0xff]  ;;  %v1011_v23 = vld [vmem:[%s1312_s1 + $0x10] sm:$0xff] }
  0x12   : > { %489 = vmatpush.bf16.msra.mxu2 %v1031_v6  ;;  %v1037_v15 = vld [vmem:[%s1312_s1 + $0xe0] sm:$0xff]  ;;  %v1036_v19 = vld [vmem:[%s1312_s1 + $0xd8] sm:$0xff]  ;;  %v1027_v25 = vld [vmem:[%s1312_s1 + $0x90] sm:$0xff]  ;;  %v424_v37 = vrot.slane %v239_v29, 3  ;;  %v425_v38 = vrot.slane %v235_v28, 4  ;;  %v237_v42 = vrot.slane %v235_v28, 1 }
  0x13   : > { %590 = vmatpush.bf16.msra.mxu3 %v1039_v7  ;;  %v1042_v20 = vld [vmem:[%s1194_s24] sm:$0xff]   ;;  %v1035_v26 = vld [vmem:[%s1312_s1 + $0xd0] sm:$0xff]  ;;  %v1018_v30 = vld [vmem:[%s1312_s1 + $0x48] sm:$0xff] }
  0x14   : > { %303 = vmatpush.bf16.msra.mxu0 %v1022_v8  ;;  %v230_v24 = vshll.u32 %v1042_v20, 16  ;;  %v228_v27 = vshrl.u32 %v1042_v20, 16  ;;  %v1010_v31 = vld [vmem:[%s1312_s1 + $0x8] sm:$0xff]  ;;  %v1017_v39 = vld [vmem:[%s1312_s1 + $0x40] sm:$0xff]  ;;  %v426_v46 = vor.u32 %v425_v38, %v424_v37  ;;  %v1054_v50 = vld [vmem:[%s1194_s24 + $0x10] sm:$0xff]   ;;  %v241_v55 = vor.u32 %v239_v29, %v237_v42 }
  0x15   : > { %378 = vmatpush.bf16.msra.mxu1 %v1014_v9  ;;  %v1026_v33 = vld [vmem:[%s1312_s1 + $0x88] sm:$0xff]  ;;  %v1009_v40 = vld [vmem:[%s1312_s1] sm:$0xff]  ;;  %v243_v51 = vshll.u32 %v1054_v50, 16  ;;  %v247_v52 = vshrl.u32 %v1054_v50, 16  ;;  %v177_v58 = vld [vmem:[%s1194_s24 + $0x18] sm:$0xf]  ;;  %v1052_v1 = vunpack.c.h.b16 %v1054_v50 }
  0x16   : > { %490 = vmatpush.bf16.msra.mxu2 %v1030_v10  ;;  %v232_v32 = vrot.slane %v230_v24, 1  ;;  %v1034_v34 = vld [vmem:[%s1312_s1 + $0xc8] sm:$0xff]  ;;  %v421_v35 = vrot.slane %v228_v27, 3  ;;  %v422_v36 = vrot.slane %v230_v24, 4  ;;  %v1025_v43 = vld [vmem:[%s1312_s1 + $0x80] sm:$0xff]  ;;  %v418_v62 = vunpack.c.l.b16 %v177_v58 }
  0x17   : > { %591 = vmatpush.bf16.msra.mxu3 %v1038_v11  ;;  %v1033_v44 = vld [vmem:[%s1312_s1 + $0xc0] sm:$0xff]  ;;  %v428_v53 = vrot.slane %v247_v52, 3  ;;  %v429_v54 = vrot.slane %v243_v51, 4  ;;  %v245_v56 = vrot.slane %v243_v51, 1  ;;  %v1068_v60 = vld [vmem:[%s1194_s24 + $0xc] sm:$0xff]  }
  0x18   : > { %304 = vmatpush.bf16.msra.mxu0 %v1021_v12  ;;  %v233_v41 = vor.u32 %v232_v32, %v228_v27  ;;  %v423_v45 = vor.u32 %v422_v36, %v421_v35  ;;  %v1067_v48 = vld [vmem:[%s1194_s24 + $0x4] sm:$0xff]   ;;  %v419_v63 = vpack.c.b16 %v418_v62, %v418_v62  ;;  %v537_v4 = vpack.c.b16 %v418_v62, %v1052_v1  ;;  %v1263_v12 = vld [vmem:[%s1313_s2] ss:$0 sm:$0xff] }
  0x19   : > { %379 = vmatpush.bf16.msra.mxu1 %v1013_v13  ;;  %v430_v57 = vor.u32 %v429_v54, %v428_v53  ;;  %v246_v59 = vsel %vm226_vm0, %v241_v55, %v245_v56  ;;  %v249_v3 = vor.u32 %v247_v52, %v245_v56 }
  0x1a   : > { %491 = vmatpush.bf16.msra.mxu2 %v1029_v14  ;;  %v238_v47 = vsel %vm226_vm0, %v233_v41, %v237_v42  ;;  %v427_v49 = vsel %vm420_vm1, %v423_v45, %v426_v46  ;;  %v433_v0 = vshll.u32 %v419_v63, 16 }
  0x1b   : > { %592 = vmatpush.bf16.msra.mxu3 %v1037_v15  ;;  %v431_v61 = vsel %vm420_vm1, %v426_v46, %v430_v57 }
  0x1c   : > { %305 = vmatpush.bf16.msra.mxu0 %v1020_v16  ;;  %v435_v2 = vrot.slane %v433_v0, 4 }
  0x1d   : > { %380 = vmatpush.bf16.msra.mxu1 %v1012_v17 }
  0x1e   : > { %492 = vmatpush.bf16.msra.mxu2 %v1028_v18  ;;  %v436_v5 = vsel %vm420_vm1, %v430_v57, %v435_v2 }
  0x1f   : > { %593 = vmatpush.bf16.msra.mxu3 %v1036_v19 }
  0x20   : > { %306 = vmatpush.bf16.msra.mxu0 %v1019_v22 }
  0x21   : > { %381 = vmatpush.bf16.msra.mxu1 %v1011_v23 }
  0x22   : > { %493 = vmatpush.bf16.msra.mxu2 %v1027_v25 }
  0x23   : > { %594 = vmatpush.bf16.msra.mxu3 %v1035_v26 }
  0x24   : > { %307 = vmatpush.bf16.msra.mxu0 %v1018_v30 }
  0x25   : > { %382 = vmatpush.bf16.msra.mxu1 %v1010_v31 }
  0x26   : > { %494 = vmatpush.bf16.msra.mxu2 %v1026_v33 }
  0x27   : > { %595 = vmatpush.bf16.msra.mxu3 %v1034_v34 }
  0x28   : > { %308 = vmatpush.bf16.msra.mxu0 %v1017_v39 }
  0x29   : > { %383 = vmatpush.bf16.msra.mxu1 %v1009_v40 }
  0x2a   : > { %495 = vmatpush.bf16.msra.mxu2 %v1025_v43 }
  0x2b   : > { %596 = vmatpush.bf16.msra.mxu3 %v1033_v44  ;;  %309 = vmatmul.bf16.vlgmr.msra.gmra.mxu0 %v238_v47 }
  0x2c   : > { %384 = vmatmul.bf16.vlgmr.msra.gmra.mxu1 %v1042_v20 }
  0x2d   : > { %496 = vmatmul.bf16.vlgmr.msra.gmra.mxu2 %v427_v49 }
  0x2e   : > { %597 = vmatmul.bf16.vlgmr.msra.gmra.mxu3 %v1067_v48 }
  0x3b   : > { %314 = vmatmul.bf16.gmra.mxu0 %v246_v59 }
  0x3c   : > { %389 = vmatmul.bf16.gmra.mxu1 %v1210_v21 }
  0x3d   : > { %501 = vmatmul.bf16.gmra.mxu2 %v431_v61 }
  0x3e   : > { %602 = vmatmul.bf16.gmra.mxu3 %v1068_v60 }
  0x4b   : > { %319 = vmatmul.bf16.gmra.mxu0 %v249_v3 }
  0x4c   : > { %394 = vmatmul.bf16.gmra.mxu1 %v1054_v50 }
  0x4d   : > { %506 = vmatmul.bf16.gmra.mxu2 %v436_v5 }
  0x4e   : > { %607 = vmatmul.bf16.gmra.mxu3 %v537_v4 }
  0xa8   : > { %v310_v6 = vpop.f32.mrf.mxu0 }
  0xa9   : > { %v385_v7 = vpop.f32.mrf.mxu1 }
  0xaa   : > { %v386_v8 = vadd.f32 %v385_v7, %v310_v6 }
  0xb0   : > { %v497_v9 = vpop.f32.mrf.mxu2  ;;  %v312_v13 = vpop.f32.mrf.mxu0 }
  0xb1   : > { %v598_v10 = vpop.f32.mrf.mxu3  ;;  %v512_v11 = vadd.f32 %v497_v9, %v386_v8  ;;  %v387_v14 = vpop.f32.mrf.mxu1 }
  0xb2   : > { %v388_v18 = vadd.f32 %v387_v14, %v312_v13 }
  0xb3   : > { %v613_v15 = vadd.f32 %v598_v10, %v512_v11 }
  0xb5   : > { %v623_v16 = vadd.f32 %v1263_v12, %v613_v15 }
  0xb7   : > { %v1001_v17 = vmul.f32 -1.442695, %v623_v16 }
  0xb8   : > { %v499_v19 = vpop.f32.mrf.mxu2  ;;  %v315_v22 = vpop.f32.mrf.mxu0 }
  0xb9   : > { %v600_v20 = vpop.f32.mrf.mxu3  ;;  %1080 = vpow2.f32 %v1001_v17  ;;  %v513_v21 = vadd.f32 %v499_v19, %v388_v18  ;;  %v390_v23 = vpop.f32.mrf.mxu1 }
  0xba   : > { %v391_v26 = vadd.f32 %v390_v23, %v315_v22 }
  0xbb   : > { %v614_v24 = vadd.f32 %v600_v20, %v513_v21 }
  0xbd   : > { %v1267_v25 = vadd.f32 %v1263_v12, %v614_v24 }
  0xbf   : > { %v1081_v27 = vpop.eup %1080  ;;  %v1002_v28 = vmul.f32 -1.442695, %v1267_v25 }
  0xc0   : > { %v647_v29 = vadd.f32 1.0, %v1081_v27  ;;  %v502_v30 = vpop.f32.mrf.mxu2  ;;  %v317_v34 = vpop.f32.mrf.mxu0 }
  0xc1   : > { %v603_v31 = vpop.f32.mrf.mxu3  ;;  %1082 = vpow2.f32 %v1002_v28  ;;  %v514_v32 = vadd.f32 %v502_v30, %v391_v26  ;;  %v392_v35 = vpop.f32.mrf.mxu1 }
  0xc2   : > { %1084 = vrcp.f32 %v647_v29  ;;  %v393_v39 = vadd.f32 %v392_v35, %v317_v34  ;;  %v664_v48 = vand.u32 2147483648, %v647_v29  ;;  %v662_v50 = vand.u32 2147483647, %v647_v29 }
  0xc3   : > { %v615_v33 = vadd.f32 %v603_v31, %v514_v32  ;;  %vm658_vm3 = vweird.f32 %v647_v29 }
  0xc4   : > { %v665_v59 = vor.u32 1.1754944e-38, %v664_v48  ;;  %vm663_vm5 = vcmp.eq.f32.partialorder %v662_v50, 8.507059e+37 }
  0xc5   : > { %v1271_v36 = vadd.f32 %v1263_v12, %v615_v33 }
  0xc7   : > { %v1083_v37 = vpop.eup %1082  ;;  %v1003_v38 = vmul.f32 -1.442695, %v1271_v36 }
  0xc8   : > { %v1085_v40 = vpop.eup %1084  ;;  %v648_v41 = vadd.f32 1.0, %v1083_v37  ;;  %v504_v42 = vpop.f32.mrf.mxu2 }
  0xc9   : > { %v654_v43 = vmul.f32 %v1085_v40, %v647_v29  ;;  %1086 = vpow2.f32 %v1003_v38  ;;  %v515_v44 = vadd.f32 %v504_v42, %v393_v39  ;;  %v605_v45 = vpop.f32.mrf.mxu3  ;;  %vm659_vm2 = vweird.f32 %v1085_v40  ;;  %v320_v52 = vpop.f32.mrf.mxu0 }
  0xca   : > { %1088 = vrcp.f32 %v648_v41  ;;  %v395_v53 = vpop.f32.mrf.mxu1  ;;  %vm660_vm4 = vmor %vm658_vm3, %vm659_vm2  ;;  %v677_v5 = vand.u32 2147483647, %v648_v41  ;;  %v679_v6 = vand.u32 2147483648, %v648_v41  ;;  %vm673_vm8 = vweird.f32 %v648_v41 }
  0xcb   : > { %v655_v46 = vsub.f32 1.0, %v654_v43  ;;  %v616_v47 = vadd.f32 %v605_v45, %v515_v44  ;;  %v396_v57 = vadd.f32 %v395_v53, %v320_v52 }
  0xcc   : > { %v680_v17 = vor.u32 1.1754944e-38, %v679_v6  ;;  %vm678_vm10 = vcmp.eq.f32.partialorder %v677_v5, 8.507059e+37 }
  0xcd   : > { %v656_v49 = vmul.f32 %v1085_v40, %v655_v46  ;;  %v1275_v51 = vadd.f32 %v1263_v12, %v616_v47 }
  0xcf   : > { %v1087_v54 = vpop.eup %1086  ;;  %v657_v55 = vadd.f32 %v1085_v40, %v656_v49  ;;  %v1004_v56 = vmul.f32 -1.442695, %v1275_v51 }
  0xd0   : > { %v1089_v58 = vpop.eup %1088  ;;  %v649_v60 = vadd.f32 1.0, %v1087_v54  ;;  %v507_v61 = vpop.f32.mrf.mxu2 }
  0xd1   : > { %v661_v62 = vsel %vm660_vm4, %v1085_v40, %v657_v55  ;;  %v669_v63 = vmul.f32 %v1089_v58, %v648_v41  ;;  %1090 = vpow2.f32 %v1004_v56  ;;  %v516_v3 = vadd.f32 %v507_v61, %v396_v57  ;;  %v608_v4 = vpop.f32.mrf.mxu3  ;;  %v322_v14 = vpop.f32.mrf.mxu0 }
  0xd2   : > { %v666_v0 = vsel %vm663_vm5, %v665_v59, %v661_v62  ;;  %1092 = vrcp.f32 %v649_v60  ;;  %vm674_vm7 = vweird.f32 %v1089_v58  ;;  %v397_v15 = vpop.f32.mrf.mxu1  ;;  %v694_v28 = vand.u32 2147483648, %v649_v60 }
  0xd3   : > { %v743_v1 = vmul.f32 %v666_v0, %v623_v16  ;;  %v670_v2 = vsub.f32 1.0, %v669_v63  ;;  %v617_v9 = vadd.f32 %v608_v4, %v516_v3  ;;  %vm675_vm9 = vmor %vm673_vm8, %vm674_vm7  ;;  %v398_v24 = vadd.f32 %v397_v15, %v322_v14 }
  0xd4   : > { %v692_v32 = vand.u32 2147483647, %v649_v60  ;;  %vm688_vm12 = vweird.f32 %v649_v60  ;;  %v695_v38 = vor.u32 1.1754944e-38, %v694_v28 }
  0xd5   : > { %v749_v7 = vpack.c.bf16 %v743_v1, %v743_v1  ;;  %v671_v8 = vmul.f32 %v1089_v58, %v670_v2  ;;  %v1287_v13 = vadd.f32 %v1263_v12, %v617_v9 }
  0xd6   : > { %vm693_vm14 = vcmp.eq.f32.partialorder %v692_v32, 8.507059e+37 }
  0xd7   : > { %v1091_v10 = vpop.eup %1090  ;;  %756 = vst.msk [vmem:[%s1282_s10] sm:$0xf] %vm755_vm6, %v749_v7  ;;  %v672_v11 = vadd.f32 %v1089_v58, %v671_v8  ;;  %v1005_v21 = vmul.f32 -1.442695, %v1287_v13 }
  0xd8   : > { %v1093_v16 = vpop.eup %1092  ;;  %v650_v18 = vadd.f32 1.0, %v1091_v10  ;;  %v509_v22 = vpop.f32.mrf.mxu2 }
  0xd9   : > { %v676_v19 = vsel %vm675_vm9, %v1089_v58, %v672_v11  ;;  %v684_v20 = vmul.f32 %v1093_v16, %v649_v60  ;;  %v517_v29 = vadd.f32 %v509_v22, %v398_v24  ;;  %vm689_vm11 = vweird.f32 %v1093_v16  ;;  %v610_v33 = vpop.f32.mrf.mxu3 }
  0xda   : > { %v681_v23 = vsel %vm678_vm10, %v680_v17, %v676_v19  ;;  %1094 = vrcp.f32 %v650_v18  ;;  %vm690_vm13 = vmor %vm688_vm12, %vm689_vm11  ;;  %v707_v47 = vand.u32 2147483647, %v650_v18  ;;  %v709_v48 = vand.u32 2147483648, %v650_v18 }
  0xdb   : > { %v744_v26 = vmul.f32 %v681_v23, %v1267_v25  ;;  %v685_v27 = vsub.f32 1.0, %v684_v20  ;;  %1096 = vpow2.f32 %v1005_v21  ;;  %v618_v34 = vadd.f32 %v610_v33, %v517_v29 }
  0xdc   : > { %vm703_vm0 = vweird.f32 %v650_v18  ;;  %v710_v52 = vor.u32 1.1754944e-38, %v709_v48  ;;  %vm708_vm2 = vcmp.eq.f32.partialorder %v707_v47, 8.507059e+37  ;;  %vm761_vm12 = vcmask 516096  }
  0xdd   : > { %v750_v30 = vpack.c.bf16 %v744_v26, %v744_v26  ;;  %v686_v31 = vmul.f32 %v1093_v16, %v685_v27  ;;  %v1294_v39 = vadd.f32 %v1263_v12, %v618_v34 }
  0xdf   : > { %757 = vst.msk [vmem:[%s1282_s10 + $0x4] sm:$0xf] %vm755_vm6, %v750_v30  ;;  %v687_v35 = vadd.f32 %v1093_v16, %v686_v31  ;;  %v1006_v44 = vmul.f32 -1.442695, %v1294_v39 }
  0xe0   : > { %v1095_v37 = vpop.eup %1094 }
  0xe1   : > { %v1097_v25 = vpop.eup %1096  ;;  %v691_v40 = vsel %vm690_vm13, %v1093_v16, %v687_v35  ;;  %v699_v41 = vmul.f32 %v1095_v37, %v650_v18  ;;  %vm704_vm15 = vweird.f32 %v1095_v37 }
  0xe2   : > { %v696_v42 = vsel %vm693_vm14, %v695_v38, %v691_v40  ;;  %v651_v43 = vadd.f32 1.0, %v1097_v25  ;;  %vm705_vm1 = vmor %vm703_vm0, %vm704_vm15 }
  0xe3   : > { %v745_v45 = vmul.f32 %v696_v42, %v1271_v36  ;;  %v700_v46 = vsub.f32 1.0, %v699_v41 }
  0xe4   : > { %1098 = vrcp.f32 %v651_v43  ;;  %v724_v61 = vand.u32 2147483648, %v651_v43  ;;  %v722_v63 = vand.u32 2147483647, %v651_v43  ;;  %vm718_vm4 = vweird.f32 %v651_v43 }
  0xe5   : > { %v751_v49 = vpack.c.bf16 %v745_v45, %v745_v45  ;;  %v701_v50 = vmul.f32 %v1095_v37, %v700_v46  ;;  %1100 = vpow2.f32 %v1006_v44 }
  0xe6   : > { %v725_v1 = vor.u32 1.1754944e-38, %v724_v61  ;;  %vm723_vm7 = vcmp.eq.f32.partialorder %v722_v63, 8.507059e+37 }
  0xe7   : > { %758 = vst.msk [vmem:[%s1282_s10 + $0x8] sm:$0xf] %vm755_vm6, %v751_v49  ;;  %v702_v12 = vadd.f32 %v1095_v37, %v701_v50 }
  0xe9   : > { %v706_v53 = vsel %vm705_vm1, %v1095_v37, %v702_v12 }
  0xea   : > { %v1099_v54 = vpop.eup %1098  ;;  %v711_v55 = vsel %vm708_vm2, %v710_v52, %v706_v53 }
  0xeb   : > { %v1101_v36 = vpop.eup %1100  ;;  %v746_v56 = vmul.f32 %v711_v55, %v1275_v51  ;;  %v714_v57 = vmul.f32 %v1099_v54, %v651_v43  ;;  %vm719_vm3 = vweird.f32 %v1099_v54 }
  0xec   : > { %v652_v58 = vadd.f32 1.0, %v1101_v36  ;;  %vm720_vm5 = vmor %vm718_vm4, %vm719_vm3 }
  0xed   : > { %v752_v59 = vpack.c.bf16 %v746_v56, %v746_v56  ;;  %v715_v60 = vsub.f32 1.0, %v714_v57 }
  0xee   : > { %1102 = vrcp.f32 %v652_v58  ;;  %v739_v8 = vand.u32 2147483648, %v652_v58  ;;  %v737_v10 = vand.u32 2147483647, %v652_v58  ;;  %vm733_vm9 = vweird.f32 %v652_v58 }
  0xef   : > { %759 = vst.msk [vmem:[%s1282_s10 + $0xc] sm:$0xf] %vm755_vm6, %v752_v59  ;;  %v716_v62 = vmul.f32 %v1099_v54, %v715_v60 }
  0xf0   : > { %v740_v14 = vor.u32 1.1754944e-38, %v739_v8  ;;  %vm738_vm11 = vcmp.eq.f32.partialorder %v737_v10, 8.507059e+37 }
  0xf1   : > { %v717_v0 = vadd.f32 %v1099_v54, %v716_v62 }
  0xf3   : > { %v721_v2 = vsel %vm720_vm5, %v1099_v54, %v717_v0 }
  0xf4   : > { %v1103_v3 = vpop.eup %1102  ;;  %v726_v51 = vsel %vm723_vm7, %v725_v1, %v721_v2 }
  0xf5   : > { %v747_v4 = vmul.f32 %v726_v51, %v1287_v13  ;;  %v729_v5 = vmul.f32 %v1103_v3, %v652_v58  ;;  %vm734_vm8 = vweird.f32 %v1103_v3 }
  0xf6   : > { %vm735_vm10 = vmor %vm733_vm9, %vm734_vm8 }
  0xf7   : > { %v753_v6 = vpack.c.bf16 %v747_v4, %v747_v4  ;;  %v730_v7 = vsub.f32 1.0, %v729_v5 }
  0xf9   : > { %760 = vst.msk [vmem:[%s1282_s10 + $0x10] sm:$0xf] %vm755_vm6, %v753_v6  ;;  %v731_v9 = vmul.f32 %v1103_v3, %v730_v7 }
  0xfb   : > { %v732_v11 = vadd.f32 %v1103_v3, %v731_v9 }
  0xfd   : > { %v736_v15 = vsel %vm735_vm10, %v1103_v3, %v732_v11 }
  0xfe   : > { %v741_v16 = vsel %vm738_vm11, %v740_v14, %v736_v15 }
  0xff   : > { %v748_v17 = vmul.f32 %v741_v16, %v1294_v39 }
 0x101   : > { %v754_v13 = vpack.c.bf16 %v748_v17, %v748_v17 }
 0x103   : > { %762 = vst.msk [vmem:[%s1282_s10 + $0x14] sm:$0x1] %vm761_vm12, %v754_v13 }
 0x104 PF: > { %s13_s12 = sadd.s32 1, %s1110_s12  }
 0x105   : > { %p10_p4 = scmp.ge.s32.totalorder %s13_s12, 4  }
 0x107   :  { %12 = sbr.rel (!%p10_p4) target bundleno = 1 (0x1), region = 65 }

// kernel: dqn_forward.5
= control target key start
LH: loop header
LB: loop body
LE: loop exit
PB: predicated region body
PF: predicated region fallthrough
CT: control target
= control target key end

     0   :  { %12 = vsyncpa [#allocation3], 0  ;;  %s4807_s0 = inlined_call_operand.vmem [shape: bf16[2,12,256], index: 0, kind: input, shape index: {}]   ;;  %s4808_s1 = inlined_call_operand.vmem [shape: bf16[4,256,64], index: 1, kind: input, shape index: {}]   ;;  %s4809_s2 = inlined_call_operand.vmem [shape: f32[1,64], index: 2, kind: input, shape index: {}]   ;;  %s4810_s3 = inlined_call_operand.vmem [shape: bf16[6,64,512], index: 3, kind: input, shape index: {}]   ;;  %s4811_s4 = inlined_call_operand.vmem [shape: f32[1,512], index: 4, kind: input, shape index: {}]   ;;  %s4812_s5 = inlined_call_operand.vmem [shape: bf16[512,128], index: 5, kind: input, shape index: {}]   ;;  %s4813_s6 = inlined_call_operand.vmem [shape: f32[1,128], index: 6, kind: input, shape index: {}]   ;;  %s4814_s7 = inlined_call_operand.hbm [shape: f32[2,1,128], index: 7, kind: output, shape index: {}]  }
   0x1   :  { %14 = vsyncpa [#allocation3 + $0x1], 0  ;;  %s3728_s24 = smov 0   ;;  %s3730_s25 = smov 0  }
   0x2   :  { %s3732_s26 = smov 0   ;;  %s3734_s27 = smov 0  }
   0x3 LB: > { %s3749_s28 = sadd.s32 4294967295, %s3686_s27   ;;  %s2390_s29 = sadd.s32 4294967294, %s3686_s27   ;;  %s3686_s27 = sphi %s3734_s27, %s4820_s27   ;;  %s3682_s26 = sphi %s3732_s26, %s4819_s26   ;;  %s3678_s25 = sphi %s3730_s25, %s4818_s25   ;;  %s3674_s24 = sphi %s3728_s24, %s4817_s24  }
   0x4   : > { %s3753_s30 = sadd.s32 1, %s3686_s27   ;;  %s179_s8 = sadd.s32 1, %s3682_s26 }
   0x5   : > { %s176_s9 = ssub.s32 %s3686_s27, %s3753_s30  ;;  %p189_p0 = scmp.ne.s32.totalorder %s3682_s26, %s3678_s25 }
   0x6   : > { %p177_p1 = scmp.eq.s32.totalorder %s176_s9, 0  ;;  %p190_p2 = scmp.eq.s32.totalorder %s3749_s28, 1 }
   0x7   : > { %p195_p3 = scmp.ne.s32.totalorder %s3678_s25, %s3674_s24  ;;  %p196_p4 = scmp.eq.s32.totalorder %s2390_s29, 1 }
   0x8   : > { %s3764_s10 = scalar_select %p177_p1, %s3682_s26, %s179_s8  }
   0x9   : > { %p3766_p5 = por %p190_p2, %p189_p0  ;;  %p3770_p6 = por %p196_p4, %p195_p3 }
   0xa   : > { %p2393_p7 = scmp.ge.s32.totalorder %s3686_s27, 1  ;;  %p240_p8 = scmp.lt.s32.totalorder %s3686_s27, 3 }
   0xc   : > { %p241_p9 = pnand %p2393_p7, %p240_p8 }
   0xd   : > { %p271_p10 = scmp.lt.s32.totalorder (!%p241_p9), %s3749_s28, 1  ;;  %s269_s17 = sand.u32 (!%p241_p9), 1, %s3678_s25  }
   0xe   : > { %244 = sbr.rel (%p241_p9) target bundleno = 652 (0x28c), region = 48  ;;  %s2331_s20 = scalar_lea.hbm (!%p241_p9), %s4814_s7, %s3749_s28 }
   0xf   : > { %s2335_s22 = sshll.u32 (!%p241_p9), %s2331_s20, 4  ;;  %s2323_s23 = scalar_lea.sflag (!%p241_p9), [#allocation3], %s269_s17  ;;  %s2336_s22 = int_to_ptr.hbm [resolvable:$true] %s2335_s22 }
  0x10   : > { %s3644_s13 = scalar_lea.hbm (!%p241_p9), %s4814_s7, 2 }
  0x13   : > { %v3395_v0 = vld [vmem:[%s4808_s1 + $0xb8] sm:$0xff]  ;;  %v3394_v4 = vld [vmem:[%s4808_s1 + $0xb0] sm:$0xff]  ;;  %s272_s15 = scalar_select %p271_p10, %s3749_s28, 1  ;;  %v3393_v8 = vld [vmem:[%s4808_s1 + $0xa8] sm:$0xff]  ;;  %vm1095_vm4 = vcmask 523264  }
  0x14   : > { %v3403_v1 = vld [vmem:[%s4808_s1 + $0xf8] sm:$0xff]  ;;  %461 = vmatpush.bf16.msra.mxu0 %v3395_v0  ;;  %v3402_v5 = vld [vmem:[%s4808_s1 + $0xf0] sm:$0xff]  ;;  %v3401_v9 = vld [vmem:[%s4808_s1 + $0xe8] sm:$0xff] }
  0x15   : > { %v3379_v2 = vld [vmem:[%s4808_s1 + $0x38] sm:$0xff]  ;;  %474 = vmatpush.bf16.msra.mxu1 %v3403_v1  ;;  %v3378_v6 = vld [vmem:[%s4808_s1 + $0x30] sm:$0xff]  ;;  %v3377_v10 = vld [vmem:[%s4808_s1 + $0x28] sm:$0xff]  ;;  %s3371_s29 = sshll.u32 %s272_s15, 4 }
  0x16   : > { %v3387_v3 = vld [vmem:[%s4808_s1 + $0x78] sm:$0xff]  ;;  %585 = vmatpush.bf16.msra.mxu2 %v3379_v2  ;;  %v3386_v7 = vld [vmem:[%s4808_s1 + $0x70] sm:$0xff]  ;;  %v3385_v11 = vld [vmem:[%s4808_s1 + $0x68] sm:$0xff]  ;;  %s3823_s18 = scalar_lea.vmem %s4807_s0, %s3371_s29  ;;  %s3638_s29 = sshra.s32 %s2336_s22, 4  ;;  %s3639_s29 = int_to_ptr.hbm [resolvable:$true] %s3638_s29 }
  0x17   : > { %598 = vmatpush.bf16.msra.mxu3 %v3387_v3  ;;  %v3392_v12 = vld [vmem:[%s4808_s1 + $0xa0] sm:$0xff]  ;;  %v3391_v17 = vld [vmem:[%s4808_s1 + $0x98] sm:$0xff]  ;;  %v3390_v23 = vld [vmem:[%s4808_s1 + $0x90] sm:$0xff]  ;;  %s3640_s8 = scalar_lea.hbm %s3639_s29, 1  ;;  %p3645_p0 = scmp.lt.s32.totalorder %s3639_s29, %s4814_s7 }
  0x18   : > { %462 = vmatpush.bf16.msra.mxu0 %v3394_v4  ;;  %v3400_v13 = vld [vmem:[%s4808_s1 + $0xe0] sm:$0xff]  ;;  %v3399_v18 = vld [vmem:[%s4808_s1 + $0xd8] sm:$0xff]  ;;  %v3398_v24 = vld [vmem:[%s4808_s1 + $0xd0] sm:$0xff]  ;;  %p3641_p11 = scmp.ne.s32.totalorder %s3639_s29, %s3640_s8  ;;  %p3646_p1 = scmp.lt.s32.totalorder %s3644_s13, %s3640_s8 }
  0x19   : > { %475 = vmatpush.bf16.msra.mxu1 %v3402_v5  ;;  %v3376_v14 = vld [vmem:[%s4808_s1 + $0x20] sm:$0xff]  ;;  %v3375_v19 = vld [vmem:[%s4808_s1 + $0x18] sm:$0xff]  ;;  %v3374_v25 = vld [vmem:[%s4808_s1 + $0x10] sm:$0xff] }
  0x1a   : > { %586 = vmatpush.bf16.msra.mxu2 %v3378_v6  ;;  %v3384_v15 = vld [vmem:[%s4808_s1 + $0x60] sm:$0xff]  ;;  %v3383_v20 = vld [vmem:[%s4808_s1 + $0x58] sm:$0xff]  ;;  %v3382_v26 = vld [vmem:[%s4808_s1 + $0x50] sm:$0xff]  ;;  %p3642_p12 = pnand %p3641_p11, %p3766_p5  ;;  %p3647_p2 = por %p3646_p1, %p3645_p0 }
  0x1b   : > { %599 = vmatpush.bf16.msra.mxu3 %v3386_v7  ;;  %v277_v16 = vld [vmem:[%s3823_s18] sm:$0xff]  ;;  %v3389_v29 = vld [vmem:[%s4808_s1 + $0x88] sm:$0xff]  ;;  %v3411_v43 = vld [vmem:[%s4808_s1 + $0x138] sm:$0xff] }
  0x1c   : > { %463 = vmatpush.bf16.msra.mxu0 %v3393_v8  ;;  %v3844_v21 = vunpack.c.l.b16 %v277_v16  ;;  %v3846_v22 = vunpack.c.h.b16 %v277_v16  ;;  %v3397_v30 = vld [vmem:[%s4808_s1 + $0xc8] sm:$0xff]  ;;  %v3388_v35 = vld [vmem:[%s4808_s1 + $0x80] sm:$0xff]  ;;  %v3419_v44 = vld [vmem:[%s4808_s1 + $0x178] sm:$0xff]  ;;  %p3643_p13 = pneg %p3642_p12 }
  0x1d   : > { %476 = vmatpush.bf16.msra.mxu1 %v3401_v9  ;;  %v3373_v31 = vld [vmem:[%s4808_s1 + $0x8] sm:$0xff]  ;;  %v3396_v36 = vld [vmem:[%s4808_s1 + $0xc0] sm:$0xff]  ;;  %v3427_v45 = vld [vmem:[%s4808_s1 + $0x1b8] sm:$0xff] }
  0x1e   : > { %587 = vmatpush.bf16.msra.mxu2 %v3377_v10  ;;  %v347_v27 = vpack.c.b16 %v3844_v21, %v3844_v21  ;;  %v348_v28 = vpack.c.b16 %v3846_v22, %v3846_v22  ;;  %v3381_v32 = vld [vmem:[%s4808_s1 + $0x48] sm:$0xff]  ;;  %v3372_v37 = vld [vmem:[%s4808_s1] sm:$0xff]  ;;  %v3435_v46 = vld [vmem:[%s4808_s1 + $0x1f8] sm:$0xff]  ;;  %p3648_p3 = pnand %p3647_p2, %p3643_p13 }
  0x1f   : > { %600 = vmatpush.bf16.msra.mxu3 %v3385_v11  ;;  %v3380_v38 = vld [vmem:[%s4808_s1 + $0x40] sm:$0xff]  ;;  %v3410_v49 = vld [vmem:[%s4808_s1 + $0x130] sm:$0xff]  ;;  %v3409_v53 = vld [vmem:[%s4808_s1 + $0x128] sm:$0xff] }
  0x20   : > { %464 = vmatpush.bf16.msra.mxu0 %v3392_v12  ;;  %v352_v33 = vshll.u32 %v347_v27, 16  ;;  %v359_v34 = vshll.u32 %v348_v28, 16  ;;  %v350_v39 = vshrl.u32 %v347_v27, 16  ;;  %v357_v41 = vshrl.u32 %v348_v28, 16  ;;  %v3418_v50 = vld [vmem:[%s4808_s1 + $0x170] sm:$0xff]  ;;  %v3417_v54 = vld [vmem:[%s4808_s1 + $0x168] sm:$0xff] }
  0x21   : > { %477 = vmatpush.bf16.msra.mxu1 %v3400_v13  ;;  %v3426_v51 = vld [vmem:[%s4808_s1 + $0x1b0] sm:$0xff]  ;;  %v3425_v55 = vld [vmem:[%s4808_s1 + $0x1a8] sm:$0xff]  ;;  %v3408_v58 = vld [vmem:[%s4808_s1 + $0x120] sm:$0xff] }
  0x22   : > { %588 = vmatpush.bf16.msra.mxu2 %v3376_v14  ;;  %v354_v40 = vrot.slane %v352_v33, 1  ;;  %v361_v42 = vrot.slane %v359_v34, 1  ;;  %v3434_v52 = vld [vmem:[%s4808_s1 + $0x1f0] sm:$0xff]  ;;  %v3433_v56 = vld [vmem:[%s4808_s1 + $0x1e8] sm:$0xff]  ;;  %v3416_v59 = vld [vmem:[%s4808_s1 + $0x160] sm:$0xff] }
  0x23   : > { %601 = vmatpush.bf16.msra.mxu3 %v3384_v15  ;;  %v278_v57 = vld [vmem:[%s3823_s18 + $0x8] sm:$0x33]  ;;  %v3424_v60 = vld [vmem:[%s4808_s1 + $0x1a0] sm:$0xff]  ;;  %v3407_v0 = vld [vmem:[%s4808_s1 + $0x118] sm:$0xff]  ;;  %s270_s18 = scalar_lea.vmem [#allocation2], %s269_s17 }
  0x24   : > { %465 = vmatpush.bf16.msra.mxu0 %v3391_v17  ;;  %v355_v47 = vor.u32 %v354_v40, %v350_v39  ;;  %v362_v48 = vor.u32 %v361_v42, %v357_v41  ;;  %v3432_v61 = vld [vmem:[%s4808_s1 + $0x1e0] sm:$0xff]  ;;  %v645_v62 = vunpack.c.l.b16 %v278_v57  ;;  %v646_v63 = vunpack.c.h.b16 %v278_v57  ;;  %v3415_v1 = vld [vmem:[%s4808_s1 + $0x158] sm:$0xff]  ;;  %v3406_v6 = vld [vmem:[%s4808_s1 + $0x110] sm:$0xff]  ;;  %s2333_s21 = sshll.u32 %s270_s18, 4  ;;  %s2334_s21 = int_to_ptr.vmem [resolvable:$true] %s2333_s21 }
  0x25   : > { %478 = vmatpush.bf16.msra.mxu1 %v3399_v18  ;;  %v3423_v2 = vld [vmem:[%s4808_s1 + $0x198] sm:$0xff]  ;;  %v3414_v7 = vld [vmem:[%s4808_s1 + $0x150] sm:$0xff]  ;;  %v3405_v14 = vld [vmem:[%s4808_s1 + $0x108] sm:$0xff] }
  0x26   : > { %589 = vmatpush.bf16.msra.mxu2 %v3375_v19  ;;  %v3431_v3 = vld [vmem:[%s4808_s1 + $0x1d8] sm:$0xff]  ;;  %v647_v4 = vpack.c.b16 %v645_v62, %v3844_v21  ;;  %v648_v5 = vpack.c.b16 %v646_v63, %v3846_v22  ;;  %v3422_v8 = vld [vmem:[%s4808_s1 + $0x190] sm:$0xff]  ;;  %v3413_v15 = vld [vmem:[%s4808_s1 + $0x148] sm:$0xff] }
  0x27   : > { %602 = vmatpush.bf16.msra.mxu3 %v3383_v20  ;;  %v3430_v9 = vld [vmem:[%s4808_s1 + $0x1d0] sm:$0xff]  ;;  %v3421_v16 = vld [vmem:[%s4808_s1 + $0x188] sm:$0xff]  ;;  %v3404_v22 = vld [vmem:[%s4808_s1 + $0x100] sm:$0xff] }
  0x28   : > { %466 = vmatpush.bf16.msra.mxu0 %v3390_v23  ;;  %v650_v10 = vshrl.u32 %v647_v4, 16  ;;  %v653_v11 = vshll.u32 %v647_v4, 16  ;;  %v658_v12 = vshrl.u32 %v648_v5, 16  ;;  %v661_v13 = vshll.u32 %v648_v5, 16  ;;  %v3429_v17 = vld [vmem:[%s4808_s1 + $0x1c8] sm:$0xff]  ;;  %v3412_v23 = vld [vmem:[%s4808_s1 + $0x140] sm:$0xff] }
  0x29   : > { %479 = vmatpush.bf16.msra.mxu1 %v3398_v24  ;;  %v3420_v24 = vld [vmem:[%s4808_s1 + $0x180] sm:$0xff]  ;;  %v2823_v42 = vld [vmem:[%s4810_s3 + $0xe8] sm:$0xf]  ;;  %v3463_v57 = vld [vmem:[%s4810_s3 + $0xd4] sm:$0xf0] }
  0x2a   : > { %590 = vmatpush.bf16.msra.mxu2 %v3374_v25  ;;  %v652_v18 = vrot.slane %v650_v10, 1  ;;  %v655_v19 = vrot.slane %v653_v11, 2  ;;  %v660_v20 = vrot.slane %v658_v12, 1  ;;  %v663_v21 = vrot.slane %v661_v13, 2  ;;  %v3428_v25 = vld [vmem:[%s4808_s1 + $0x1c0] sm:$0xff] }
  0x2b   : > { %603 = vmatpush.bf16.msra.mxu3 %v3382_v26  ;;  %v2809_v62 = vld [vmem:[%s4810_s3 + $0xd8] sm:$0xf0]  ;;  %v2799_v63 = vld [vmem:[%s4810_s3 + $0xc0] sm:$0xf]  ;;  %v2791_v12 = vld [vmem:[%s4810_s3 + $0xa8] sm:$0xf] }
  0x2c   : > { %467 = vmatpush.bf16.msra.mxu0 %v3389_v29  ;;  %v656_v26 = vor.u32 %v655_v19, %v652_v18  ;;  %v824_v29 = vrot.slane %v648_v5, 2  ;;  %v3459_v13 = vld [vmem:[%s4810_s3 + $0xb4] sm:$0xf0]  ;;  %v3458_v18 = vld [vmem:[%s4810_s3 + $0xac] sm:$0xf0] }
  0x2d   : > { %480 = vmatpush.bf16.msra.mxu1 %v3397_v30 }
  0x2e   : > { %591 = vmatpush.bf16.msra.mxu2 %v3373_v31 }
  0x2f   : > { %604 = vmatpush.bf16.msra.mxu3 %v3381_v32 }
  0x30   : > { %468 = vmatpush.bf16.msra.mxu0 %v3388_v35 }
  0x31   : > { %481 = vmatpush.bf16.msra.mxu1 %v3396_v36 }
  0x32   : > { %592 = vmatpush.bf16.msra.mxu2 %v3372_v37 }
  0x33   : > { %605 = vmatpush.bf16.msra.mxu3 %v3380_v38  ;;  %469 = vmatmul.bf16.vlgmr.msra.gmra.mxu0 %v355_v47  ;;  %v2815_v47 = vld [vmem:[%s4810_s3 + $0xe0] sm:$0xf] }
  0x34   : > { %763 = vmatpush.bf16.msrb.mxu0 %v3411_v43  ;;  %482 = vmatmul.bf16.vlgmr.msra.gmra.mxu1 %v362_v48  ;;  %v3467_v43 = vld [vmem:[%s4810_s3 + $0xf4] sm:$0xf0]  ;;  %v3466_v48 = vld [vmem:[%s4810_s3 + $0xec] sm:$0xf0] }
  0x35   : > { %776 = vmatpush.bf16.msrb.mxu1 %v3419_v44  ;;  %593 = vmatmul.bf16.vlgmr.msra.gmra.mxu2 %v347_v27  ;;  %v664_v27 = vor.u32 %v663_v21, %v660_v20  ;;  %v3465_v44 = vld [vmem:[%s4810_s3 + $0xec] sm:$0xf] }
  0x36   : > { %923 = vmatpush.bf16.msrb.mxu2 %v3427_v45  ;;  %606 = vmatmul.bf16.vlgmr.msra.gmra.mxu3 %v348_v28  ;;  %v823_v28 = vrot.slane %v647_v4, 2  ;;  %v2824_v45 = vor.u32 %v3467_v43, %v2823_v42  ;;  %v3449_v42 = vld [vmem:[%s4810_s3 + $0x6c] sm:$0xf] }
  0x37   : > { %936 = vmatpush.bf16.msrb.mxu3 %v3435_v46  ;;  %v2825_v46 = vld [vmem:[%s4810_s3 + $0xf8] sm:$0xf0] }
  0x38   : > { %764 = vmatpush.bf16.msrb.mxu0 %v3410_v49 }
  0x39   : > { %777 = vmatpush.bf16.msrb.mxu1 %v3418_v50  ;;  %v2828_v50 = vor.u32 %v3465_v44, %v2825_v46  ;;  %v2893_v44 = vld [vmem:[%s4810_s3 + $0x78] sm:$0xf0]  ;;  %v3450_v46 = vld [vmem:[%s4810_s3 + $0x6c] sm:$0xf0] }
  0x3a   : > { %924 = vmatpush.bf16.msrb.mxu2 %v3426_v51  ;;  %v2816_v51 = vor.u32 %v3466_v48, %v2815_v47  ;;  %v2896_v47 = vor.u32 %v3449_v42, %v2893_v44  ;;  %v3481_v42 = vld [vmem:[%s4810_s3 + $0x16c] sm:$0xf] }
  0x3b   : > { %937 = vmatpush.bf16.msrb.mxu3 %v3434_v52  ;;  %v3464_v52 = vld [vmem:[%s4810_s3 + $0xe4] sm:$0xf] }
  0x3c   : > { %765 = vmatpush.bf16.msrb.mxu0 %v3409_v53  ;;  %v2817_v53 = vld [vmem:[%s4810_s3 + $0xf0] sm:$0xf0] }
  0x3d   : > { %778 = vmatpush.bf16.msrb.mxu1 %v3417_v54  ;;  %v2820_v54 = vor.u32 %v3464_v52, %v2817_v53 }
  0x3e   : > { %925 = vmatpush.bf16.msrb.mxu2 %v3425_v55 }
  0x3f   : > { %938 = vmatpush.bf16.msrb.mxu3 %v3433_v56  ;;  %v2807_v56 = vld [vmem:[%s4810_s3 + $0xc8] sm:$0xf] }
  0x40   : > { %766 = vmatpush.bf16.msrb.mxu0 %v3408_v58  ;;  %v3461_v58 = vld [vmem:[%s4810_s3 + $0xcc] sm:$0xf] }
  0x41   : > { %779 = vmatpush.bf16.msrb.mxu1 %v3416_v59 }
  0x42   : > { %926 = vmatpush.bf16.msrb.mxu2 %v3424_v60 }
  0x43   : > { %939 = vmatpush.bf16.msrb.mxu3 %v3432_v61  ;;  %v2808_v61 = vor.u32 %v3463_v57, %v2807_v56  ;;  %v2877_v56 = vld [vmem:[%s4810_s3 + $0x58] sm:$0xf0] }
  0x44   : > { %767 = vmatpush.bf16.msrb.mxu0 %v3407_v0  ;;  %v3462_v0 = vld [vmem:[%s4810_s3 + $0xcc] sm:$0xf0] }
  0x45   : > { %780 = vmatpush.bf16.msrb.mxu1 %v3415_v1 }
  0x46   : > { %927 = vmatpush.bf16.msrb.mxu2 %v3423_v2 }
  0x47   : > { %940 = vmatpush.bf16.msrb.mxu3 %v3431_v3  ;;  %v3603_v3 = vld [vmem:[%s4809_s2] ss:$0 sm:$0xff] }
  0x48   : > { %768 = vmatpush.bf16.msrb.mxu0 %v3406_v6  ;;  %v2812_v6 = vor.u32 %v3461_v58, %v2809_v62 }
  0x49   : > { %781 = vmatpush.bf16.msrb.mxu1 %v3414_v7  ;;  %v2800_v7 = vor.u32 %v3462_v0, %v2799_v63  ;;  %v3444_v63 = vld [vmem:[%s4810_s3 + $0x44] sm:$0xf]  ;;  %v2869_v0 = vld [vmem:[%s4810_s3 + $0x50] sm:$0xf0] }
  0x4a   : > { %928 = vmatpush.bf16.msrb.mxu2 %v3422_v8  ;;  %v3460_v8 = vld [vmem:[%s4810_s3 + $0xc4] sm:$0xf] }
  0x4b   : > { %941 = vmatpush.bf16.msrb.mxu3 %v3430_v9  ;;  %v2801_v9 = vld [vmem:[%s4810_s3 + $0xd0] sm:$0xf0] }
  0x4c   : > { %769 = vmatpush.bf16.msrb.mxu0 %v3405_v14  ;;  %v2804_v10 = vor.u32 %v3460_v8, %v2801_v9  ;;  %v3457_v14 = vld [vmem:[%s4810_s3 + $0xac] sm:$0xf]  ;;  %v3442_v9 = vld [vmem:[%s4810_s3 + $0x2c] sm:$0xf0] }
  0x4d   : > { %782 = vmatpush.bf16.msrb.mxu1 %v3413_v15  ;;  %v2792_v15 = vor.u32 %v3459_v13, %v2791_v12  ;;  %v2853_v12 = vld [vmem:[%s4810_s3 + $0x30] sm:$0xf0]  ;;  %v2843_v13 = vld [vmem:[%s4810_s3 + $0x8] sm:$0xf] }
  0x4e   : > { %929 = vmatpush.bf16.msrb.mxu2 %v3421_v16  ;;  %v2793_v16 = vld [vmem:[%s4810_s3 + $0xb8] sm:$0xf0] }
  0x4f   : > { %942 = vmatpush.bf16.msrb.mxu3 %v3429_v17  ;;  %v2783_v17 = vld [vmem:[%s4810_s3 + $0xa0] sm:$0xf]  ;;  %v2796_v20 = vor.u32 %v3457_v14, %v2793_v16  ;;  %v3439_v14 = vld [vmem:[%s4810_s3 + $0x14] sm:$0xf0]  ;;  %v3437_v16 = vld [vmem:[%s4810_s3 + $0xc] sm:$0xf] }
  0x50   : > { %770 = vmatpush.bf16.msrb.mxu0 %v3404_v22  ;;  %v2784_v21 = vor.u32 %v3458_v18, %v2783_v17  ;;  %v3456_v22 = vld [vmem:[%s4810_s3 + $0xa4] sm:$0xf]  ;;  %v2845_v17 = vld [vmem:[%s4810_s3 + $0x18] sm:$0xf0]  ;;  %v2835_v18 = vld [vmem:[%s4810_s3] sm:$0xf] }
  0x51   : > { %783 = vmatpush.bf16.msrb.mxu1 %v3412_v23  ;;  %v2785_v23 = vld [vmem:[%s4810_s3 + $0xb0] sm:$0xf0] }
  0x52   : > { %930 = vmatpush.bf16.msrb.mxu2 %v3420_v24  ;;  %v2788_v24 = vor.u32 %v3456_v22, %v2785_v23  ;;  %v3436_v22 = vld [vmem:[%s4810_s3 + $0x4] sm:$0xf]  ;;  %v2837_v23 = vld [vmem:[%s4810_s3 + $0x10] sm:$0xf0] }
  0x53   : > { %943 = vmatpush.bf16.msrb.mxu3 %v3428_v25  ;;  %771 = vmatmul.bf16.vlgmr.msrb.gmra.mxu0 %v656_v26  ;;  %v2775_v26 = vld [vmem:[%s4810_s3 + $0x88] sm:$0xf] }
  0x54   : > { %784 = vmatmul.bf16.vlgmr.msrb.gmra.mxu1 %v664_v27  ;;  %1103 = vmatpush.bf16.msra.mxu0 %v2816_v51  ;;  %v3455_v27 = vld [vmem:[%s4810_s3 + $0x94] sm:$0xf0]  ;;  %v2875_v51 = vld [vmem:[%s4810_s3 + $0x48] sm:$0xf] }
  0x55   : > { %931 = vmatmul.bf16.vlgmr.msrb.gmra.mxu2 %v823_v28  ;;  %1116 = vmatpush.bf16.msra.mxu1 %v2820_v54  ;;  %v3447_v54 = vld [vmem:[%s4810_s3 + $0x54] sm:$0xf0] }
  0x56   : > { %944 = vmatmul.bf16.vlgmr.msrb.gmra.mxu3 %v824_v29  ;;  %1129 = vmatpush.bf16.msra.mxu2 %v2824_v45  ;;  %v2883_v45 = vld [vmem:[%s4810_s3 + $0x60] sm:$0xf]  ;;  %v2876_v58 = vor.u32 %v3447_v54, %v2875_v51  ;;  %v2959_v51 = vld [vmem:[%s4810_s3 + $0x148] sm:$0xf] }
  0x57   : > { %1142 = vmatpush.bf16.msra.mxu3 %v2828_v50  ;;  %v2884_v48 = vor.u32 %v3450_v46, %v2883_v45  ;;  %v2885_v50 = vld [vmem:[%s4810_s3 + $0x70] sm:$0xf0]  ;;  %v3482_v45 = vld [vmem:[%s4810_s3 + $0x16c] sm:$0xf0]  ;;  %v3480_v46 = vld [vmem:[%s4810_s3 + $0x164] sm:$0xf] }
  0x58   : > { %1104 = vmatpush.bf16.msra.mxu0 %v2800_v7  ;;  %v2851_v7 = vld [vmem:[%s4810_s3 + $0x20] sm:$0xf] }
  0x59   : > { %1117 = vmatpush.bf16.msra.mxu1 %v2804_v10  ;;  %v3440_v10 = vld [vmem:[%s4810_s3 + $0x24] sm:$0xf] }
  0x5a   : > { %1130 = vmatpush.bf16.msra.mxu2 %v2808_v61  ;;  %v3446_v61 = vld [vmem:[%s4810_s3 + $0x4c] sm:$0xf0] }
  0x5b   : > { %1143 = vmatpush.bf16.msra.mxu3 %v2812_v6  ;;  %v2861_v6 = vld [vmem:[%s4810_s3 + $0x38] sm:$0xf0] }
  0x5c   : > { %1105 = vmatpush.bf16.msra.mxu0 %v2784_v21  ;;  %v3438_v21 = vld [vmem:[%s4810_s3 + $0xc] sm:$0xf0] }
  0x5d   : > { %1118 = vmatpush.bf16.msra.mxu1 %v2788_v24 }
  0x5e   : > { %1131 = vmatpush.bf16.msra.mxu2 %v2792_v15  ;;  %v2856_v15 = vor.u32 %v3440_v10, %v2853_v12  ;;  %v3471_v12 = vld [vmem:[%s4810_s3 + $0x114] sm:$0xf0] }
  0x5f   : > { %1144 = vmatpush.bf16.msra.mxu3 %v2796_v20  ;;  %v2844_v20 = vor.u32 %v3439_v14, %v2843_v13 }
  0xb0   : > { %v470_v30 = vpop.f32.mrf.mxu0 }
  0xb1   : > { %v483_v31 = vpop.f32.mrf.mxu1 }
  0xb2   : > { %v484_v38 = vadd.f32 %v483_v31, %v470_v30  ;;  %v2776_v30 = vor.u32 %v3455_v27, %v2775_v26  ;;  %v3453_v31 = vld [vmem:[%s4810_s3 + $0x8c] sm:$0xf]  ;;  %v2836_v26 = vor.u32 %v3438_v21, %v2835_v18  ;;  %v3470_v18 = vld [vmem:[%s4810_s3 + $0x10c] sm:$0xf0]  ;;  %v2921_v21 = vld [vmem:[%s4810_s3 + $0x110] sm:$0xf0] }
  0xb4   : > { %1132 = vmatpush.bf16.msra.mxu2 %v2776_v30 }
  0xb8   : > { %v594_v32 = vpop.f32.mrf.mxu2  ;;  %v472_v34 = vpop.f32.mrf.mxu0 }
  0xb9   : > { %v607_v33 = vpop.f32.mrf.mxu3  ;;  %v485_v35 = vpop.f32.mrf.mxu1  ;;  %v595_v41 = vadd.f32 %v594_v32, %v484_v38  ;;  %v2777_v32 = vld [vmem:[%s4810_s3 + $0x98] sm:$0xf0] }
  0xba   : > { %v2780_v34 = vor.u32 %v3453_v31, %v2777_v32  ;;  %v3454_v35 = vld [vmem:[%s4810_s3 + $0x8c] sm:$0xf0] }
  0xbb   : > { %v608_v55 = vadd.f32 %v607_v33, %v595_v41  ;;  %v2767_v33 = vld [vmem:[%s4810_s3 + $0x80] sm:$0xf]  ;;  %v3451_v41 = vld [vmem:[%s4810_s3 + $0x74] sm:$0xf0] }
  0xbc   : > { %v2768_v38 = vor.u32 %v3454_v35, %v2767_v33  ;;  %1145 = vmatpush.bf16.msra.mxu3 %v2780_v34 }
  0xbe   : > { %1106 = vmatpush.bf16.msra.mxu0 %v2768_v38 }
  0xc0   : > { %v596_v36 = vpop.f32.mrf.mxu2  ;;  %1277 = vmatpush.bf16.msrb.mxu3 %v2896_v47  ;;  %v2969_v47 = vld [vmem:[%s4810_s3 + $0x170] sm:$0xf0] }
  0xc1   : > { %v609_v37 = vpop.f32.mrf.mxu3  ;;  %v3452_v36 = vld [vmem:[%s4810_s3 + $0x84] sm:$0xf]  ;;  %v2972_v54 = vor.u32 %v3480_v46, %v2969_v47  ;;  %v3037_v46 = vld [vmem:[%s4810_s3 + $0x1d0] sm:$0xf0] }
  0xc2   : > { %v2769_v37 = vld [vmem:[%s4810_s3 + $0x90] sm:$0xf0]  ;;  %1238 = vmatpush.bf16.msrb.mxu0 %v2884_v48 }
  0xd0   : > { %v772_v39 = vpop.f32.mrf.mxu0 }
  0xd1   : > { %v785_v40 = vpop.f32.mrf.mxu1 }
  0xd2   : > { %v786_v49 = vadd.f32 %v785_v40, %v772_v39  ;;  %v2772_v39 = vor.u32 %v3452_v36, %v2769_v37  ;;  %v2891_v40 = vld [vmem:[%s4810_s3 + $0x68] sm:$0xf] }
  0xd3   : > { %v2892_v43 = vor.u32 %v3451_v41, %v2891_v40  ;;  %v2975_v40 = vld [vmem:[%s4810_s3 + $0x168] sm:$0xf]  ;;  %v3483_v41 = vld [vmem:[%s4810_s3 + $0x174] sm:$0xf0] }
  0xd4   : > { %v789_v1 = vadd.f32 %v786_v49, %v608_v55  ;;  %1119 = vmatpush.bf16.msra.mxu1 %v2772_v39  ;;  %v3448_v49 = vld [vmem:[%s4810_s3 + $0x64] sm:$0xf]  ;;  %v3445_v55 = vld [vmem:[%s4810_s3 + $0x4c] sm:$0xf] }
  0xd5   : > { %1264 = vmatpush.bf16.msrb.mxu2 %v2892_v43  ;;  %v2888_v53 = vor.u32 %v3448_v49, %v2885_v50  ;;  %v2967_v43 = vld [vmem:[%s4810_s3 + $0x160] sm:$0xf]  ;;  %v2976_v49 = vor.u32 %v3483_v41, %v2975_v40  ;;  %v3493_v41 = vld [vmem:[%s4810_s3 + $0x1cc] sm:$0xf] }
  0xd8   : > { %v932_v59 = vpop.f32.mrf.mxu2  ;;  %v774_v4 = vpop.f32.mrf.mxu0  ;;  %1251 = vmatpush.bf16.msrb.mxu1 %v2888_v53  ;;  %v2968_v53 = vor.u32 %v3482_v45, %v2967_v43  ;;  %v3494_v43 = vld [vmem:[%s4810_s3 + $0x1cc] sm:$0xf0]  ;;  %v3492_v45 = vld [vmem:[%s4810_s3 + $0x1c4] sm:$0xf] }
  0xd9   : > { %v945_v60 = vpop.f32.mrf.mxu3  ;;  %v787_v5 = vpop.f32.mrf.mxu1  ;;  %1265 = vmatpush.bf16.msrb.mxu2 %v2876_v58  ;;  %v3478_v58 = vld [vmem:[%s4810_s3 + $0x14c] sm:$0xf0] }
  0xda   : > { %v946_v2 = vadd.f32 %v945_v60, %v932_v59  ;;  %v2880_v59 = vor.u32 %v3445_v55, %v2877_v56  ;;  %v2867_v60 = vld [vmem:[%s4810_s3 + $0x40] sm:$0xf]  ;;  %v3441_v5 = vld [vmem:[%s4810_s3 + $0x2c] sm:$0xf]  ;;  %v2961_v56 = vld [vmem:[%s4810_s3 + $0x158] sm:$0xf0] }
  0xdb   : > { %v2868_v62 = vor.u32 %v3446_v61, %v2867_v60  ;;  %v2864_v8 = vor.u32 %v3441_v5, %v2861_v6  ;;  %v3477_v55 = vld [vmem:[%s4810_s3 + $0x14c] sm:$0xf]  ;;  %v2953_v60 = vld [vmem:[%s4810_s3 + $0x150] sm:$0xf0]  ;;  %v2935_v5 = vld [vmem:[%s4810_s3 + $0x120] sm:$0xf] }
  0xdc   : > { %v949_v11 = vadd.f32 %v946_v2, %v789_v1  ;;  %v2859_v1 = vld [vmem:[%s4810_s3 + $0x28] sm:$0xf]  ;;  %v3443_v2 = vld [vmem:[%s4810_s3 + $0x34] sm:$0xf0]  ;;  %1278 = vmatpush.bf16.msrb.mxu3 %v2880_v59  ;;  %v3476_v59 = vld [vmem:[%s4810_s3 + $0x144] sm:$0xf] }
  0xdd   : > { %v2860_v4 = vor.u32 %v3443_v2, %v2859_v1  ;;  %1239 = vmatpush.bf16.msrb.mxu0 %v2868_v62  ;;  %v2964_v62 = vor.u32 %v3477_v55, %v2961_v56  ;;  %v2956_v2 = vor.u32 %v3476_v59, %v2953_v60  ;;  %v3474_v6 = vld [vmem:[%s4810_s3 + $0x12c] sm:$0xf0]  ;;  %v3019_v55 = vld [vmem:[%s4810_s3 + $0x1a0] sm:$0xf] }
  0xde   : > { %v4056_v19 = vadd.f32 %v3603_v3, %v949_v11  ;;  %v2872_v3 = vor.u32 %v3444_v63, %v2869_v0  ;;  %v2852_v11 = vor.u32 %v3442_v9, %v2851_v7  ;;  %v2943_v63 = vld [vmem:[%s4810_s3 + $0x128] sm:$0xf]  ;;  %v3475_v0 = vld [vmem:[%s4810_s3 + $0x134] sm:$0xf0]  ;;  %v3472_v7 = vld [vmem:[%s4810_s3 + $0x124] sm:$0xf]  ;;  %v2936_v13 = vor.u32 %v3474_v6, %v2935_v5 }
  0xdf   : > { %1266 = vmatpush.bf16.msrb.mxu2 %v2860_v4  ;;  %v2945_v4 = vld [vmem:[%s4810_s3 + $0x138] sm:$0xf0]  ;;  %v2944_v9 = vor.u32 %v3475_v0, %v2943_v63  ;;  %v3490_v56 = vld [vmem:[%s4810_s3 + $0x1ac] sm:$0xf0]  ;;  %v3484_v5 = vld [vmem:[%s4810_s3 + $0x184] sm:$0xf] }
  0xe0   : > { %v2748_v25 = vmul.f32 -1.442695, %v4056_v19  ;;  %v934_v28 = vpop.f32.mrf.mxu2  ;;  %1252 = vmatpush.bf16.msrb.mxu1 %v2872_v3  ;;  %1279 = vmatpush.bf16.msrb.mxu3 %v2864_v8  ;;  %v3473_v3 = vld [vmem:[%s4810_s3 + $0x12c] sm:$0xf]  ;;  %v2937_v8 = vld [vmem:[%s4810_s3 + $0x130] sm:$0xf0]  ;;  %v3020_v63 = vor.u32 %v3490_v56, %v3019_v55 }
  0xe1   : > { %v947_v29 = vpop.f32.mrf.mxu3  ;;  %1240 = vmatpush.bf16.msrb.mxu0 %v2852_v11  ;;  %v2840_v28 = vor.u32 %v3436_v22, %v2837_v23  ;;  %v2948_v10 = vor.u32 %v3473_v3, %v2945_v4  ;;  %v2927_v11 = vld [vmem:[%s4810_s3 + $0x108] sm:$0xf]  ;;  %v2940_v14 = vor.u32 %v3472_v7, %v2937_v8  ;;  %v3003_v3 = vld [vmem:[%s4810_s3 + $0x180] sm:$0xf]  ;;  %v3486_v4 = vld [vmem:[%s4810_s3 + $0x18c] sm:$0xf0] }
  0xe2   : > { %3604 = vpow2.f32 %v2748_v25  ;;  %v2848_v25 = vor.u32 %v3437_v16, %v2845_v17  ;;  %v2929_v16 = vld [vmem:[%s4810_s3 + $0x118] sm:$0xf0]  ;;  %v2919_v17 = vld [vmem:[%s4810_s3 + $0x100] sm:$0xf]  ;;  %v2928_v22 = vor.u32 %v3471_v12, %v2927_v11  ;;  %v3005_v6 = vld [vmem:[%s4810_s3 + $0x190] sm:$0xf0]  ;;  %v3004_v11 = vor.u32 %v3486_v4, %v3003_v3 }
  0xe3   : > { %1267 = vmatpush.bf16.msrb.mxu2 %v2844_v20  ;;  %v3468_v20 = vld [vmem:[%s4810_s3 + $0x104] sm:$0xf]  ;;  %v3008_v12 = vor.u32 %v3484_v5, %v3005_v6  ;;  %v3502_v55 = vld [vmem:[%s4810_s3 + $0x20c] sm:$0xf0]  ;;  %v3221_v5 = vld [vmem:[%s4810_s3 + $0x2f0] sm:$0xf0] }
  0xe4   : > { %1253 = vmatpush.bf16.msrb.mxu1 %v2856_v15  ;;  %1280 = vmatpush.bf16.msrb.mxu3 %v2848_v25  ;;  %v3469_v15 = vld [vmem:[%s4810_s3 + $0x10c] sm:$0xf]  ;;  %v3499_v25 = vld [vmem:[%s4810_s3 + $0x1f4] sm:$0xf0]  ;;  %v3500_v56 = vld [vmem:[%s4810_s3 + $0x204] sm:$0xf] }
  0xe5   : > { %1241 = vmatpush.bf16.msrb.mxu0 %v2836_v26  ;;  %v2932_v23 = vor.u32 %v3469_v15, %v2929_v16  ;;  %v2920_v26 = vor.u32 %v3470_v18, %v2919_v17  ;;  %v3135_v15 = vld [vmem:[%s4810_s3 + $0x260] sm:$0xf]  ;;  %v3514_v16 = vld [vmem:[%s4810_s3 + $0x26c] sm:$0xf0]  ;;  %v3512_v17 = vld [vmem:[%s4810_s3 + $0x264] sm:$0xf] }
  0xe6   : > { %v3137_v18 = vld [vmem:[%s4810_s3 + $0x270] sm:$0xf0]  ;;  %v3530_v3 = vld [vmem:[%s4810_s3 + $0x2ec] sm:$0xf0]  ;;  %v3528_v4 = vld [vmem:[%s4810_s3 + $0x2e4] sm:$0xf] }
  0xe8   : > { %v3605_v52 = vpop.eup %3604  ;;  %1254 = vmatpush.bf16.msrb.mxu1 %v2840_v28  ;;  %v3497_v28 = vld [vmem:[%s4810_s3 + $0x1ec] sm:$0xf] }
  0xe9   : > { %v958_v57 = vadd.f32 1.0, %v3605_v52  ;;  %v3479_v52 = vld [vmem:[%s4810_s3 + $0x154] sm:$0xf0] }
  0xea   : > { %v2960_v61 = vor.u32 %v3479_v52, %v2959_v51  ;;  %v3491_v51 = vld [vmem:[%s4810_s3 + $0x1b4] sm:$0xf0] }
  0xeb   : > { %3606 = vrcp.f32 %v958_v57  ;;  %v970_v30 = vand.u32 2147483648, %v958_v57  ;;  %v968_v32 = vand.u32 2147483647, %v958_v57  ;;  %vm964_vm1 = vweird.f32 %v958_v57 }
  0xed   : > { %v971_v34 = vor.u32 1.1754944e-38, %v970_v30  ;;  %vm969_vm3 = vcmp.eq.f32.partialorder %v968_v32, 8.507059e+37  ;;  %v3051_v30 = vld [vmem:[%s4810_s3 + $0x1e0] sm:$0xf]  ;;  %v3496_v32 = vld [vmem:[%s4810_s3 + $0x1e4] sm:$0xf] }
  0xf1   : > { %v3607_v24 = vpop.eup %3606 }
  0xf2   : > { %v960_v27 = vmul.f32 %v3607_v24, %v958_v57  ;;  %vm965_vm0 = vweird.f32 %v3607_v24  ;;  %v2951_v57 = vld [vmem:[%s4810_s3 + $0x140] sm:$0xf] }
  0xf3   : > { %vm966_vm2 = vmor %vm964_vm1, %vm965_vm0  ;;  %v2952_v1 = vor.u32 %v3478_v58, %v2951_v57  ;;  %v3488_v57 = vld [vmem:[%s4810_s3 + $0x1a4] sm:$0xf]  ;;  %v3021_v58 = vld [vmem:[%s4810_s3 + $0x1b0] sm:$0xf0] }
  0xf4   : > { %v961_v29 = vsub.f32 1.0, %v960_v27  ;;  %v2924_v27 = vor.u32 %v3468_v20, %v2921_v21  ;;  %v3024_v0 = vor.u32 %v3488_v57, %v3021_v58  ;;  %v3089_v57 = vld [vmem:[%s4810_s3 + $0x210] sm:$0xf0] }
  0xf6   : > { %v962_v31 = vmul.f32 %v3607_v24, %v961_v29  ;;  %v3061_v29 = vld [vmem:[%s4810_s3 + $0x1f8] sm:$0xf0] }
  0xf8   : > { %v963_v33 = vadd.f32 %v3607_v24, %v962_v31  ;;  %v3498_v31 = vld [vmem:[%s4810_s3 + $0x1ec] sm:$0xf0] }
  0xfa   : > { %v967_v35 = vsel %vm966_vm2, %v3607_v24, %v963_v33  ;;  %v3059_v24 = vld [vmem:[%s4810_s3 + $0x1e8] sm:$0xf]  ;;  %v3053_v33 = vld [vmem:[%s4810_s3 + $0x1f0] sm:$0xf0] }
  0xfb   : > { %v972_v36 = vsel %vm969_vm3, %v971_v34, %v967_v35  ;;  %v3060_v34 = vor.u32 %v3499_v25, %v3059_v24  ;;  %v3064_v35 = vor.u32 %v3497_v28, %v3061_v29  ;;  %v3056_v40 = vor.u32 %v3496_v32, %v3053_v33  ;;  %v3511_v24 = vld [vmem:[%s4810_s3 + $0x254] sm:$0xf0]  ;;  %v3129_v28 = vld [vmem:[%s4810_s3 + $0x258] sm:$0xf0]  ;;  %v3119_v29 = vld [vmem:[%s4810_s3 + $0x240] sm:$0xf] }
  0xfc   : > { %v974_v37 = vmul.f32 %v972_v36, %v4056_v19  ;;  %v2977_v19 = vld [vmem:[%s4810_s3 + $0x178] sm:$0xf0]  ;;  %v3043_v36 = vld [vmem:[%s4810_s3 + $0x1c8] sm:$0xf]  ;;  %v3136_v25 = vor.u32 %v3514_v16, %v3135_v15  ;;  %v3121_v32 = vld [vmem:[%s4810_s3 + $0x250] sm:$0xf0] }
  0xfd   : > { %v2980_v50 = vor.u32 %v3481_v42, %v2977_v19  ;;  %v3045_v42 = vld [vmem:[%s4810_s3 + $0x1d8] sm:$0xf0]  ;;  %v3035_v19 = vld [vmem:[%s4810_s3 + $0x1c0] sm:$0xf]  ;;  %v3526_v16 = vld [vmem:[%s4810_s3 + $0x2cc] sm:$0xf0] }
  0xfe   : > { %v4186_v38 = vpack.c.bf16 %v974_v37, %v974_v37  ;;  %v3495_v37 = vld [vmem:[%s4810_s3 + $0x1d4] sm:$0xf0]  ;;  %v3036_v52 = vor.u32 %v3494_v43, %v3035_v19  ;;  %v3506_v19 = vld [vmem:[%s4810_s3 + $0x22c] sm:$0xf0]  ;;  %v3504_v43 = vld [vmem:[%s4810_s3 + $0x224] sm:$0xf] }
  0xff   : > { %v3044_v47 = vor.u32 %v3495_v37, %v3043_v36  ;;  %v3507_v36 = vld [vmem:[%s4810_s3 + $0x234] sm:$0xf0]  ;;  %v3203_v15 = vld [vmem:[%s4810_s3 + $0x2c0] sm:$0xf] }
 0x100   : > { %v1010_v39 = vunpack.c.l.b16 %v4186_v38 }
 0x102   : > { %v4204_v44 = vpack.c.b16 %v1010_v39, %v1010_v39  ;;  %v3052_v39 = vor.u32 %v3498_v31, %v3051_v30  ;;  %v3510_v30 = vld [vmem:[%s4810_s3 + $0x24c] sm:$0xf0]  ;;  %v3508_v31 = vld [vmem:[%s4810_s3 + $0x244] sm:$0xf] }
 0x103   : > { %v3120_v37 = vor.u32 %v3510_v30, %v3119_v29  ;;  %v3522_v29 = vld [vmem:[%s4810_s3 + $0x2ac] sm:$0xf0]  ;;  %v3520_v30 = vld [vmem:[%s4810_s3 + $0x2a4] sm:$0xf] }
 0x104   : > { %v4216_v48 = vshrl.u32 %v4204_v44, 16  ;;  %v1303_v20 = vrot.slane %v4204_v44, 1 }
 0x106   : > { %2829 = vmatmul.msk.bf16.vlgmr.msra.gmra.mxu0 %vm1095_vm4, %v4216_v48  ;;  %2830 = vmatmul.msk.bf16.vlgmr.msra.gmra.mxu1 %vm1095_vm4, %v4216_v48  ;;  %v1460_v6 = vrot.slane %v4216_v48, 1 }
 0x107   : > { %2831 = vmatmul.msk.bf16.vlgmr.msra.gmra.mxu2 %vm1095_vm4, %v4216_v48  ;;  %2832 = vmatmul.msk.bf16.vlgmr.msra.gmra.mxu3 %vm1095_vm4, %v4216_v48 }
 0x108   : > { %1417 = vmatpush.bf16.msra.mxu2 %v2976_v49  ;;  %1430 = vmatpush.bf16.msra.mxu3 %v2980_v50  ;;  %v3048_v49 = vor.u32 %v3493_v41, %v3045_v42  ;;  %v3027_v50 = vld [vmem:[%s4810_s3 + $0x1a8] sm:$0xf]  ;;  %v3113_v41 = vld [vmem:[%s4810_s3 + $0x238] sm:$0xf0]  ;;  %v3103_v42 = vld [vmem:[%s4810_s3 + $0x220] sm:$0xf] }
 0x109   : > { %1391 = vmatpush.bf16.msra.mxu0 %v2968_v53  ;;  %1404 = vmatpush.bf16.msra.mxu1 %v2972_v54  ;;  %v3040_v53 = vor.u32 %v3492_v45, %v3037_v46  ;;  %v3029_v54 = vld [vmem:[%s4810_s3 + $0x1b8] sm:$0xf0]  ;;  %v3028_v59 = vor.u32 %v3491_v51, %v3027_v50  ;;  %v3105_v45 = vld [vmem:[%s4810_s3 + $0x230] sm:$0xf0]  ;;  %v3503_v50 = vld [vmem:[%s4810_s3 + $0x214] sm:$0xf0]  ;;  %v3104_v51 = vor.u32 %v3506_v19, %v3103_v42 }
 0x10a   : > { %v3518_v42 = vld [vmem:[%s4810_s3 + $0x28c] sm:$0xf0]  ;;  %v3516_v19 = vld [vmem:[%s4810_s3 + $0x284] sm:$0xf] }
 0x10c   : > { %1418 = vmatpush.bf16.msra.mxu2 %v2960_v61  ;;  %1431 = vmatpush.bf16.msra.mxu3 %v2964_v62  ;;  %v3011_v61 = vld [vmem:[%s4810_s3 + $0x188] sm:$0xf]  ;;  %v3487_v62 = vld [vmem:[%s4810_s3 + $0x194] sm:$0xf0] }
 0x10d   : > { %1392 = vmatpush.bf16.msra.mxu0 %v2952_v1  ;;  %1405 = vmatpush.bf16.msra.mxu1 %v2956_v2  ;;  %v3485_v1 = vld [vmem:[%s4810_s3 + $0x18c] sm:$0xf]  ;;  %v3013_v2 = vld [vmem:[%s4810_s3 + $0x198] sm:$0xf0]  ;;  %v3012_v7 = vor.u32 %v3487_v62, %v3011_v61  ;;  %v3531_v61 = vld [vmem:[%s4810_s3 + $0x2f4] sm:$0xf0] }
 0x10e   : > { %v3016_v8 = vor.u32 %v3485_v1, %v3013_v2  ;;  %v3229_v1 = vld [vmem:[%s4810_s3 + $0x2f8] sm:$0xf0]  ;;  %v3219_v2 = vld [vmem:[%s4810_s3 + $0x2e0] sm:$0xf] }
 0x110   : > { %1419 = vmatpush.bf16.msra.mxu2 %v2944_v9  ;;  %1432 = vmatpush.bf16.msra.mxu3 %v2948_v10  ;;  %v3143_v9 = vld [vmem:[%s4810_s3 + $0x268] sm:$0xf]  ;;  %v3515_v10 = vld [vmem:[%s4810_s3 + $0x274] sm:$0xf0] }
 0x111   : > { %1393 = vmatpush.bf16.msra.mxu0 %v2936_v13  ;;  %1406 = vmatpush.bf16.msra.mxu1 %v2940_v14  ;;  %v3513_v13 = vld [vmem:[%s4810_s3 + $0x26c] sm:$0xf]  ;;  %v3145_v14 = vld [vmem:[%s4810_s3 + $0x278] sm:$0xf0]  ;;  %v3144_v21 = vor.u32 %v3515_v10, %v3143_v9  ;;  %v3211_v9 = vld [vmem:[%s4810_s3 + $0x2c8] sm:$0xf] }
 0x112   : > { %v3527_v10 = vld [vmem:[%s4810_s3 + $0x2d4] sm:$0xf0] }
 0x114   : > { %1420 = vmatpush.bf16.msra.mxu2 %v2928_v22  ;;  %1433 = vmatpush.bf16.msra.mxu3 %v2932_v23  ;;  %v3148_v22 = vor.u32 %v3513_v13, %v3145_v14  ;;  %v3127_v23 = vld [vmem:[%s4810_s3 + $0x248] sm:$0xf]  ;;  %v3525_v13 = vld [vmem:[%s4810_s3 + $0x2cc] sm:$0xf]  ;;  %v3213_v14 = vld [vmem:[%s4810_s3 + $0x2d8] sm:$0xf0] }
 0x115   : > { %1394 = vmatpush.bf16.msra.mxu0 %v2920_v26  ;;  %1407 = vmatpush.bf16.msra.mxu1 %v2924_v27  ;;  %v3140_v26 = vor.u32 %v3512_v17, %v3137_v18  ;;  %v3509_v27 = vld [vmem:[%s4810_s3 + $0x24c] sm:$0xf]  ;;  %v3128_v33 = vor.u32 %v3511_v24, %v3127_v23  ;;  %v3524_v17 = vld [vmem:[%s4810_s3 + $0x2c4] sm:$0xf]  ;;  %v3205_v18 = vld [vmem:[%s4810_s3 + $0x2d0] sm:$0xf0]  ;;  %v3204_v24 = vor.u32 %v3526_v16, %v3203_v15 }
 0x116   : > { %2897 = vmatmul.msk.bf16.vlgmr.msrb.gmra.mxu0 %vm1095_vm4, %v4186_v38  ;;  %2898 = vmatmul.msk.bf16.vlgmr.msrb.gmra.mxu1 %vm1095_vm4, %v4186_v38  ;;  %v3523_v23 = vld [vmem:[%s4810_s3 + $0x2b4] sm:$0xf0] }
 0x117   : > { %2899 = vmatmul.msk.bf16.vlgmr.msrb.gmra.mxu2 %vm1095_vm4, %v4186_v38  ;;  %2900 = vmatmul.msk.bf16.vlgmr.msrb.gmra.mxu3 %vm1095_vm4, %v4186_v38  ;;  %v3489_v38 = vld [vmem:[%s4810_s3 + $0x1ac] sm:$0xf]  ;;  %v3539_v15 = vld [vmem:[%s4812_s5 + $0x38] sm:$0xff] }
 0x118   : > { %1574 = vmatpush.bf16.msrb.mxu2 %v3060_v34  ;;  %1587 = vmatpush.bf16.msrb.mxu3 %v3064_v35  ;;  %v3032_v60 = vor.u32 %v3489_v38, %v3029_v54  ;;  %v3132_v34 = vor.u32 %v3509_v27, %v3129_v28  ;;  %v3111_v35 = vld [vmem:[%s4810_s3 + $0x228] sm:$0xf]  ;;  %v3097_v38 = vld [vmem:[%s4810_s3 + $0x218] sm:$0xf0]  ;;  %v3087_v54 = vld [vmem:[%s4810_s3 + $0x200] sm:$0xf] }
 0x119   : > { %1548 = vmatpush.bf16.msrb.mxu0 %v3052_v39  ;;  %1561 = vmatpush.bf16.msrb.mxu1 %v3056_v40  ;;  %v3124_v39 = vor.u32 %v3508_v31, %v3121_v32  ;;  %v3505_v40 = vld [vmem:[%s4810_s3 + $0x22c] sm:$0xf]  ;;  %v3112_v46 = vor.u32 %v3507_v36, %v3111_v35  ;;  %v3088_v62 = vor.u32 %v3502_v55, %v3087_v54  ;;  %v3197_v27 = vld [vmem:[%s4810_s3 + $0x2b8] sm:$0xf0]  ;;  %v3187_v28 = vld [vmem:[%s4810_s3 + $0x2a0] sm:$0xf] }
 0x11a   : > { %v3189_v31 = vld [vmem:[%s4810_s3 + $0x2b0] sm:$0xf0]  ;;  %v3519_v35 = vld [vmem:[%s4810_s3 + $0x294] sm:$0xf0]  ;;  %v3188_v36 = vor.u32 %v3522_v29, %v3187_v28 }
 0x11b   : > { %v3547_v16 = vld [vmem:[%s4812_s5 + $0x78] sm:$0xff] }
 0x11c   : > { %1575 = vmatpush.bf16.msrb.mxu2 %v3044_v47  ;;  %1588 = vmatpush.bf16.msrb.mxu3 %v3048_v49  ;;  %v3116_v47 = vor.u32 %v3505_v40, %v3113_v41  ;;  %v3095_v49 = vld [vmem:[%s4810_s3 + $0x208] sm:$0xf]  ;;  %v3181_v40 = vld [vmem:[%s4810_s3 + $0x298] sm:$0xf0]  ;;  %v3171_v41 = vld [vmem:[%s4810_s3 + $0x280] sm:$0xf] }
 0x11d   : > { %1549 = vmatpush.bf16.msrb.mxu0 %v3036_v52  ;;  %1562 = vmatpush.bf16.msrb.mxu1 %v3040_v53  ;;  %v3108_v52 = vor.u32 %v3504_v43, %v3105_v45  ;;  %v3501_v53 = vld [vmem:[%s4810_s3 + $0x20c] sm:$0xf]  ;;  %v3096_v58 = vor.u32 %v3503_v50, %v3095_v49  ;;  %v3173_v43 = vld [vmem:[%s4810_s3 + $0x290] sm:$0xf0]  ;;  %v1617_v50 = vrot.slane %v4204_v44, 2 }
 0x11e   : > { %v3176_v49 = vor.u32 %v3516_v19, %v3173_v43  ;;  %v4679_v19 = vld [vmem:[%s4811_s4] sm:$0xf] }
 0x120   : > { %1576 = vmatpush.bf16.msrb.mxu2 %v3028_v59  ;;  %1589 = vmatpush.bf16.msrb.mxu3 %v3032_v60  ;;  %v3100_v59 = vor.u32 %v3501_v53, %v3097_v38  ;;  %v3227_v60 = vld [vmem:[%s4810_s3 + $0x2e8] sm:$0xf] }
 0x121   : > { %1550 = vmatpush.bf16.msrb.mxu0 %v3020_v63  ;;  %1563 = vmatpush.bf16.msrb.mxu1 %v3024_v0  ;;  %v3092_v63 = vor.u32 %v3500_v56, %v3089_v57  ;;  %v3529_v0 = vld [vmem:[%s4810_s3 + $0x2ec] sm:$0xf] }
 0x124   : > { %1577 = vmatpush.bf16.msrb.mxu2 %v3012_v7  ;;  %1590 = vmatpush.bf16.msrb.mxu3 %v3016_v8  ;;  %v3228_v7 = vor.u32 %v3531_v61, %v3227_v60  ;;  %v3232_v8 = vor.u32 %v3529_v0, %v3229_v1 }
 0x125   : > { %1551 = vmatpush.bf16.msrb.mxu0 %v3004_v11  ;;  %1564 = vmatpush.bf16.msrb.mxu1 %v3008_v12  ;;  %v3220_v11 = vor.u32 %v3530_v3, %v3219_v2  ;;  %v3224_v12 = vor.u32 %v3528_v4, %v3221_v5 }
 0x126   : > { %2981 = vmatmul.msk.bf16.vlgmr.msra.gmra.mxu0 %vm1095_vm4, %v1303_v20  ;;  %2982 = vmatmul.msk.bf16.vlgmr.msra.gmra.mxu1 %vm1095_vm4, %v1303_v20 }
 0x127   : > { %2983 = vmatmul.msk.bf16.vlgmr.msra.gmra.mxu2 %vm1095_vm4, %v1303_v20  ;;  %2984 = vmatmul.msk.bf16.vlgmr.msra.gmra.mxu3 %vm1095_vm4, %v1303_v20  ;;  %v3212_v20 = vor.u32 %v3527_v10, %v3211_v9 }
 0x128   : > { %1731 = vmatpush.bf16.msra.mxu2 %v3144_v21  ;;  %1744 = vmatpush.bf16.msra.mxu3 %v3148_v22  ;;  %v3216_v21 = vor.u32 %v3525_v13, %v3213_v14  ;;  %v3195_v22 = vld [vmem:[%s4810_s3 + $0x2a8] sm:$0xf] }
 0x129   : > { %1705 = vmatpush.bf16.msra.mxu0 %v3136_v25  ;;  %1718 = vmatpush.bf16.msra.mxu1 %v3140_v26  ;;  %v3208_v25 = vor.u32 %v3524_v17, %v3205_v18  ;;  %v3521_v26 = vld [vmem:[%s4810_s3 + $0x2ac] sm:$0xf]  ;;  %v3196_v32 = vor.u32 %v3523_v23, %v3195_v22  ;;  %v3538_v22 = vld [vmem:[%s4812_s5 + $0x30] sm:$0xff] }
 0x12a   : > { %v3546_v23 = vld [vmem:[%s4812_s5 + $0x70] sm:$0xff] }
 0x12c   : > { %1732 = vmatpush.bf16.msra.mxu2 %v3128_v33  ;;  %1745 = vmatpush.bf16.msra.mxu3 %v3132_v34  ;;  %v3200_v33 = vor.u32 %v3521_v26, %v3197_v27  ;;  %v3179_v34 = vld [vmem:[%s4810_s3 + $0x288] sm:$0xf] }
 0x12d   : > { %1706 = vmatpush.bf16.msra.mxu0 %v3120_v37  ;;  %1719 = vmatpush.bf16.msra.mxu1 %v3124_v39  ;;  %v3192_v37 = vor.u32 %v3520_v30, %v3189_v31  ;;  %v3517_v39 = vld [vmem:[%s4810_s3 + $0x28c] sm:$0xf]  ;;  %v3180_v45 = vor.u32 %v3519_v35, %v3179_v34  ;;  %v3554_v30 = vld [vmem:[%s4812_s5 + $0xb0] sm:$0xff] }
 0x12e   : > { %v3537_v26 = vld [vmem:[%s4812_s5 + $0x28] sm:$0xff]  ;;  %v3562_v31 = vld [vmem:[%s4812_s5 + $0xf0] sm:$0xff] }
 0x12f   : > { %v3545_v27 = vld [vmem:[%s4812_s5 + $0x68] sm:$0xff] }
 0x130   : > { %1733 = vmatpush.bf16.msra.mxu2 %v3112_v46  ;;  %1746 = vmatpush.bf16.msra.mxu3 %v3116_v47  ;;  %v3184_v46 = vor.u32 %v3517_v39, %v3181_v40  ;;  %v3172_v47 = vor.u32 %v3518_v42, %v3171_v41  ;;  %v3553_v41 = vld [vmem:[%s4812_s5 + $0xa8] sm:$0xff] }
 0x131   : > { %1707 = vmatpush.bf16.msra.mxu0 %v3104_v51  ;;  %1720 = vmatpush.bf16.msra.mxu1 %v3108_v52  ;;  %v1774_v51 = vrot.slane %v4216_v48, 2  ;;  %v3561_v42 = vld [vmem:[%s4812_s5 + $0xe8] sm:$0xff] }
 0x134   : > { %1734 = vmatpush.bf16.msra.mxu2 %v3096_v58  ;;  %1747 = vmatpush.bf16.msra.mxu3 %v3100_v59 }
 0x135   : > { %1708 = vmatpush.bf16.msra.mxu0 %v3088_v62  ;;  %1721 = vmatpush.bf16.msra.mxu1 %v3092_v63 }
 0x136   : > { %3065 = vmatmul.msk.bf16.vlgmr.msrb.gmra.mxu0 %vm1095_vm4, %v1460_v6  ;;  %3066 = vmatmul.msk.bf16.vlgmr.msrb.gmra.mxu1 %vm1095_vm4, %v1460_v6 }
 0x137   : > { %3067 = vmatmul.msk.bf16.vlgmr.msrb.gmra.mxu2 %vm1095_vm4, %v1460_v6  ;;  %3068 = vmatmul.msk.bf16.vlgmr.msrb.gmra.mxu3 %vm1095_vm4, %v1460_v6 }
 0x138   : > { %1888 = vmatpush.bf16.msrb.mxu2 %v3228_v7  ;;  %1901 = vmatpush.bf16.msrb.mxu3 %v3232_v8 }
 0x139   : > { %1862 = vmatpush.bf16.msrb.mxu0 %v3220_v11  ;;  %1875 = vmatpush.bf16.msrb.mxu1 %v3224_v12 }
 0x13c   : > { %1889 = vmatpush.bf16.msrb.mxu2 %v3212_v20  ;;  %1902 = vmatpush.bf16.msrb.mxu3 %v3216_v21 }
 0x13d   : > { %1863 = vmatpush.bf16.msrb.mxu0 %v3204_v24  ;;  %1876 = vmatpush.bf16.msrb.mxu1 %v3208_v25  ;;  %v3555_v24 = vld [vmem:[%s4812_s5 + $0xb8] sm:$0xff] }
 0x13e   : > { %v3563_v25 = vld [vmem:[%s4812_s5 + $0xf8] sm:$0xff] }
 0x140   : > { %1890 = vmatpush.bf16.msrb.mxu2 %v3196_v32  ;;  %1903 = vmatpush.bf16.msrb.mxu3 %v3200_v33 }
 0x141   : > { %1864 = vmatpush.bf16.msrb.mxu0 %v3188_v36  ;;  %1877 = vmatpush.bf16.msrb.mxu1 %v3192_v37  ;;  %v3536_v36 = vld [vmem:[%s4812_s5 + $0x20] sm:$0xff] }
 0x142   : > { %v3544_v37 = vld [vmem:[%s4812_s5 + $0x60] sm:$0xff] }
 0x144   : > { %1891 = vmatpush.bf16.msrb.mxu2 %v3180_v45  ;;  %1904 = vmatpush.bf16.msrb.mxu3 %v3184_v46  ;;  %v3535_v46 = vld [vmem:[%s4812_s5 + $0x18] sm:$0xff] }
 0x145   : > { %1865 = vmatpush.bf16.msrb.mxu0 %v3172_v47  ;;  %1878 = vmatpush.bf16.msrb.mxu1 %v3176_v49  ;;  %v3543_v47 = vld [vmem:[%s4812_s5 + $0x58] sm:$0xff] }
 0x146   : > { %3149 = vmatmul.msk.bf16.vlgmr.msra.gmra.mxu0 %vm1095_vm4, %v1617_v50  ;;  %3150 = vmatmul.msk.bf16.vlgmr.msra.gmra.mxu1 %vm1095_vm4, %v1617_v50 }
 0x147   : > { %3151 = vmatmul.msk.bf16.vlgmr.msra.gmra.mxu2 %vm1095_vm4, %v1617_v50  ;;  %3152 = vmatmul.msk.bf16.vlgmr.msra.gmra.mxu3 %vm1095_vm4, %v1617_v50 }
 0x148   : > { %2295 = vmatpush.bf16.msra.mxu2 %v3555_v24  ;;  %2308 = vmatpush.bf16.msra.mxu3 %v3563_v25  ;;  %v3540_v24 = vld [vmem:[%s4812_s5 + $0x40] sm:$0xff] }
 0x149   : > { %2269 = vmatpush.bf16.msra.mxu0 %v3539_v15  ;;  %2282 = vmatpush.bf16.msra.mxu1 %v3547_v16  ;;  %v3550_v16 = vld [vmem:[%s4812_s5 + $0x90] sm:$0xff] }
 0x14c   : > { %2296 = vmatpush.bf16.msra.mxu2 %v3554_v30  ;;  %2309 = vmatpush.bf16.msra.mxu3 %v3562_v31 }
 0x14d   : > { %2270 = vmatpush.bf16.msra.mxu0 %v3538_v22  ;;  %2283 = vmatpush.bf16.msra.mxu1 %v3546_v23  ;;  %v3532_v23 = vld [vmem:[%s4812_s5] sm:$0xff] }
 0x150   : > { %2297 = vmatpush.bf16.msra.mxu2 %v3553_v41  ;;  %2310 = vmatpush.bf16.msra.mxu3 %v3561_v42 }
 0x151   : > { %2271 = vmatpush.bf16.msra.mxu0 %v3537_v26  ;;  %2284 = vmatpush.bf16.msra.mxu1 %v3545_v27  ;;  %v3549_v27 = vld [vmem:[%s4812_s5 + $0x88] sm:$0xff] }
 0x155   : > { %2272 = vmatpush.bf16.msra.mxu0 %v3536_v36  ;;  %2285 = vmatpush.bf16.msra.mxu1 %v3544_v37 }
 0x156   : > { %3233 = vmatmul.msk.bf16.vlgmr.msrb.gmra.mxu0 %vm1095_vm4, %v1774_v51  ;;  %3234 = vmatmul.msk.bf16.vlgmr.msrb.gmra.mxu1 %vm1095_vm4, %v1774_v51 }
 0x157   : > { %3235 = vmatmul.msk.bf16.vlgmr.msrb.gmra.mxu2 %vm1095_vm4, %v1774_v51  ;;  %3236 = vmatmul.msk.bf16.vlgmr.msrb.gmra.mxu3 %vm1095_vm4, %v1774_v51 }
 0x159   : > { %2273 = vmatpush.bf16.msra.mxu0 %v3535_v46  ;;  %2286 = vmatpush.bf16.msra.mxu1 %v3543_v47 }
 0x183   : > { %v1108_v44 = vpop.f32.mrf.mxu0  ;;  %v1121_v52 = vpop.f32.mrf.mxu1 }
 0x18a   : > { %v4614_v53 = vpop.f32.mrf.mxu2  ;;  %v4616_v38 = vpop.f32.mrf.mxu3 }
 0x18b   : > { %v1110_v54 = vpop.f32.mrf.mxu0  ;;  %v1123_v55 = vpop.f32.mrf.mxu1 }
 0x18c   : > { %v1917_v54 = vperm.slane %v4679_v19, 1  ;;  %v3552_v55 = vld [vmem:[%s4812_s5 + $0xa0] sm:$0xff] }
 0x18d   : > { %2298 = vmatpush.bf16.msra.mxu2 %v3552_v55 }
 0x192   : > { %v1136_v56 = vpop.f32.mrf.mxu2  ;;  %v1149_v57 = vpop.f32.mrf.mxu3 }
 0x193   : > { %v1243_v58 = vpop.f32.mrf.mxu0  ;;  %v1256_v48 = vpop.f32.mrf.mxu1  ;;  %v3560_v56 = vld [vmem:[%s4812_s5 + $0xe0] sm:$0xff] }
 0x194   : > { %v1244_v34 = vadd.f32 %v1243_v58, %v1108_v44  ;;  %v1257_v35 = vadd.f32 %v1256_v48, %v1121_v52  ;;  %v1916_v52 = vperm.slane %v4679_v19, 0  ;;  %2311 = vmatpush.bf16.msra.mxu3 %v3560_v56 }
 0x19a   : > { %v4618_v59 = vpop.f32.mrf.mxu2  ;;  %v4620_v60 = vpop.f32.mrf.mxu3 }
 0x19b   : > { %v1245_v61 = vpop.f32.mrf.mxu0  ;;  %v1258_v62 = vpop.f32.mrf.mxu1  ;;  %v1270_v57 = vadd.f32 %v4618_v59, %v4614_v53  ;;  %v1283_v58 = vadd.f32 %v4620_v60, %v4616_v38  ;;  %v3551_v60 = vld [vmem:[%s4812_s5 + $0x98] sm:$0xff] }
 0x19c   : > { %2299 = vmatpush.bf16.msra.mxu2 %v3551_v60 }
 0x1a0   : > { %2300 = vmatpush.bf16.msra.mxu2 %v3550_v16 }
 0x1a2   : > { %v1271_v63 = vpop.f32.mrf.mxu2  ;;  %v1284_v0 = vpop.f32.mrf.mxu3 }
 0x1a3   : > { %v1396_v1 = vpop.f32.mrf.mxu0  ;;  %v1409_v2 = vpop.f32.mrf.mxu1  ;;  %v3534_v0 = vld [vmem:[%s4812_s5 + $0x10] sm:$0xff] }
 0x1a4   : > { %v1439_v39 = vadd.f32 %v1396_v1, %v1244_v34  ;;  %v1440_v40 = vadd.f32 %v1409_v2, %v1257_v35  ;;  %v3542_v1 = vld [vmem:[%s4812_s5 + $0x50] sm:$0xff]  ;;  %2274 = vmatpush.bf16.msra.mxu0 %v3534_v0  ;;  %2301 = vmatpush.bf16.msra.mxu2 %v3549_v27 }
 0x1a5   : > { %2287 = vmatpush.bf16.msra.mxu1 %v3542_v1 }
 0x1aa   : > { %v4622_v3 = vpop.f32.mrf.mxu2  ;;  %v4624_v4 = vpop.f32.mrf.mxu3 }
 0x1ab   : > { %v1398_v5 = vpop.f32.mrf.mxu0  ;;  %v1411_v6 = vpop.f32.mrf.mxu1  ;;  %v1441_v2 = vadd.f32 %v4622_v3, %v1270_v57  ;;  %v1442_v53 = vadd.f32 %v4624_v4, %v1283_v58 }
 0x1ac   : > { %v3559_v5 = vld [vmem:[%s4812_s5 + $0xd8] sm:$0xff] }
 0x1ad   : > { %2312 = vmatpush.bf16.msra.mxu3 %v3559_v5 }
 0x1b2   : > { %v1424_v7 = vpop.f32.mrf.mxu2  ;;  %v1437_v8 = vpop.f32.mrf.mxu3 }
 0x1b3   : > { %v1553_v9 = vpop.f32.mrf.mxu0  ;;  %v1566_v10 = vpop.f32.mrf.mxu1  ;;  %v3533_v8 = vld [vmem:[%s4812_s5 + $0x8] sm:$0xff] }
 0x1b4   : > { %v1596_v43 = vadd.f32 %v1553_v9, %v1439_v39  ;;  %v1597_v45 = vadd.f32 %v1566_v10, %v1440_v40  ;;  %v3541_v9 = vld [vmem:[%s4812_s5 + $0x48] sm:$0xff]  ;;  %2275 = vmatpush.bf16.msra.mxu0 %v3533_v8 }
 0x1b5   : > { %2288 = vmatpush.bf16.msra.mxu1 %v3541_v9 }
 0x1b8   : > { %2276 = vmatpush.bf16.msra.mxu0 %v3532_v23 }
 0x1b9   : > { %2289 = vmatpush.bf16.msra.mxu1 %v3540_v24 }
 0x1ba   : > { %v4626_v11 = vpop.f32.mrf.mxu2  ;;  %v4628_v12 = vpop.f32.mrf.mxu3 }
 0x1bb   : > { %v1555_v13 = vpop.f32.mrf.mxu0  ;;  %v1568_v14 = vpop.f32.mrf.mxu1  ;;  %v1598_v6 = vadd.f32 %v4626_v11, %v1441_v2  ;;  %v1599_v3 = vadd.f32 %v4628_v12, %v1442_v53  ;;  %v1918_v12 = vperm.slane %v4679_v19, 2 }
 0x1bc   : > { %v1919_v13 = vperm.slane %v4679_v19, 3 }
 0x1c2   : > { %v1581_v17 = vpop.f32.mrf.mxu2  ;;  %v1594_v18 = vpop.f32.mrf.mxu3 }
 0x1c3   : > { %v1710_v20 = vpop.f32.mrf.mxu0  ;;  %v1723_v21 = vpop.f32.mrf.mxu1  ;;  %v3558_v17 = vld [vmem:[%s4812_s5 + $0xd0] sm:$0xff] }
 0x1c4   : > { %v1753_v49 = vadd.f32 %v1710_v20, %v1596_v43  ;;  %v1754_v50 = vadd.f32 %v1723_v21, %v1597_v45  ;;  %2313 = vmatpush.bf16.msra.mxu3 %v3558_v17 }
 0x1ca   : > { %v4654_v28 = vpop.f32.mrf.mxu2  ;;  %v4656_v29 = vpop.f32.mrf.mxu3 }
 0x1cb   : > { %v1712_v32 = vpop.f32.mrf.mxu0  ;;  %v1725_v33 = vpop.f32.mrf.mxu1  ;;  %v1755_v10 = vadd.f32 %v4654_v28, %v1598_v6  ;;  %v1756_v11 = vadd.f32 %v4656_v29, %v1599_v3  ;;  %v3557_v28 = vld [vmem:[%s4812_s5 + $0xc8] sm:$0xff] }
 0x1cc   : > { %2314 = vmatpush.bf16.msra.mxu3 %v3557_v28  ;;  %v3548_v32 = vld [vmem:[%s4812_s5 + $0x80] sm:$0xff] }
 0x1cd   : > { %v3556_v33 = vld [vmem:[%s4812_s5 + $0xc0] sm:$0xff]  ;;  %2302 = vmatpush.bf16.msra.mxu2 %v3548_v32 }
 0x1d0   : > { %2315 = vmatpush.bf16.msra.mxu3 %v3556_v33 }
 0x1d2   : > { %v1738_v51 = vpop.f32.mrf.mxu2  ;;  %v1751_v44 = vpop.f32.mrf.mxu3 }
 0x1d3   : > { %v1867_v48 = vpop.f32.mrf.mxu0  ;;  %v1880_v61 = vpop.f32.mrf.mxu1 }
 0x1d4   : > { %v1910_v62 = vadd.f32 %v1867_v48, %v1753_v49  ;;  %v1911_v63 = vadd.f32 %v1880_v61, %v1754_v50 }
 0x1d6   : > { %v4707_v59 = vadd.f32 %v1916_v52, %v1910_v62  ;;  %v4709_v38 = vadd.f32 %v1917_v54, %v1911_v63 }
 0x1d8   : > { %v3237_v4 = vmul.f32 -1.442695, %v4707_v59  ;;  %v3238_v7 = vmul.f32 -1.442695, %v4709_v38 }
 0x1da   : > { %3608 = vpow2.f32 %v3237_v4  ;;  %v1893_v14 = vpop.f32.mrf.mxu2  ;;  %v1906_v15 = vpop.f32.mrf.mxu3 }
 0x1db   : > { %3610 = vpow2.f32 %v3238_v7  ;;  %v1912_v18 = vadd.f32 %v1893_v14, %v1755_v10  ;;  %v1913_v20 = vadd.f32 %v1906_v15, %v1756_v11  ;;  %v1869_v21 = vpop.f32.mrf.mxu0  ;;  %v1882_v22 = vpop.f32.mrf.mxu1 }
 0x1dd   : > { %v4743_v25 = vadd.f32 %v1918_v12, %v1912_v18  ;;  %v4745_v26 = vadd.f32 %v1919_v13, %v1913_v20 }
 0x1df   : > { %v3239_v29 = vmul.f32 -1.442695, %v4743_v25  ;;  %v3240_v30 = vmul.f32 -1.442695, %v4745_v26 }
 0x1e0   : > { %v3609_v31 = vpop.eup %3608 }
 0x1e1   : > { %v3611_v34 = vpop.eup %3610  ;;  %v1940_v35 = vadd.f32 1.0, %v3609_v31  ;;  %3612 = vpow2.f32 %v3239_v29  ;;  %v2076_v31 = vld [vmem:[%s4813_s6] sm:$0x1] }
 0x1e2   : > { %v1941_v36 = vadd.f32 1.0, %v3611_v34  ;;  %3614 = vpow2.f32 %v3240_v30  ;;  %v1895_v37 = vpop.f32.mrf.mxu2  ;;  %v1908_v39 = vpop.f32.mrf.mxu3 }
 0x1e3   : > { %3616 = vrcp.f32 %v1940_v35  ;;  %v1953_v50 = vand.u32 2147483647, %v1940_v35  ;;  %v1955_v51 = vand.u32 2147483648, %v1940_v35  ;;  %vm1949_vm7 = vweird.f32 %v1940_v35 }
 0x1e4   : > { %3618 = vrcp.f32 %v1941_v36  ;;  %v1968_v54 = vand.u32 2147483647, %v1941_v36  ;;  %v1970_v55 = vand.u32 2147483648, %v1941_v36  ;;  %vm1964_vm9 = vweird.f32 %v1941_v36 }
 0x1e5   : > { %v1956_v48 = vor.u32 1.1754944e-38, %v1955_v51  ;;  %vm1954_vm10 = vcmp.eq.f32.partialorder %v1953_v50, 8.507059e+37 }
 0x1e6   : > { %vm1969_vm12 = vcmp.eq.f32.partialorder %v1968_v54, 8.507059e+37  ;;  %v1971_v1 = vor.u32 1.1754944e-38, %v1970_v55 }
 0x1e7   : > { %v3613_v40 = vpop.eup %3612 }
 0x1e8   : > { %v3615_v41 = vpop.eup %3614  ;;  %v1942_v42 = vadd.f32 1.0, %v3613_v40 }
 0x1e9   : > { %v3617_v19 = vpop.eup %3616  ;;  %v4761_v43 = vadd.f32 1.0, %v3615_v41 }
 0x1ea   : > { %v3619_v45 = vpop.eup %3618  ;;  %v1945_v46 = vmul.f32 %v3617_v19, %v1940_v35  ;;  %3620 = vrcp.f32 %v1942_v42  ;;  %vm1950_vm5 = vweird.f32 %v3617_v19  ;;  %v1983_v4 = vand.u32 2147483647, %v1942_v42 }
 0x1eb   : > { %v1960_v47 = vmul.f32 %v3619_v45, %v1941_v36  ;;  %3622 = vrcp.f32 %v4761_v43  ;;  %vm1965_vm6 = vweird.f32 %v3619_v45  ;;  %vm1951_vm8 = vmor %vm1949_vm7, %vm1950_vm5  ;;  %v1985_v7 = vand.u32 2147483648, %v1942_v42 }
 0x1ec   : > { %v1946_v49 = vsub.f32 1.0, %v1945_v46  ;;  %vm1966_vm11 = vmor %vm1964_vm9, %vm1965_vm6  ;;  %vm1979_vm14 = vweird.f32 %v1942_v42  ;;  %v1998_v12 = vand.u32 2147483647, %v4761_v43  ;;  %v2000_v13 = vand.u32 2147483648, %v4761_v43 }
 0x1ed   : > { %v1961_v44 = vsub.f32 1.0, %v1960_v47  ;;  %vm1984_vm1 = vcmp.eq.f32.partialorder %v1983_v4, 8.507059e+37  ;;  %vm1994_vm2 = vweird.f32 %v4761_v43 }
 0x1ee   : > { %v1947_v52 = vmul.f32 %v3617_v19, %v1946_v49  ;;  %v2001_v20 = vor.u32 1.1754944e-38, %v2000_v13  ;;  %vm1999_vm4 = vcmp.eq.f32.partialorder %v1998_v12, 8.507059e+37 }
 0x1ef   : > { %v1962_v56 = vmul.f32 %v3619_v45, %v1961_v44 }
 0x1f0   : > { %v3621_v57 = vpop.eup %3620  ;;  %v1948_v58 = vadd.f32 %v3617_v19, %v1947_v52 }
 0x1f1   : > { %v1963_v61 = vadd.f32 %v3619_v45, %v1962_v56  ;;  %v1975_v62 = vmul.f32 %v3621_v57, %v1942_v42  ;;  %v3623_v63 = vpop.eup %3622  ;;  %vm1980_vm13 = vweird.f32 %v3621_v57 }
 0x1f2   : > { %v1952_v0 = vsel %vm1951_vm8, %v3617_v19, %v1948_v58  ;;  %v1990_v5 = vmul.f32 %v3623_v63, %v4761_v43  ;;  %vm1995_vm15 = vweird.f32 %v3623_v63  ;;  %vm1981_vm0 = vmor %vm1979_vm14, %vm1980_vm13 }
 0x1f3   : > { %v1957_v2 = vsel %vm1954_vm10, %v1956_v48, %v1952_v0  ;;  %v1967_v53 = vsel %vm1966_vm11, %v3619_v45, %v1963_v61  ;;  %v1976_v60 = vsub.f32 1.0, %v1975_v62  ;;  %vm1996_vm3 = vmor %vm1994_vm2, %vm1995_vm15 }
 0x1f4   : > { %v2004_v6 = vmul.f32 %v1957_v2, %v4707_v59  ;;  %v1972_v3 = vsel %vm1969_vm12, %v1971_v1, %v1967_v53  ;;  %v1991_v10 = vsub.f32 1.0, %v1990_v5  ;;  %v1986_v59 = vor.u32 1.1754944e-38, %v1985_v7 }
 0x1f5   : > { %v2005_v8 = vmul.f32 %v1972_v3, %v4709_v38  ;;  %v1977_v9 = vmul.f32 %v3621_v57, %v1976_v60 }
 0x1f6   : > { %v2008_v11 = vpack.c.bf16 %v2004_v6, %v2004_v6  ;;  %v1992_v16 = vmul.f32 %v3623_v63, %v1991_v10 }
 0x1f7   : > { %v2009_v14 = vpack.c.bf16 %v2005_v8, %v2005_v8  ;;  %v1978_v15 = vadd.f32 %v3621_v57, %v1977_v9 }
 0x1f8   : > { %2277 = vmatmul.bf16.vlgmr.msra.gmra.mxu0 %v2008_v11  ;;  %v1993_v18 = vadd.f32 %v3623_v63, %v1992_v16 }
 0x1f9   : > { %v1982_v17 = vsel %vm1981_vm0, %v3621_v57, %v1978_v15  ;;  %2290 = vmatmul.bf16.vlgmr.msra.gmra.mxu1 %v2009_v14 }
 0x1fa   : > { %v1987_v38 = vsel %vm1984_vm1, %v1986_v59, %v1982_v17  ;;  %v1997_v22 = vsel %vm1996_vm3, %v3623_v63, %v1993_v18 }
 0x1fb   : > { %v2006_v21 = vmul.f32 %v1987_v38, %v4743_v25  ;;  %v2002_v23 = vsel %vm1999_vm4, %v2001_v20, %v1997_v22 }
 0x1fc   : > { %v2007_v27 = vmul.f32 %v2002_v23, %v4745_v26 }
 0x1fd   : > { %v2010_v24 = vpack.c.bf16 %v2006_v21, %v2006_v21 }
 0x1fe   : > { %v2011_v28 = vpack.c.bf16 %v2007_v27, %v2007_v27 }
 0x1ff   : > { %2303 = vmatmul.bf16.vlgmr.msra.gmra.mxu2 %v2010_v24 }
 0x200   : > { %2316 = vmatmul.bf16.vlgmr.msra.gmra.mxu3 %v2011_v28 }
 0x275   : > { %v2278_v29 = vpop.f32.mrf.mxu0 }
 0x276   : > { %v2291_v30 = vpop.f32.mrf.mxu1  ;;  %v2279_v32 = vadd.f32 %v2278_v29, %v2076_v31 }
 0x278   : > { %v2292_v34 = vadd.f32 %v2291_v30, %v2279_v32 }
 0x27d   : > { %v2280_v33 = vpop.f32.mrf.mxu0 }
 0x27e   : > { %v2293_v25 = vpop.f32.mrf.mxu1 }
 0x282   : > { %v2304_v26 = vpop.f32.mrf.mxu2 }
 0x283   : > { %v2305_v35 = vadd.f32 %v2304_v26, %v2292_v34  ;;  %v2317_v36 = vpop.f32.mrf.mxu3 }
 0x285   : > { %v2318_v37 = vadd.f32 %v2317_v36, %v2305_v35 }
 0x287   : > { %2321 = vst [vmem:[%s270_s18] sm:$0x1] %v2318_v37 }
 0x288   : > { %3651 = shalt.err (!%p3648_p3)
}
 0x289   : > { %3564 = dma.vmem_to_hbm [thread:$0]  (%p3766_p5), %s2334_s21, 16, %s2336_s22, %s2323_s23  }
 0x28a   : > { %v2306_v39 = vpop.f32.mrf.mxu2 }
 0x28b   : > { %v2319_v40 = vpop.f32.mrf.mxu3 }
 0x28c PF: > { %p3570_p4 = scmp.ge.s32.totalorder %s3686_s27, 2  ;;  %s2347_s17 = sand.u32 1, %s3674_s24  }
 0x28d   : > { %s2348_s19 = scalar_lea.sflag [#allocation3], %s2347_s17 }
 0x28e   : > { %p3567_p7 = pnand %p3570_p4, %p3770_p6 }
 0x290   : > { %p3568_p8 = pneg %p3567_p7 }
 0x292   : > { %3669 = dma.done.wait (%p3568_p8), %s2348_s19, 16  }
 0x293   : > { %3671 = vsyncadd (%p3568_p8), %s2348_s19, 4294967280  ;;  %p17_p5 = scmp.ge.s32.totalorder %s3753_s30, 4   ;;  %s4817_s24 = smov %s3678_s25 }
 0x294   : > { %s4818_s25 = smov %s3682_s26  ;;  %s4819_s26 = smov %s3764_s10 }
 0x295   : > { %s4820_s27 = smov %s3753_s30  ;;  %19 = sbr.rel (!%p17_p5) target bundleno = 3 (0x3), region = 91 }
 0x29a   :  { %2353 = vsyncpa [#allocation3], 1 }
 0x29b   :  { %2355 = vsyncpa [#allocation3 + $0x1], 1 }

</bundles_post_ra>
